<compile_context>
chip_gen: v6e
topology: v6e:2x2x1
jax: 0.10.0
libtpu: 0.0.40
codegen_flags: <defaults>
</compile_context>

<pallas_src>
import jax
import jax.numpy as jnp
from jax.experimental import pallas as pl
from jax.experimental.pallas import tpu as pltpu

Z_DIM = 32     # z_dim (channel count)
SEQ_LEN = 128  # input length; divisible by 2**4 (four stride-2 downsamples)
BATCH = 2
N_CONV = 16    # 4 levels * (1 down + 2 residual convs) + 2 heads * 2 convs


# ----------------------------- in-kernel helpers -----------------------------

def _swish(x):
    return x * jax.nn.sigmoid(x)


# ----------------------------- fused pallas kernel ----------------------------

def _encoder_kernel(xp_ref, w_ref, b_ref, mu_ref, lv_ref, a0_ref, a1_ref, a2_ref):
    """One grid step = the full encoder forward for one batch element.

    xp_ref : (L/2, 2C)  input with even/odd taps packed along lanes
    w_ref  : (16, 3C, C) per-layer conv weights, [W0; W1; W2] stacked on the contraction axis
    b_ref  : (16, 1, C)  per-layer biases
    mu_ref, lv_ref : (L/16, C) condition_mean / condition_var outputs
    a0_ref, a1_ref, a2_ref : (L/2, C), (L/4, C), (L/8, C) level activations (xs outputs),
        also reused in-kernel as the VMEM-resident inputs of the next downsampling conv.
    """
    C = w_ref.shape[-1]

    def conv_s1(x, idx):
        # Conv1d(k=3, stride=1, pad=1) as ONE (L, 3C) @ (3C, C) matmul.
        zero = jnp.zeros((1, C), jnp.float32)
        x_prev = jnp.concatenate([zero, x[:-1, :]], axis=0)       # x[l-1]
        x_next = jnp.concatenate([x[1:, :], zero], axis=0)        # x[l+1]
        taps = jnp.concatenate([x_prev, x, x_next], axis=-1)      # (L, 3C)
        return jnp.dot(taps, w_ref[idx],
                       preferred_element_type=jnp.float32) + b_ref[idx]

    def down(x_even, x_odd, idx):
        # Conv1d(k=3, stride=2, pad=1) -> Swish, as ONE (Lo, 3C) @ (3C, C) matmul.
        # out[l] = W0.x[2l-1] + W1.x[2l] + W2.x[2l+1]  (zero-padded)
        zero = jnp.zeros((1, C), jnp.float32)
        x_odd_prev = jnp.concatenate([zero, x_odd[:-1, :]], axis=0)   # x[2l-1]
        taps = jnp.concatenate([x_odd_prev, x_even, x_odd], axis=-1)  # (Lo, 3C)
        y = jnp.dot(taps, w_ref[idx],
                    preferred_element_type=jnp.float32) + b_ref[idx]
        return _swish(y)

    def down_from_ref(src_ref, idx):
        Lo = src_ref.shape[0] // 2
        x_even = src_ref[pl.ds(0, Lo, stride=2), :].astype(jnp.float32)  # x[2l]
        x_odd = src_ref[pl.ds(1, Lo, stride=2), :].astype(jnp.float32)   # x[2l+1]
        return down(x_even, x_odd, idx)

    def residual(x, idx):
        h = _swish(conv_s1(x, idx))
        h = conv_s1(h, idx + 1)
        return x + h

    # weight indices: level i -> down = 3i, residual convs = 3i+1, 3i+2 ; heads -> 12..15

    # ---- level 0 (input arrives pre-packed: lanes [0:C] = even rows, [C:2C] = odd rows)
    xp = xp_ref[...].astype(jnp.float32)
    h = down(xp[:, :C], xp[:, C:], 0)
    h = residual(h, 1)
    a0_ref[...] = h.astype(a0_ref.dtype)

    # ---- level 1 (reads level-0 activation straight back out of its VMEM output ref)
    h = residual(down_from_ref(a0_ref, 3), 4)
    a1_ref[...] = h.astype(a1_ref.dtype)

    # ---- level 2
    h = residual(down_from_ref(a1_ref, 6), 7)
    a2_ref[...] = h.astype(a2_ref.dtype)

    # ---- level 3 (only feeds the heads; stays in registers)
    h3 = residual(down_from_ref(a2_ref, 9), 10)

    # ---- fused condition_mean / condition_var heads (share h3)
    m = _swish(conv_s1(h3, 12))
    mu_ref[...] = jnp.maximum(conv_s1(m, 13), 0.0).astype(mu_ref.dtype)
    v = _swish(conv_s1(h3, 14))
    lv_ref[...] = jnp.maximum(conv_s1(v, 15), 0.0).astype(lv_ref.dtype)


# ----------------------------- wrapper ----------------------------------------

def _pack_params(params, C):
    """Stack all 16 convs: weights -> (16, 3C, C) with [W0; W1; W2] rows, biases -> (16, 1, C)."""
    ws, bs = [], []

    def add(w, b):
        ws.append(w.reshape(3 * C, C))
        bs.append(b.reshape(1, C))

    for i in range(4):
        add(*params["down"][i])                 # index 3i
        w1, b1, w2, b2 = params["res"][i]
        add(w1, b1)                             # index 3i + 1
        add(w2, b2)                             # index 3i + 2
    for head in ("mean", "var"):                # indices 12,13 then 14,15
        w1, b1, w2, b2 = params[head]
        add(w1, b1)
        add(w2, b2)
    return jnp.stack(ws, axis=0), jnp.stack(bs, axis=0)


@jax.jit
def encoder_forward(x, params):
    """Mirrors Encoder.forward: 4x (EncoderBlock -> ResidualBlock), two condition heads."""
    N, L, C = x.shape
    w_all, b_all = _pack_params(params, C)
    xp = x.reshape(N, L // 2, 2 * C)   # free view: even/odd taps packed along the lane axis

    out_shape = (
        jax.ShapeDtypeStruct((N, L // 16, C), x.dtype),   # mu
        jax.ShapeDtypeStruct((N, L // 16, C), x.dtype),   # log_var
        jax.ShapeDtypeStruct((N, L // 2, C), x.dtype),    # level-0 activation
        jax.ShapeDtypeStruct((N, L // 4, C), x.dtype),    # level-1 activation
        jax.ShapeDtypeStruct((N, L // 8, C), x.dtype),    # level-2 activation
    )
    mu, log_var, a0, a1, a2 = pl.pallas_call(
        _encoder_kernel,
        out_shape=out_shape,
        grid=(N,),
        in_specs=[
            pl.BlockSpec((None, L // 2, 2 * C), lambda n: (n, 0, 0)),
            pl.BlockSpec((N_CONV, 3 * C, C), lambda n: (0, 0, 0)),   # weights: VMEM-resident
            pl.BlockSpec((N_CONV, 1, C), lambda n: (0, 0, 0)),       # biases:  VMEM-resident
        ],
        out_specs=(
            pl.BlockSpec((None, L // 16, C), lambda n: (n, 0, 0)),
            pl.BlockSpec((None, L // 16, C), lambda n: (n, 0, 0)),
            pl.BlockSpec((None, L // 2, C), lambda n: (n, 0, 0)),
            pl.BlockSpec((None, L // 4, C), lambda n: (n, 0, 0)),
            pl.BlockSpec((None, L // 8, C), lambda n: (n, 0, 0)),
        ),
        compiler_params=pltpu.CompilerParams(
            dimension_semantics=("parallel",),   # one batch per TensorCore on v7x
        ),
    )(xp, w_all, b_all)
    # Encoder.forward returns xs[:-1][::-1] = [level2, level1, level0]
    return mu, log_var, [a2, a1, a0]


# ----------------------------- plain-JAX reference ----------------------------

def _ref_conv1d(x, w, b, stride):
    y = jax.lax.conv_general_dilated(
        x, w, window_strides=(stride,), padding=[(1, 1)],
        dimension_numbers=("NWC", "WIO", "NWC"),
        precision=jax.lax.Precision.HIGHEST)
    return y + b[None, :, :]


def ref_forward(x, params):
    xs = []
    for i in range(4):
        wd, bd = params["down"][i]
        x = jax.nn.silu(_ref_conv1d(x, wd, bd, 2))
        w1, b1, w2, b2 = params["res"][i]
        h = _ref_conv1d(x, w1, b1, 1)
        h = jax.nn.silu(h)
        h = _ref_conv1d(h, w2, b2, 1)
        x = x + h
        xs.append(x)

    def head(p, z):
        w1, b1, w2, b2 = p
        h = jax.nn.silu(_ref_conv1d(z, w1, b1, 1))
        return jax.nn.relu(_ref_conv1d(h, w2, b2, 1))

    return head(params["mean"], xs[-1]), head(params["var"], xs[-1]), xs[:-1][::-1]


# ----------------------------- parameter init ---------------------------------

def init_params(key, C):
    scale = (3.0 * C) ** -0.5

    def conv_pair(k):
        kw, kb = jax.random.split(k)
        w = jax.random.normal(kw, (3, C, C), jnp.float32) * scale
        b = jax.random.normal(kb, (1, C), jnp.float32) * 0.01
        return w, b

    keys = jax.random.split(key, 16)
    return {
        "down": [conv_pair(keys[i]) for i in range(4)],
        "res": [conv_pair(keys[4 + 2 * i]) + conv_pair(keys[5 + 2 * i]) for i in range(4)],
        "mean": conv_pair(keys[12]) + conv_pair(keys[13]),
        "var": conv_pair(keys[14]) + conv_pair(keys[15]),
    }


# ----------------------------- main -------------------------------------------

if __name__ == "__main__":
    key = jax.random.PRNGKey(0)
    kx, kp = jax.random.split(key)
    x = jax.random.normal(kx, (BATCH, SEQ_LEN, Z_DIM), jnp.float32)
    params = init_params(kp, Z_DIM)

    mu, log_var, xs_rev = encoder_forward(x, params)
    jax.block_until_ready((mu, log_var, xs_rev))

    # sanity: shapes mirror the PyTorch module (NCL -> NLC here)
    assert mu.shape == (BATCH, SEQ_LEN // 16, Z_DIM)
    assert log_var.shape == (BATCH, SEQ_LEN // 16, Z_DIM)
    assert len(xs_rev) == 3
    assert [t.shape[1] for t in xs_rev] == [SEQ_LEN // 8, SEQ_LEN // 4, SEQ_LEN // 2]

    # numerical check against a plain-JAX reference of the same forward pass
    mu_r, lv_r, xs_rev_r = ref_forward(x, params)
    for a, b in [(mu, mu_r), (log_var, lv_r)] + list(zip(xs_rev, xs_rev_r)):
        err = float(jnp.max(jnp.abs(a - b)))
        assert err < 5e-2, f"mismatch vs reference: {err}"

    print("KERNEL_OK")
</pallas_src>

<mosaic_0001>
module attributes {stable_mosaic.version = 11 : i64} {
  func.func @_encoder_kernel(%arg0: i32, %arg1: memref<1x64x64xf32, #tpu.memory_space<vmem>>, %arg2: memref<16x96x32xf32, #tpu.memory_space<vmem>>, %arg3: memref<16x1x32xf32, #tpu.memory_space<vmem>>, %arg4: memref<1x8x32xf32, #tpu.memory_space<vmem>>, %arg5: memref<1x8x32xf32, #tpu.memory_space<vmem>>, %arg6: memref<1x64x32xf32, #tpu.memory_space<vmem>>, %arg7: memref<1x32x32xf32, #tpu.memory_space<vmem>>, %arg8: memref<1x16x32xf32, #tpu.memory_space<vmem>>) attributes {dimension_semantics = [#tpu.dimension_semantics<parallel>], iteration_bounds = array<i64: 2>, scalar_prefetch = 0 : i64, scratch_operands = 0 : i64, tpu.core_type = #tpu.core_type<tc>, window_params = [{transform_indices = @transform_0, window_bounds = array<i64: 1, 64, 64>}, {pipeline_mode = #tpu.pipeline_mode<synchronous>, transform_indices = @transform_1, window_bounds = array<i64: 16, 96, 32>}, {pipeline_mode = #tpu.pipeline_mode<synchronous>, transform_indices = @transform_2, window_bounds = array<i64: 16, 1, 32>}, {transform_indices = @transform_3, window_bounds = array<i64: 1, 8, 32>}, {transform_indices = @transform_4, window_bounds = array<i64: 1, 8, 32>}, {transform_indices = @transform_5, window_bounds = array<i64: 1, 64, 32>}, {transform_indices = @transform_6, window_bounds = array<i64: 1, 32, 32>}, {transform_indices = @transform_7, window_bounds = array<i64: 1, 16, 32>}]} {
    %c0 = arith.constant 0 : index
    %c0_0 = arith.constant 0 : index
    %c0_1 = arith.constant 0 : index
    %0 = vector.load %arg1[%c0, %c0_0, %c0_1] : memref<1x64x64xf32, #tpu.memory_space<vmem>>, vector<1x64x64xf32>
    %1 = vector.shape_cast %0 : vector<1x64x64xf32> to vector<64x64xf32>
    %2 = vector.extract_strided_slice %1 {offsets = [0, 0], sizes = [64, 32], strides = [1, 1]} : vector<64x64xf32> to vector<64x32xf32>
    %3 = vector.extract_strided_slice %1 {offsets = [0, 32], sizes = [64, 32], strides = [1, 1]} : vector<64x64xf32> to vector<64x32xf32>
    %cst = arith.constant 0.000000e+00 : f32
    %4 = vector.broadcast %cst : f32 to vector<1x32xf32>
    %5 = vector.extract_strided_slice %3 {offsets = [0, 0], sizes = [63, 32], strides = [1, 1]} : vector<64x32xf32> to vector<63x32xf32>
    %6 = tpu.concatenate %4, %5 in 0 : vector<1x32xf32>, vector<63x32xf32> -> vector<64x32xf32>
    %7 = tpu.concatenate %6, %2, %3 in 1 : vector<64x32xf32>, vector<64x32xf32>, vector<64x32xf32> -> vector<64x96xf32>
    %c0_2 = arith.constant 0 : index
    %c0_3 = arith.constant 0 : index
    %c0_4 = arith.constant 0 : index
    %8 = vector.load %arg2[%c0_2, %c0_3, %c0_4] : memref<16x96x32xf32, #tpu.memory_space<vmem>>, vector<1x96x32xf32>
    %9 = vector.shape_cast %8 : vector<1x96x32xf32> to vector<96x32xf32>
    %cst_5 = arith.constant dense<0.000000e+00> : vector<64x32xf32>
    %10 = tpu.matmul %7, %9, %cst_5 {dimension_numbers = #tpu.dot_dimension_numbers<[1], [0], [0], [1], [0, 0, 1, 1], [], []>} : vector<64x96xf32>, vector<96x32xf32>, vector<64x32xf32> -> vector<64x32xf32>
    %c0_6 = arith.constant 0 : index
    %c0_7 = arith.constant 0 : index
    %c0_8 = arith.constant 0 : index
    %11 = vector.load %arg3[%c0_6, %c0_7, %c0_8] : memref<16x1x32xf32, #tpu.memory_space<vmem>>, vector<1x1x32xf32>
    %12 = vector.shape_cast %11 : vector<1x1x32xf32> to vector<1x32xf32>
    %13 = vector.broadcast %12 : vector<1x32xf32> to vector<64x32xf32>
    %14 = arith.addf %10, %13 : vector<64x32xf32>
    %15 = arith.negf %14 : vector<64x32xf32>
    %16 = math.exp %15 : vector<64x32xf32>
    %cst_9 = arith.constant 1.000000e+00 : f32
    %17 = vector.broadcast %cst_9 : f32 to vector<64x32xf32>
    %18 = arith.addf %17, %16 : vector<64x32xf32>
    %19 = arith.divf %17, %18 : vector<64x32xf32>
    %20 = arith.mulf %14, %19 : vector<64x32xf32>
    %cst_10 = arith.constant 0.000000e+00 : f32
    %21 = vector.broadcast %cst_10 : f32 to vector<1x32xf32>
    %22 = vector.extract_strided_slice %20 {offsets = [0, 0], sizes = [63, 32], strides = [1, 1]} : vector<64x32xf32> to vector<63x32xf32>
    %23 = tpu.concatenate %21, %22 in 0 : vector<1x32xf32>, vector<63x32xf32> -> vector<64x32xf32>
    %24 = vector.extract_strided_slice %20 {offsets = [1, 0], sizes = [63, 32], strides = [1, 1]} : vector<64x32xf32> to vector<63x32xf32>
    %25 = tpu.concatenate %24, %21 in 0 : vector<63x32xf32>, vector<1x32xf32> -> vector<64x32xf32>
    %26 = tpu.concatenate %23, %20, %25 in 1 : vector<64x32xf32>, vector<64x32xf32>, vector<64x32xf32> -> vector<64x96xf32>
    %c1 = arith.constant 1 : index
    %c0_11 = arith.constant 0 : index
    %c0_12 = arith.constant 0 : index
    %27 = vector.load %arg2[%c1, %c0_11, %c0_12] : memref<16x96x32xf32, #tpu.memory_space<vmem>>, vector<1x96x32xf32>
    %28 = vector.shape_cast %27 : vector<1x96x32xf32> to vector<96x32xf32>
    %cst_13 = arith.constant dense<0.000000e+00> : vector<64x32xf32>
    %29 = tpu.matmul %26, %28, %cst_13 {dimension_numbers = #tpu.dot_dimension_numbers<[1], [0], [0], [1], [0, 0, 1, 1], [], []>} : vector<64x96xf32>, vector<96x32xf32>, vector<64x32xf32> -> vector<64x32xf32>
    %c1_14 = arith.constant 1 : index
    %c0_15 = arith.constant 0 : index
    %c0_16 = arith.constant 0 : index
    %30 = vector.load %arg3[%c1_14, %c0_15, %c0_16] : memref<16x1x32xf32, #tpu.memory_space<vmem>>, vector<1x1x32xf32>
    %31 = vector.shape_cast %30 : vector<1x1x32xf32> to vector<1x32xf32>
    %32 = vector.broadcast %31 : vector<1x32xf32> to vector<64x32xf32>
    %33 = arith.addf %29, %32 : vector<64x32xf32>
    %34 = arith.negf %33 : vector<64x32xf32>
    %35 = math.exp %34 : vector<64x32xf32>
    %cst_17 = arith.constant 1.000000e+00 : f32
    %36 = vector.broadcast %cst_17 : f32 to vector<64x32xf32>
    %37 = arith.addf %36, %35 : vector<64x32xf32>
    %38 = arith.divf %36, %37 : vector<64x32xf32>
    %39 = arith.mulf %33, %38 : vector<64x32xf32>
    %cst_18 = arith.constant 0.000000e+00 : f32
    %40 = vector.broadcast %cst_18 : f32 to vector<1x32xf32>
    %41 = vector.extract_strided_slice %39 {offsets = [0, 0], sizes = [63, 32], strides = [1, 1]} : vector<64x32xf32> to vector<63x32xf32>
    %42 = tpu.concatenate %40, %41 in 0 : vector<1x32xf32>, vector<63x32xf32> -> vector<64x32xf32>
    %43 = vector.extract_strided_slice %39 {offsets = [1, 0], sizes = [63, 32], strides = [1, 1]} : vector<64x32xf32> to vector<63x32xf32>
    %44 = tpu.concatenate %43, %40 in 0 : vector<63x32xf32>, vector<1x32xf32> -> vector<64x32xf32>
    %45 = tpu.concatenate %42, %39, %44 in 1 : vector<64x32xf32>, vector<64x32xf32>, vector<64x32xf32> -> vector<64x96xf32>
    %c2 = arith.constant 2 : index
    %c0_19 = arith.constant 0 : index
    %c0_20 = arith.constant 0 : index
    %46 = vector.load %arg2[%c2, %c0_19, %c0_20] : memref<16x96x32xf32, #tpu.memory_space<vmem>>, vector<1x96x32xf32>
    %47 = vector.shape_cast %46 : vector<1x96x32xf32> to vector<96x32xf32>
    %cst_21 = arith.constant dense<0.000000e+00> : vector<64x32xf32>
    %48 = tpu.matmul %45, %47, %cst_21 {dimension_numbers = #tpu.dot_dimension_numbers<[1], [0], [0], [1], [0, 0, 1, 1], [], []>} : vector<64x96xf32>, vector<96x32xf32>, vector<64x32xf32> -> vector<64x32xf32>
    %c2_22 = arith.constant 2 : index
    %c0_23 = arith.constant 0 : index
    %c0_24 = arith.constant 0 : index
    %49 = vector.load %arg3[%c2_22, %c0_23, %c0_24] : memref<16x1x32xf32, #tpu.memory_space<vmem>>, vector<1x1x32xf32>
    %50 = vector.shape_cast %49 : vector<1x1x32xf32> to vector<1x32xf32>
    %51 = vector.broadcast %50 : vector<1x32xf32> to vector<64x32xf32>
    %52 = arith.addf %48, %51 : vector<64x32xf32>
    %53 = arith.addf %20, %52 : vector<64x32xf32>
    %c0_25 = arith.constant 0 : index
    %c0_26 = arith.constant 0 : index
    %c0_27 = arith.constant 0 : index
    %54 = vector.load %arg6[%c0_25, %c0_26, %c0_27] : memref<1x64x32xf32, #tpu.memory_space<vmem>>, vector<1x64x32xf32>
    %55 = vector.shape_cast %54 : vector<1x64x32xf32> to vector<64x32xf32>
    %56 = vector.shape_cast %53 : vector<64x32xf32> to vector<1x64x32xf32>
    tpu.vector_store %arg6[%c0_25, %c0_26, %c0_27], %56 {strides = array<i32>} : memref<1x64x32xf32, #tpu.memory_space<vmem>>, vector<1x64x32xf32>,
    %c0_28 = arith.constant 0 : index
    %c0_29 = arith.constant 0 : index
    %c0_30 = arith.constant 0 : index
    %57 = tpu.strided_load %arg6[%c0_28, %c0_29, %c0_30] {strides = array<i32: 1, 2, 1>} : memref<1x64x32xf32, #tpu.memory_space<vmem>>, vector<1x32x32xf32>
    %58 = vector.shape_cast %57 : vector<1x32x32xf32> to vector<32x32xf32>
    %c0_31 = arith.constant 0 : index
    %c1_32 = arith.constant 1 : index
    %c0_33 = arith.constant 0 : index
    %59 = tpu.strided_load %arg6[%c0_31, %c1_32, %c0_33] {strides = array<i32: 1, 2, 1>} : memref<1x64x32xf32, #tpu.memory_space<vmem>>, vector<1x32x32xf32>
    %60 = vector.shape_cast %59 : vector<1x32x32xf32> to vector<32x32xf32>
    %cst_34 = arith.constant 0.000000e+00 : f32
    %61 = vector.broadcast %cst_34 : f32 to vector<1x32xf32>
    %62 = vector.extract_strided_slice %60 {offsets = [0, 0], sizes = [31, 32], strides = [1, 1]} : vector<32x32xf32> to vector<31x32xf32>
    %63 = tpu.concatenate %61, %62 in 0 : vector<1x32xf32>, vector<31x32xf32> -> vector<32x32xf32>
    %64 = tpu.concatenate %63, %58, %60 in 1 : vector<32x32xf32>, vector<32x32xf32>, vector<32x32xf32> -> vector<32x96xf32>
    %c3 = arith.constant 3 : index
    %c0_35 = arith.constant 0 : index
    %c0_36 = arith.constant 0 : index
    %65 = vector.load %arg2[%c3, %c0_35, %c0_36] : memref<16x96x32xf32, #tpu.memory_space<vmem>>, vector<1x96x32xf32>
    %66 = vector.shape_cast %65 : vector<1x96x32xf32> to vector<96x32xf32>
    %cst_37 = arith.constant dense<0.000000e+00> : vector<32x32xf32>
    %67 = tpu.matmul %64, %66, %cst_37 {dimension_numbers = #tpu.dot_dimension_numbers<[1], [0], [0], [1], [0, 0, 1, 1], [], []>} : vector<32x96xf32>, vector<96x32xf32>, vector<32x32xf32> -> vector<32x32xf32>
    %c3_38 = arith.constant 3 : index
    %c0_39 = arith.constant 0 : index
    %c0_40 = arith.constant 0 : index
    %68 = vector.load %arg3[%c3_38, %c0_39, %c0_40] : memref<16x1x32xf32, #tpu.memory_space<vmem>>, vector<1x1x32xf32>
    %69 = vector.shape_cast %68 : vector<1x1x32xf32> to vector<1x32xf32>
    %70 = vector.broadcast %69 : vector<1x32xf32> to vector<32x32xf32>
    %71 = arith.addf %67, %70 : vector<32x32xf32>
    %72 = arith.negf %71 : vector<32x32xf32>
    %73 = math.exp %72 : vector<32x32xf32>
    %cst_41 = arith.constant 1.000000e+00 : f32
    %74 = vector.broadcast %cst_41 : f32 to vector<32x32xf32>
    %75 = arith.addf %74, %73 : vector<32x32xf32>
    %76 = arith.divf %74, %75 : vector<32x32xf32>
    %77 = arith.mulf %71, %76 : vector<32x32xf32>
    %cst_42 = arith.constant 0.000000e+00 : f32
    %78 = vector.broadcast %cst_42 : f32 to vector<1x32xf32>
    %79 = vector.extract_strided_slice %77 {offsets = [0, 0], sizes = [31, 32], strides = [1, 1]} : vector<32x32xf32> to vector<31x32xf32>
    %80 = tpu.concatenate %78, %79 in 0 : vector<1x32xf32>, vector<31x32xf32> -> vector<32x32xf32>
    %81 = vector.extract_strided_slice %77 {offsets = [1, 0], sizes = [31, 32], strides = [1, 1]} : vector<32x32xf32> to vector<31x32xf32>
    %82 = tpu.concatenate %81, %78 in 0 : vector<31x32xf32>, vector<1x32xf32> -> vector<32x32xf32>
    %83 = tpu.concatenate %80, %77, %82 in 1 : vector<32x32xf32>, vector<32x32xf32>, vector<32x32xf32> -> vector<32x96xf32>
    %c4 = arith.constant 4 : index
    %c0_43 = arith.constant 0 : index
    %c0_44 = arith.constant 0 : index
    %84 = vector.load %arg2[%c4, %c0_43, %c0_44] : memref<16x96x32xf32, #tpu.memory_space<vmem>>, vector<1x96x32xf32>
    %85 = vector.shape_cast %84 : vector<1x96x32xf32> to vector<96x32xf32>
    %cst_45 = arith.constant dense<0.000000e+00> : vector<32x32xf32>
    %86 = tpu.matmul %83, %85, %cst_45 {dimension_numbers = #tpu.dot_dimension_numbers<[1], [0], [0], [1], [0, 0, 1, 1], [], []>} : vector<32x96xf32>, vector<96x32xf32>, vector<32x32xf32> -> vector<32x32xf32>
    %c4_46 = arith.constant 4 : index
    %c0_47 = arith.constant 0 : index
    %c0_48 = arith.constant 0 : index
    %87 = vector.load %arg3[%c4_46, %c0_47, %c0_48] : memref<16x1x32xf32, #tpu.memory_space<vmem>>, vector<1x1x32xf32>
    %88 = vector.shape_cast %87 : vector<1x1x32xf32> to vector<1x32xf32>
    %89 = vector.broadcast %88 : vector<1x32xf32> to vector<32x32xf32>
    %90 = arith.addf %86, %89 : vector<32x32xf32>
    %91 = arith.negf %90 : vector<32x32xf32>
    %92 = math.exp %91 : vector<32x32xf32>
    %cst_49 = arith.constant 1.000000e+00 : f32
    %93 = vector.broadcast %cst_49 : f32 to vector<32x32xf32>
    %94 = arith.addf %93, %92 : vector<32x32xf32>
    %95 = arith.divf %93, %94 : vector<32x32xf32>
    %96 = arith.mulf %90, %95 : vector<32x32xf32>
    %cst_50 = arith.constant 0.000000e+00 : f32
    %97 = vector.broadcast %cst_50 : f32 to vector<1x32xf32>
    %98 = vector.extract_strided_slice %96 {offsets = [0, 0], sizes = [31, 32], strides = [1, 1]} : vector<32x32xf32> to vector<31x32xf32>
    %99 = tpu.concatenate %97, %98 in 0 : vector<1x32xf32>, vector<31x32xf32> -> vector<32x32xf32>
    %100 = vector.extract_strided_slice %96 {offsets = [1, 0], sizes = [31, 32], strides = [1, 1]} : vector<32x32xf32> to vector<31x32xf32>
    %101 = tpu.concatenate %100, %97 in 0 : vector<31x32xf32>, vector<1x32xf32> -> vector<32x32xf32>
    %102 = tpu.concatenate %99, %96, %101 in 1 : vector<32x32xf32>, vector<32x32xf32>, vector<32x32xf32> -> vector<32x96xf32>
    %c5 = arith.constant 5 : index
    %c0_51 = arith.constant 0 : index
    %c0_52 = arith.constant 0 : index
    %103 = vector.load %arg2[%c5, %c0_51, %c0_52] : memref<16x96x32xf32, #tpu.memory_space<vmem>>, vector<1x96x32xf32>
    %104 = vector.shape_cast %103 : vector<1x96x32xf32> to vector<96x32xf32>
    %cst_53 = arith.constant dense<0.000000e+00> : vector<32x32xf32>
    %105 = tpu.matmul %102, %104, %cst_53 {dimension_numbers = #tpu.dot_dimension_numbers<[1], [0], [0], [1], [0, 0, 1, 1], [], []>} : vector<32x96xf32>, vector<96x32xf32>, vector<32x32xf32> -> vector<32x32xf32>
    %c5_54 = arith.constant 5 : index
    %c0_55 = arith.constant 0 : index
    %c0_56 = arith.constant 0 : index
    %106 = vector.load %arg3[%c5_54, %c0_55, %c0_56] : memref<16x1x32xf32, #tpu.memory_space<vmem>>, vector<1x1x32xf32>
    %107 = vector.shape_cast %106 : vector<1x1x32xf32> to vector<1x32xf32>
    %108 = vector.broadcast %107 : vector<1x32xf32> to vector<32x32xf32>
    %109 = arith.addf %105, %108 : vector<32x32xf32>
    %110 = arith.addf %77, %109 : vector<32x32xf32>
    %c0_57 = arith.constant 0 : index
    %c0_58 = arith.constant 0 : index
    %c0_59 = arith.constant 0 : index
    %111 = vector.load %arg7[%c0_57, %c0_58, %c0_59] : memref<1x32x32xf32, #tpu.memory_space<vmem>>, vector<1x32x32xf32>
    %112 = vector.shape_cast %111 : vector<1x32x32xf32> to vector<32x32xf32>
    %113 = vector.shape_cast %110 : vector<32x32xf32> to vector<1x32x32xf32>
    tpu.vector_store %arg7[%c0_57, %c0_58, %c0_59], %113 {strides = array<i32>} : memref<1x32x32xf32, #tpu.memory_space<vmem>>, vector<1x32x32xf32>,
    %c0_60 = arith.constant 0 : index
    %c0_61 = arith.constant 0 : index
    %c0_62 = arith.constant 0 : index
    %114 = tpu.strided_load %arg7[%c0_60, %c0_61, %c0_62] {strides = array<i32: 1, 2, 1>} : memref<1x32x32xf32, #tpu.memory_space<vmem>>, vector<1x16x32xf32>
    %115 = vector.shape_cast %114 : vector<1x16x32xf32> to vector<16x32xf32>
    %c0_63 = arith.constant 0 : index
    %c1_64 = arith.constant 1 : index
    %c0_65 = arith.constant 0 : index
    %116 = tpu.strided_load %arg7[%c0_63, %c1_64, %c0_65] {strides = array<i32: 1, 2, 1>} : memref<1x32x32xf32, #tpu.memory_space<vmem>>, vector<1x16x32xf32>
    %117 = vector.shape_cast %116 : vector<1x16x32xf32> to vector<16x32xf32>
    %cst_66 = arith.constant 0.000000e+00 : f32
    %118 = vector.broadcast %cst_66 : f32 to vector<1x32xf32>
    %119 = vector.extract_strided_slice %117 {offsets = [0, 0], sizes = [15, 32], strides = [1, 1]} : vector<16x32xf32> to vector<15x32xf32>
    %120 = tpu.concatenate %118, %119 in 0 : vector<1x32xf32>, vector<15x32xf32> -> vector<16x32xf32>
    %121 = tpu.concatenate %120, %115, %117 in 1 : vector<16x32xf32>, vector<16x32xf32>, vector<16x32xf32> -> vector<16x96xf32>
    %c6 = arith.constant 6 : index
    %c0_67 = arith.constant 0 : index
    %c0_68 = arith.constant 0 : index
    %122 = vector.load %arg2[%c6, %c0_67, %c0_68] : memref<16x96x32xf32, #tpu.memory_space<vmem>>, vector<1x96x32xf32>
    %123 = vector.shape_cast %122 : vector<1x96x32xf32> to vector<96x32xf32>
    %cst_69 = arith.constant dense<0.000000e+00> : vector<16x32xf32>
    %124 = tpu.matmul %121, %123, %cst_69 {dimension_numbers = #tpu.dot_dimension_numbers<[1], [0], [0], [1], [0, 0, 1, 1], [], []>} : vector<16x96xf32>, vector<96x32xf32>, vector<16x32xf32> -> vector<16x32xf32>
    %c6_70 = arith.constant 6 : index
    %c0_71 = arith.constant 0 : index
    %c0_72 = arith.constant 0 : index
    %125 = vector.load %arg3[%c6_70, %c0_71, %c0_72] : memref<16x1x32xf32, #tpu.memory_space<vmem>>, vector<1x1x32xf32>
    %126 = vector.shape_cast %125 : vector<1x1x32xf32> to vector<1x32xf32>
    %127 = vector.broadcast %126 : vector<1x32xf32> to vector<16x32xf32>
    %128 = arith.addf %124, %127 : vector<16x32xf32>
    %129 = arith.negf %128 : vector<16x32xf32>
    %130 = math.exp %129 : vector<16x32xf32>
    %cst_73 = arith.constant 1.000000e+00 : f32
    %131 = vector.broadcast %cst_73 : f32 to vector<16x32xf32>
    %132 = arith.addf %131, %130 : vector<16x32xf32>
    %133 = arith.divf %131, %132 : vector<16x32xf32>
    %134 = arith.mulf %128, %133 : vector<16x32xf32>
    %cst_74 = arith.constant 0.000000e+00 : f32
    %135 = vector.broadcast %cst_74 : f32 to vector<1x32xf32>
    %136 = vector.extract_strided_slice %134 {offsets = [0, 0], sizes = [15, 32], strides = [1, 1]} : vector<16x32xf32> to vector<15x32xf32>
    %137 = tpu.concatenate %135, %136 in 0 : vector<1x32xf32>, vector<15x32xf32> -> vector<16x32xf32>
    %138 = vector.extract_strided_slice %134 {offsets = [1, 0], sizes = [15, 32], strides = [1, 1]} : vector<16x32xf32> to vector<15x32xf32>
    %139 = tpu.concatenate %138, %135 in 0 : vector<15x32xf32>, vector<1x32xf32> -> vector<16x32xf32>
    %140 = tpu.concatenate %137, %134, %139 in 1 : vector<16x32xf32>, vector<16x32xf32>, vector<16x32xf32> -> vector<16x96xf32>
    %c7 = arith.constant 7 : index
    %c0_75 = arith.constant 0 : index
    %c0_76 = arith.constant 0 : index
    %141 = vector.load %arg2[%c7, %c0_75, %c0_76] : memref<16x96x32xf32, #tpu.memory_space<vmem>>, vector<1x96x32xf32>
    %142 = vector.shape_cast %141 : vector<1x96x32xf32> to vector<96x32xf32>
    %cst_77 = arith.constant dense<0.000000e+00> : vector<16x32xf32>
    %143 = tpu.matmul %140, %142, %cst_77 {dimension_numbers = #tpu.dot_dimension_numbers<[1], [0], [0], [1], [0, 0, 1, 1], [], []>} : vector<16x96xf32>, vector<96x32xf32>, vector<16x32xf32> -> vector<16x32xf32>
    %c7_78 = arith.constant 7 : index
    %c0_79 = arith.constant 0 : index
    %c0_80 = arith.constant 0 : index
    %144 = vector.load %arg3[%c7_78, %c0_79, %c0_80] : memref<16x1x32xf32, #tpu.memory_space<vmem>>, vector<1x1x32xf32>
    %145 = vector.shape_cast %144 : vector<1x1x32xf32> to vector<1x32xf32>
    %146 = vector.broadcast %145 : vector<1x32xf32> to vector<16x32xf32>
    %147 = arith.addf %143, %146 : vector<16x32xf32>
    %148 = arith.negf %147 : vector<16x32xf32>
    %149 = math.exp %148 : vector<16x32xf32>
    %cst_81 = arith.constant 1.000000e+00 : f32
    %150 = vector.broadcast %cst_81 : f32 to vector<16x32xf32>
    %151 = arith.addf %150, %149 : vector<16x32xf32>
    %152 = arith.divf %150, %151 : vector<16x32xf32>
    %153 = arith.mulf %147, %152 : vector<16x32xf32>
    %cst_82 = arith.constant 0.000000e+00 : f32
    %154 = vector.broadcast %cst_82 : f32 to vector<1x32xf32>
    %155 = vector.extract_strided_slice %153 {offsets = [0, 0], sizes = [15, 32], strides = [1, 1]} : vector<16x32xf32> to vector<15x32xf32>
    %156 = tpu.concatenate %154, %155 in 0 : vector<1x32xf32>, vector<15x32xf32> -> vector<16x32xf32>
    %157 = vector.extract_strided_slice %153 {offsets = [1, 0], sizes = [15, 32], strides = [1, 1]} : vector<16x32xf32> to vector<15x32xf32>
    %158 = tpu.concatenate %157, %154 in 0 : vector<15x32xf32>, vector<1x32xf32> -> vector<16x32xf32>
    %159 = tpu.concatenate %156, %153, %158 in 1 : vector<16x32xf32>, vector<16x32xf32>, vector<16x32xf32> -> vector<16x96xf32>
    %c8 = arith.constant 8 : index
    %c0_83 = arith.constant 0 : index
    %c0_84 = arith.constant 0 : index
    %160 = vector.load %arg2[%c8, %c0_83, %c0_84] : memref<16x96x32xf32, #tpu.memory_space<vmem>>, vector<1x96x32xf32>
    %161 = vector.shape_cast %160 : vector<1x96x32xf32> to vector<96x32xf32>
    %cst_85 = arith.constant dense<0.000000e+00> : vector<16x32xf32>
    %162 = tpu.matmul %159, %161, %cst_85 {dimension_numbers = #tpu.dot_dimension_numbers<[1], [0], [0], [1], [0, 0, 1, 1], [], []>} : vector<16x96xf32>, vector<96x32xf32>, vector<16x32xf32> -> vector<16x32xf32>
    %c8_86 = arith.constant 8 : index
    %c0_87 = arith.constant 0 : index
    %c0_88 = arith.constant 0 : index
    %163 = vector.load %arg3[%c8_86, %c0_87, %c0_88] : memref<16x1x32xf32, #tpu.memory_space<vmem>>, vector<1x1x32xf32>
    %164 = vector.shape_cast %163 : vector<1x1x32xf32> to vector<1x32xf32>
    %165 = vector.broadcast %164 : vector<1x32xf32> to vector<16x32xf32>
    %166 = arith.addf %162, %165 : vector<16x32xf32>
    %167 = arith.addf %134, %166 : vector<16x32xf32>
    %c0_89 = arith.constant 0 : index
    %c0_90 = arith.constant 0 : index
    %c0_91 = arith.constant 0 : index
    %168 = vector.load %arg8[%c0_89, %c0_90, %c0_91] : memref<1x16x32xf32, #tpu.memory_space<vmem>>, vector<1x16x32xf32>
    %169 = vector.shape_cast %168 : vector<1x16x32xf32> to vector<16x32xf32>
    %170 = vector.shape_cast %167 : vector<16x32xf32> to vector<1x16x32xf32>
    tpu.vector_store %arg8[%c0_89, %c0_90, %c0_91], %170 {strides = array<i32>} : memref<1x16x32xf32, #tpu.memory_space<vmem>>, vector<1x16x32xf32>,
    %c0_92 = arith.constant 0 : index
    %c0_93 = arith.constant 0 : index
    %c0_94 = arith.constant 0 : index
    %171 = tpu.strided_load %arg8[%c0_92, %c0_93, %c0_94] {strides = array<i32: 1, 2, 1>} : memref<1x16x32xf32, #tpu.memory_space<vmem>>, vector<1x8x32xf32>
    %172 = vector.shape_cast %171 : vector<1x8x32xf32> to vector<8x32xf32>
    %c0_95 = arith.constant 0 : index
    %c1_96 = arith.constant 1 : index
    %c0_97 = arith.constant 0 : index
    %173 = tpu.strided_load %arg8[%c0_95, %c1_96, %c0_97] {strides = array<i32: 1, 2, 1>} : memref<1x16x32xf32, #tpu.memory_space<vmem>>, vector<1x8x32xf32>
    %174 = vector.shape_cast %173 : vector<1x8x32xf32> to vector<8x32xf32>
    %cst_98 = arith.constant 0.000000e+00 : f32
    %175 = vector.broadcast %cst_98 : f32 to vector<1x32xf32>
    %176 = vector.extract_strided_slice %174 {offsets = [0, 0], sizes = [7, 32], strides = [1, 1]} : vector<8x32xf32> to vector<7x32xf32>
    %177 = tpu.concatenate %175, %176 in 0 : vector<1x32xf32>, vector<7x32xf32> -> vector<8x32xf32>
    %178 = tpu.concatenate %177, %172, %174 in 1 : vector<8x32xf32>, vector<8x32xf32>, vector<8x32xf32> -> vector<8x96xf32>
    %c9 = arith.constant 9 : index
    %c0_99 = arith.constant 0 : index
    %c0_100 = arith.constant 0 : index
    %179 = vector.load %arg2[%c9, %c0_99, %c0_100] : memref<16x96x32xf32, #tpu.memory_space<vmem>>, vector<1x96x32xf32>
    %180 = vector.shape_cast %179 : vector<1x96x32xf32> to vector<96x32xf32>
    %cst_101 = arith.constant dense<0.000000e+00> : vector<8x32xf32>
    %181 = tpu.matmul %178, %180, %cst_101 {dimension_numbers = #tpu.dot_dimension_numbers<[1], [0], [0], [1], [0, 0, 1, 1], [], []>} : vector<8x96xf32>, vector<96x32xf32>, vector<8x32xf32> -> vector<8x32xf32>
    %c9_102 = arith.constant 9 : index
    %c0_103 = arith.constant 0 : index
    %c0_104 = arith.constant 0 : index
    %182 = vector.load %arg3[%c9_102, %c0_103, %c0_104] : memref<16x1x32xf32, #tpu.memory_space<vmem>>, vector<1x1x32xf32>
    %183 = vector.shape_cast %182 : vector<1x1x32xf32> to vector<1x32xf32>
    %184 = vector.broadcast %183 : vector<1x32xf32> to vector<8x32xf32>
    %185 = arith.addf %181, %184 : vector<8x32xf32>
    %186 = arith.negf %185 : vector<8x32xf32>
    %187 = math.exp %186 : vector<8x32xf32>
    %cst_105 = arith.constant 1.000000e+00 : f32
    %188 = vector.broadcast %cst_105 : f32 to vector<8x32xf32>
    %189 = arith.addf %188, %187 : vector<8x32xf32>
    %190 = arith.divf %188, %189 : vector<8x32xf32>
    %191 = arith.mulf %185, %190 : vector<8x32xf32>
    %cst_106 = arith.constant 0.000000e+00 : f32
    %192 = vector.broadcast %cst_106 : f32 to vector<1x32xf32>
    %193 = vector.extract_strided_slice %191 {offsets = [0, 0], sizes = [7, 32], strides = [1, 1]} : vector<8x32xf32> to vector<7x32xf32>
    %194 = tpu.concatenate %192, %193 in 0 : vector<1x32xf32>, vector<7x32xf32> -> vector<8x32xf32>
    %195 = vector.extract_strided_slice %191 {offsets = [1, 0], sizes = [7, 32], strides = [1, 1]} : vector<8x32xf32> to vector<7x32xf32>
    %196 = tpu.concatenate %195, %192 in 0 : vector<7x32xf32>, vector<1x32xf32> -> vector<8x32xf32>
    %197 = tpu.concatenate %194, %191, %196 in 1 : vector<8x32xf32>, vector<8x32xf32>, vector<8x32xf32> -> vector<8x96xf32>
    %c10 = arith.constant 10 : index
    %c0_107 = arith.constant 0 : index
    %c0_108 = arith.constant 0 : index
    %198 = vector.load %arg2[%c10, %c0_107, %c0_108] : memref<16x96x32xf32, #tpu.memory_space<vmem>>, vector<1x96x32xf32>
    %199 = vector.shape_cast %198 : vector<1x96x32xf32> to vector<96x32xf32>
    %cst_109 = arith.constant dense<0.000000e+00> : vector<8x32xf32>
    %200 = tpu.matmul %197, %199, %cst_109 {dimension_numbers = #tpu.dot_dimension_numbers<[1], [0], [0], [1], [0, 0, 1, 1], [], []>} : vector<8x96xf32>, vector<96x32xf32>, vector<8x32xf32> -> vector<8x32xf32>
    %c10_110 = arith.constant 10 : index
    %c0_111 = arith.constant 0 : index
    %c0_112 = arith.constant 0 : index
    %201 = vector.load %arg3[%c10_110, %c0_111, %c0_112] : memref<16x1x32xf32, #tpu.memory_space<vmem>>, vector<1x1x32xf32>
    %202 = vector.shape_cast %201 : vector<1x1x32xf32> to vector<1x32xf32>
    %203 = vector.broadcast %202 : vector<1x32xf32> to vector<8x32xf32>
    %204 = arith.addf %200, %203 : vector<8x32xf32>
    %205 = arith.negf %204 : vector<8x32xf32>
    %206 = math.exp %205 : vector<8x32xf32>
    %cst_113 = arith.constant 1.000000e+00 : f32
    %207 = vector.broadcast %cst_113 : f32 to vector<8x32xf32>
    %208 = arith.addf %207, %206 : vector<8x32xf32>
    %209 = arith.divf %207, %208 : vector<8x32xf32>
    %210 = arith.mulf %204, %209 : vector<8x32xf32>
    %cst_114 = arith.constant 0.000000e+00 : f32
    %211 = vector.broadcast %cst_114 : f32 to vector<1x32xf32>
    %212 = vector.extract_strided_slice %210 {offsets = [0, 0], sizes = [7, 32], strides = [1, 1]} : vector<8x32xf32> to vector<7x32xf32>
    %213 = tpu.concatenate %211, %212 in 0 : vector<1x32xf32>, vector<7x32xf32> -> vector<8x32xf32>
    %214 = vector.extract_strided_slice %210 {offsets = [1, 0], sizes = [7, 32], strides = [1, 1]} : vector<8x32xf32> to vector<7x32xf32>
    %215 = tpu.concatenate %214, %211 in 0 : vector<7x32xf32>, vector<1x32xf32> -> vector<8x32xf32>
    %216 = tpu.concatenate %213, %210, %215 in 1 : vector<8x32xf32>, vector<8x32xf32>, vector<8x32xf32> -> vector<8x96xf32>
    %c11 = arith.constant 11 : index
    %c0_115 = arith.constant 0 : index
    %c0_116 = arith.constant 0 : index
    %217 = vector.load %arg2[%c11, %c0_115, %c0_116] : memref<16x96x32xf32, #tpu.memory_space<vmem>>, vector<1x96x32xf32>
    %218 = vector.shape_cast %217 : vector<1x96x32xf32> to vector<96x32xf32>
    %cst_117 = arith.constant dense<0.000000e+00> : vector<8x32xf32>
    %219 = tpu.matmul %216, %218, %cst_117 {dimension_numbers = #tpu.dot_dimension_numbers<[1], [0], [0], [1], [0, 0, 1, 1], [], []>} : vector<8x96xf32>, vector<96x32xf32>, vector<8x32xf32> -> vector<8x32xf32>
    %c11_118 = arith.constant 11 : index
    %c0_119 = arith.constant 0 : index
    %c0_120 = arith.constant 0 : index
    %220 = vector.load %arg3[%c11_118, %c0_119, %c0_120] : memref<16x1x32xf32, #tpu.memory_space<vmem>>, vector<1x1x32xf32>
    %221 = vector.shape_cast %220 : vector<1x1x32xf32> to vector<1x32xf32>
    %222 = vector.broadcast %221 : vector<1x32xf32> to vector<8x32xf32>
    %223 = arith.addf %219, %222 : vector<8x32xf32>
    %224 = arith.addf %191, %223 : vector<8x32xf32>
    %cst_121 = arith.constant 0.000000e+00 : f32
    %225 = vector.broadcast %cst_121 : f32 to vector<1x32xf32>
    %226 = vector.extract_strided_slice %224 {offsets = [0, 0], sizes = [7, 32], strides = [1, 1]} : vector<8x32xf32> to vector<7x32xf32>
    %227 = tpu.concatenate %225, %226 in 0 : vector<1x32xf32>, vector<7x32xf32> -> vector<8x32xf32>
    %228 = vector.extract_strided_slice %224 {offsets = [1, 0], sizes = [7, 32], strides = [1, 1]} : vector<8x32xf32> to vector<7x32xf32>
    %229 = tpu.concatenate %228, %225 in 0 : vector<7x32xf32>, vector<1x32xf32> -> vector<8x32xf32>
    %230 = tpu.concatenate %227, %224, %229 in 1 : vector<8x32xf32>, vector<8x32xf32>, vector<8x32xf32> -> vector<8x96xf32>
    %c12 = arith.constant 12 : index
    %c0_122 = arith.constant 0 : index
    %c0_123 = arith.constant 0 : index
    %231 = vector.load %arg2[%c12, %c0_122, %c0_123] : memref<16x96x32xf32, #tpu.memory_space<vmem>>, vector<1x96x32xf32>
    %232 = vector.shape_cast %231 : vector<1x96x32xf32> to vector<96x32xf32>
    %cst_124 = arith.constant dense<0.000000e+00> : vector<8x32xf32>
    %233 = tpu.matmul %230, %232, %cst_124 {dimension_numbers = #tpu.dot_dimension_numbers<[1], [0], [0], [1], [0, 0, 1, 1], [], []>} : vector<8x96xf32>, vector<96x32xf32>, vector<8x32xf32> -> vector<8x32xf32>
    %c12_125 = arith.constant 12 : index
    %c0_126 = arith.constant 0 : index
    %c0_127 = arith.constant 0 : index
    %234 = vector.load %arg3[%c12_125, %c0_126, %c0_127] : memref<16x1x32xf32, #tpu.memory_space<vmem>>, vector<1x1x32xf32>
    %235 = vector.shape_cast %234 : vector<1x1x32xf32> to vector<1x32xf32>
    %236 = vector.broadcast %235 : vector<1x32xf32> to vector<8x32xf32>
    %237 = arith.addf %233, %236 : vector<8x32xf32>
    %238 = arith.negf %237 : vector<8x32xf32>
    %239 = math.exp %238 : vector<8x32xf32>
    %cst_128 = arith.constant 1.000000e+00 : f32
    %240 = vector.broadcast %cst_128 : f32 to vector<8x32xf32>
    %241 = arith.addf %240, %239 : vector<8x32xf32>
    %242 = arith.divf %240, %241 : vector<8x32xf32>
    %243 = arith.mulf %237, %242 : vector<8x32xf32>
    %cst_129 = arith.constant 0.000000e+00 : f32
    %244 = vector.broadcast %cst_129 : f32 to vector<1x32xf32>
    %245 = vector.extract_strided_slice %243 {offsets = [0, 0], sizes = [7, 32], strides = [1, 1]} : vector<8x32xf32> to vector<7x32xf32>
    %246 = tpu.concatenate %244, %245 in 0 : vector<1x32xf32>, vector<7x32xf32> -> vector<8x32xf32>
    %247 = vector.extract_strided_slice %243 {offsets = [1, 0], sizes = [7, 32], strides = [1, 1]} : vector<8x32xf32> to vector<7x32xf32>
    %248 = tpu.concatenate %247, %244 in 0 : vector<7x32xf32>, vector<1x32xf32> -> vector<8x32xf32>
    %249 = tpu.concatenate %246, %243, %248 in 1 : vector<8x32xf32>, vector<8x32xf32>, vector<8x32xf32> -> vector<8x96xf32>
    %c13 = arith.constant 13 : index
    %c0_130 = arith.constant 0 : index
    %c0_131 = arith.constant 0 : index
    %250 = vector.load %arg2[%c13, %c0_130, %c0_131] : memref<16x96x32xf32, #tpu.memory_space<vmem>>, vector<1x96x32xf32>
    %251 = vector.shape_cast %250 : vector<1x96x32xf32> to vector<96x32xf32>
    %cst_132 = arith.constant dense<0.000000e+00> : vector<8x32xf32>
    %252 = tpu.matmul %249, %251, %cst_132 {dimension_numbers = #tpu.dot_dimension_numbers<[1], [0], [0], [1], [0, 0, 1, 1], [], []>} : vector<8x96xf32>, vector<96x32xf32>, vector<8x32xf32> -> vector<8x32xf32>
    %c13_133 = arith.constant 13 : index
    %c0_134 = arith.constant 0 : index
    %c0_135 = arith.constant 0 : index
    %253 = vector.load %arg3[%c13_133, %c0_134, %c0_135] : memref<16x1x32xf32, #tpu.memory_space<vmem>>, vector<1x1x32xf32>
    %254 = vector.shape_cast %253 : vector<1x1x32xf32> to vector<1x32xf32>
    %255 = vector.broadcast %254 : vector<1x32xf32> to vector<8x32xf32>
    %256 = arith.addf %252, %255 : vector<8x32xf32>
    %cst_136 = arith.constant 0.000000e+00 : f32
    %257 = vector.broadcast %cst_136 : f32 to vector<8x32xf32>
    %258 = arith.maximumf %256, %257 : vector<8x32xf32>
    %c0_137 = arith.constant 0 : index
    %c0_138 = arith.constant 0 : index
    %c0_139 = arith.constant 0 : index
    %259 = vector.load %arg4[%c0_137, %c0_138, %c0_139] : memref<1x8x32xf32, #tpu.memory_space<vmem>>, vector<1x8x32xf32>
    %260 = vector.shape_cast %259 : vector<1x8x32xf32> to vector<8x32xf32>
    %261 = vector.shape_cast %258 : vector<8x32xf32> to vector<1x8x32xf32>
    tpu.vector_store %arg4[%c0_137, %c0_138, %c0_139], %261 {strides = array<i32>} : memref<1x8x32xf32, #tpu.memory_space<vmem>>, vector<1x8x32xf32>,
    %cst_140 = arith.constant 0.000000e+00 : f32
    %262 = vector.broadcast %cst_140 : f32 to vector<1x32xf32>
    %263 = vector.extract_strided_slice %224 {offsets = [0, 0], sizes = [7, 32], strides = [1, 1]} : vector<8x32xf32> to vector<7x32xf32>
    %264 = tpu.concatenate %262, %263 in 0 : vector<1x32xf32>, vector<7x32xf32> -> vector<8x32xf32>
    %265 = vector.extract_strided_slice %224 {offsets = [1, 0], sizes = [7, 32], strides = [1, 1]} : vector<8x32xf32> to vector<7x32xf32>
    %266 = tpu.concatenate %265, %262 in 0 : vector<7x32xf32>, vector<1x32xf32> -> vector<8x32xf32>
    %267 = tpu.concatenate %264, %224, %266 in 1 : vector<8x32xf32>, vector<8x32xf32>, vector<8x32xf32> -> vector<8x96xf32>
    %c14 = arith.constant 14 : index
    %c0_141 = arith.constant 0 : index
    %c0_142 = arith.constant 0 : index
    %268 = vector.load %arg2[%c14, %c0_141, %c0_142] : memref<16x96x32xf32, #tpu.memory_space<vmem>>, vector<1x96x32xf32>
    %269 = vector.shape_cast %268 : vector<1x96x32xf32> to vector<96x32xf32>
    %cst_143 = arith.constant dense<0.000000e+00> : vector<8x32xf32>
    %270 = tpu.matmul %267, %269, %cst_143 {dimension_numbers = #tpu.dot_dimension_numbers<[1], [0], [0], [1], [0, 0, 1, 1], [], []>} : vector<8x96xf32>, vector<96x32xf32>, vector<8x32xf32> -> vector<8x32xf32>
    %c14_144 = arith.constant 14 : index
    %c0_145 = arith.constant 0 : index
    %c0_146 = arith.constant 0 : index
    %271 = vector.load %arg3[%c14_144, %c0_145, %c0_146] : memref<16x1x32xf32, #tpu.memory_space<vmem>>, vector<1x1x32xf32>
    %272 = vector.shape_cast %271 : vector<1x1x32xf32> to vector<1x32xf32>
    %273 = vector.broadcast %272 : vector<1x32xf32> to vector<8x32xf32>
    %274 = arith.addf %270, %273 : vector<8x32xf32>
    %275 = arith.negf %274 : vector<8x32xf32>
    %276 = math.exp %275 : vector<8x32xf32>
    %cst_147 = arith.constant 1.000000e+00 : f32
    %277 = vector.broadcast %cst_147 : f32 to vector<8x32xf32>
    %278 = arith.addf %277, %276 : vector<8x32xf32>
    %279 = arith.divf %277, %278 : vector<8x32xf32>
    %280 = arith.mulf %274, %279 : vector<8x32xf32>
    %cst_148 = arith.constant 0.000000e+00 : f32
    %281 = vector.broadcast %cst_148 : f32 to vector<1x32xf32>
    %282 = vector.extract_strided_slice %280 {offsets = [0, 0], sizes = [7, 32], strides = [1, 1]} : vector<8x32xf32> to vector<7x32xf32>
    %283 = tpu.concatenate %281, %282 in 0 : vector<1x32xf32>, vector<7x32xf32> -> vector<8x32xf32>
    %284 = vector.extract_strided_slice %280 {offsets = [1, 0], sizes = [7, 32], strides = [1, 1]} : vector<8x32xf32> to vector<7x32xf32>
    %285 = tpu.concatenate %284, %281 in 0 : vector<7x32xf32>, vector<1x32xf32> -> vector<8x32xf32>
    %286 = tpu.concatenate %283, %280, %285 in 1 : vector<8x32xf32>, vector<8x32xf32>, vector<8x32xf32> -> vector<8x96xf32>
    %c15 = arith.constant 15 : index
    %c0_149 = arith.constant 0 : index
    %c0_150 = arith.constant 0 : index
    %287 = vector.load %arg2[%c15, %c0_149, %c0_150] : memref<16x96x32xf32, #tpu.memory_space<vmem>>, vector<1x96x32xf32>
    %288 = vector.shape_cast %287 : vector<1x96x32xf32> to vector<96x32xf32>
    %cst_151 = arith.constant dense<0.000000e+00> : vector<8x32xf32>
    %289 = tpu.matmul %286, %288, %cst_151 {dimension_numbers = #tpu.dot_dimension_numbers<[1], [0], [0], [1], [0, 0, 1, 1], [], []>} : vector<8x96xf32>, vector<96x32xf32>, vector<8x32xf32> -> vector<8x32xf32>
    %c15_152 = arith.constant 15 : index
    %c0_153 = arith.constant 0 : index
    %c0_154 = arith.constant 0 : index
    %290 = vector.load %arg3[%c15_152, %c0_153, %c0_154] : memref<16x1x32xf32, #tpu.memory_space<vmem>>, vector<1x1x32xf32>
    %291 = vector.shape_cast %290 : vector<1x1x32xf32> to vector<1x32xf32>
    %292 = vector.broadcast %291 : vector<1x32xf32> to vector<8x32xf32>
    %293 = arith.addf %289, %292 : vector<8x32xf32>
    %cst_155 = arith.constant 0.000000e+00 : f32
    %294 = vector.broadcast %cst_155 : f32 to vector<8x32xf32>
    %295 = arith.maximumf %293, %294 : vector<8x32xf32>
    %c0_156 = arith.constant 0 : index
    %c0_157 = arith.constant 0 : index
    %c0_158 = arith.constant 0 : index
    %296 = vector.load %arg5[%c0_156, %c0_157, %c0_158] : memref<1x8x32xf32, #tpu.memory_space<vmem>>, vector<1x8x32xf32>
    %297 = vector.shape_cast %296 : vector<1x8x32xf32> to vector<8x32xf32>
    %298 = vector.shape_cast %295 : vector<8x32xf32> to vector<1x8x32xf32>
    tpu.vector_store %arg5[%c0_156, %c0_157, %c0_158], %298 {strides = array<i32>} : memref<1x8x32xf32, #tpu.memory_space<vmem>>, vector<1x8x32xf32>,
    return
  }
  func.func @transform_0(%arg0: i32) -> (i32, i32, i32) {
    %c0_i32 = arith.constant 0 : i32
    %c0_i32_0 = arith.constant 0 : i32
    %c0_i32_1 = arith.constant 0 : i32
    return %arg0, %c0_i32, %c0_i32_0 : i32, i32, i32
  }
  func.func @transform_1(%arg0: i32) -> (i32, i32, i32) {
    %c0_i32 = arith.constant 0 : i32
    %c0_i32_0 = arith.constant 0 : i32
    %c0_i32_1 = arith.constant 0 : i32
    %c0_i32_2 = arith.constant 0 : i32
    return %c0_i32, %c0_i32_0, %c0_i32_1 : i32, i32, i32
  }
  func.func @transform_2(%arg0: i32) -> (i32, i32, i32) {
    %c0_i32 = arith.constant 0 : i32
    %c0_i32_0 = arith.constant 0 : i32
    %c0_i32_1 = arith.constant 0 : i32
    %c0_i32_2 = arith.constant 0 : i32
    return %c0_i32, %c0_i32_0, %c0_i32_1 : i32, i32, i32
  }
  func.func @transform_3(%arg0: i32) -> (i32, i32, i32) {
    %c0_i32 = arith.constant 0 : i32
    %c0_i32_0 = arith.constant 0 : i32
    %c0_i32_1 = arith.constant 0 : i32
    return %arg0, %c0_i32, %c0_i32_0 : i32, i32, i32
  }
  func.func @transform_4(%arg0: i32) -> (i32, i32, i32) {
    %c0_i32 = arith.constant 0 : i32
    %c0_i32_0 = arith.constant 0 : i32
    %c0_i32_1 = arith.constant 0 : i32
    return %arg0, %c0_i32, %c0_i32_0 : i32, i32, i32
  }
  func.func @transform_5(%arg0: i32) -> (i32, i32, i32) {
    %c0_i32 = arith.constant 0 : i32
    %c0_i32_0 = arith.constant 0 : i32
    %c0_i32_1 = arith.constant 0 : i32
    return %arg0, %c0_i32, %c0_i32_0 : i32, i32, i32
  }
  func.func @transform_6(%arg0: i32) -> (i32, i32, i32) {
    %c0_i32 = arith.constant 0 : i32
    %c0_i32_0 = arith.constant 0 : i32
    %c0_i32_1 = arith.constant 0 : i32
    return %arg0, %c0_i32, %c0_i32_0 : i32, i32, i32
  }
  func.func @transform_7(%arg0: i32) -> (i32, i32, i32) {
    %c0_i32 = arith.constant 0 : i32
    %c0_i32_0 = arith.constant 0 : i32
    %c0_i32_1 = arith.constant 0 : i32
    return %arg0, %c0_i32, %c0_i32_0 : i32, i32, i32
  }
}

</mosaic_0001>

<bundles_post_ra>
// kernel: encoder_forward.1
= control target key start
LH: loop header
LB: loop body
LE: loop exit
PB: predicated region body
PF: predicated region fallthrough
CT: control target
= control target key end

     0   :  { %s6209_s0 = inlined_call_operand.vmem [shape: f32[2,64,64], index: 0, kind: input, shape index: {}]   ;;  %s6210_s1 = inlined_call_operand.vmem [shape: f32[16,96,32], index: 1, kind: input, shape index: {}]   ;;  %s6211_s2 = inlined_call_operand.vmem [shape: f32[16,1,32], index: 2, kind: input, shape index: {}]   ;;  %s6212_s3 = inlined_call_operand.hbm [shape: f32[2,8,32], index: 3, kind: output, shape index: {0}]   ;;  %s6213_s4 = inlined_call_operand.hbm [shape: f32[2,8,32], index: 4, kind: output, shape index: {1}]   ;;  %s6214_s5 = inlined_call_operand.vmem [shape: f32[2,64,32], index: 5, kind: output, shape index: {2}]   ;;  %s6215_s6 = inlined_call_operand.hbm [shape: f32[2,32,32], index: 6, kind: output, shape index: {3}]   ;;  %s6216_s7 = inlined_call_operand.hbm [shape: f32[2,16,32], index: 7, kind: output, shape index: {4}]  }
   0x1   :  { %6221 = sst [smem:[#allocation12_spill]] %s6209_s0 }
   0x2   :  { %6222 = sst [smem:[#allocation13_spill]] %s6210_s1 }
   0x3   :  { %13 = vsyncpa [#allocation3], 0 }
   0x4   :  { %15 = vsyncpa [#allocation3 + $0x1], 0 }
   0x5   :  { %16 = vsyncpa [#allocation5], 0 }
   0x6   :  { %18 = vsyncpa [#allocation5 + $0x1], 0 }
   0x7   :  { %19 = vsyncpa [#allocation8], 0 }
   0x8   :  { %21 = vsyncpa [#allocation8 + $0x1], 0  ;;  %s4725_s24 = smov 0   ;;  %s4727_s25 = smov 0  }
   0x9   :  { %s4729_s26 = smov 0   ;;  %s4731_s27 = smov 0  }
   0xa LB: > { %s4746_s28 = sadd.s32 4294967295, %s4672_s27   ;;  %s6217_s29 = sadd.s32 4294967294, %s4672_s27   ;;  %s4672_s27 = sphi %s4731_s27, %s6234_s27   ;;  %s4668_s26 = sphi %s4729_s26, %s6233_s26   ;;  %s4664_s25 = sphi %s4727_s25, %s6232_s25   ;;  %s4660_s24 = sphi %s4725_s24, %s6231_s24  }
   0xb   : > { %s4750_s30 = sadd.s32 1, %s4672_s27   ;;  %s102_s8 = sadd.s32 1, %s4668_s26 }
   0xc   : > { %s99_s9 = ssub.s32 %s4672_s27, %s4750_s30  ;;  %p112_p0 = scmp.ne.s32.totalorder %s4668_s26, %s4664_s25 }
   0xd   : > { %p100_p1 = scmp.eq.s32.totalorder %s99_s9, 0  ;;  %p113_p2 = scmp.eq.s32.totalorder %s4746_s28, 1 }
   0xe   : > { %p118_p3 = scmp.ne.s32.totalorder %s4664_s25, %s4660_s24  ;;  %p119_p4 = scmp.eq.s32.totalorder %s6217_s29, 1 }
   0xf   : > { %s4763_s10 = scalar_select %p100_p1, %s4668_s26, %s102_s8  }
  0x10   : > { %p4765_p5 = por %p113_p2, %p112_p0  ;;  %p4769_p6 = por %p119_p4, %p118_p3 }
  0x11   : > { %p3300_p7 = scmp.ge.s32.totalorder %s4672_s27, 1  ;;  %p255_p8 = scmp.lt.s32.totalorder %s4672_s27, 3 }
  0x13   : > { %p256_p9 = pnand %p3300_p7, %p255_p8 }
  0x14   : > { %p307_p10 = scmp.lt.s32.totalorder (!%p256_p9), %s4746_s28, 1  ;;  %s6225_s1 = sld [smem:[#allocation13_spill]] (!%p256_p9) }
  0x15   : > { %259 = sbr.rel (%p256_p9) target bundleno = 4906 (0x132a), region = 32  ;;  %s6226_s0 = sld [smem:[#allocation12_spill]] (!%p256_p9) }
  0x16   : > { %s4674_s13 = smov (!%p256_p9), 32   ;;  %s4675_s19 = smov (!%p256_p9), 96  }
  0x17   : > { %s4676_s21 = smov (!%p256_p9), 64  }
  0x1a   : > { %v427_v0 = vld [vmem:[%s6225_s1 + $0x58] sm:$0xff]  ;;  %v426_v1 = vld [vmem:[%s6225_s1 + $0x50] sm:$0xff]  ;;  %s4783_s17 = scalar_select %p307_p10, %s4746_s28, 1  ;;  %v425_v2 = vld [vmem:[%s6225_s1 + $0x48] sm:$0xff]  ;;  %vm333_vm0 = vcmask 1040384   ;;  %vm398_vm1 = vcmask 261120  }
  0x1b   : > { %3869 = vmatprep.subr.mxu0 %v427_v0  ;;  %v424_v3 = vld [vmem:[%s6225_s1 + $0x40] sm:$0xff]  ;;  %v423_v8 = vld [vmem:[%s6225_s1 + $0x38] sm:$0xff]  ;;  %v422_v12 = vld [vmem:[%s6225_s1 + $0x30] sm:$0xff]  ;;  %vm407_vm2 = vcmask 523264   ;;  %vm435_vm3 = vcmask 785408   ;;  %vm653_vm4 = vcmask 1046528  }
  0x1c   : > { %3870 = vmatpush3.msra.mxu0 %v427_v0  ;;  %s3624_s20 = sshll.u32 %s4783_s17, 6  ;;  %v421_v17 = vld [vmem:[%s6225_s1 + $0x28] sm:$0xff]  ;;  %v420_v18 = vld [vmem:[%s6225_s1 + $0x20] sm:$0xff]  ;;  %v419_v22 = vld [vmem:[%s6225_s1 + $0x18] sm:$0xff]  ;;  %vm4678_vm5 = vmmov 0  }
  0x1d   : > { %3871 = vmatprep.subr.mxu0 %v426_v1  ;;  %s4794_s23 = scalar_lea.vmem %s6226_s0, %s3624_s20  ;;  %v418_v26 = vld [vmem:[%s6225_s1 + $0x10] sm:$0xff]  ;;  %v417_v27 = vld [vmem:[%s6225_s1 + $0x8] sm:$0xff]  ;;  %v416_v31 = vld [vmem:[%s6225_s1] sm:$0xff]  ;;  %s5211_s15 = scalar_lea.vmem %s6214_s5, %s3624_s20 }
  0x1e   : > { %3872 = vmatpush3.msra.mxu0 %v426_v1  ;;  %v318_v4 = vld [vmem:[%s4794_s23 + $0x8] sm:$0xff]  ;;  %v317_v5 = vld [vmem:[%s4794_s23] sm:$0xff]  ;;  %v319_v6 = vld [vmem:[%s4794_s23 + $0x10] sm:$0xff] }
  0x1f   : > { %3873 = vmatprep.subr.mxu0 %v425_v2  ;;  %376 = vrot.lane.b32.xlu1 %v318_v4, %s4674_s13  ;;  %v334_v7 = vrot.slane %v317_v5, 7  ;;  %v335_v9 = vrot.slane %v318_v4, 7  ;;  %v337_v10 = vrot.slane %v319_v6, 7  ;;  %v320_v11 = vld [vmem:[%s4794_s23 + $0x18] sm:$0xff]  ;;  %v321_v16 = vld [vmem:[%s4794_s23 + $0x20] sm:$0xff]  ;;  %v322_v21 = vld [vmem:[%s4794_s23 + $0x28] sm:$0xff] }
  0x20   : > { %3874 = vmatpush3.msra.mxu0 %v425_v2  ;;  %374 = vrot.lane.b32.xlu0 %v317_v5, %s4674_s13  ;;  %v339_v15 = vrot.slane %v320_v11, 7  ;;  %v341_v20 = vrot.slane %v321_v16, 7  ;;  %v343_v24 = vrot.slane %v322_v21, 7  ;;  %v323_v25 = vld [vmem:[%s4794_s23 + $0x30] sm:$0xff]  ;;  %v324_v30 = vld [vmem:[%s4794_s23 + $0x38] sm:$0xff] }
  0x21   : > { %3875 = vmatprep.subr.mxu0 %v424_v3  ;;  %v338_v13 = vsel %vm333_vm0, %v335_v9, %v337_v10  ;;  %v336_v14 = vsel %vm333_vm0, %v334_v7, %v335_v9  ;;  %v345_v29 = vrot.slane %v323_v25, 7  ;;  %v347_v33 = vrot.slane %v324_v30, 7  ;;  %v3337_v4 = vld [vmem:[%s6225_s1 + $0xb8] sm:$0xff]  ;;  %v3336_v5 = vld [vmem:[%s6225_s1 + $0xb0] sm:$0xff] }
  0x22   : > { %3876 = vmatpush3.msra.mxu0 %v424_v3  ;;  %v340_v19 = vsel %vm333_vm0, %v337_v10, %v339_v15  ;;  %v342_v23 = vsel %vm333_vm0, %v339_v15, %v341_v20  ;;  %v344_v28 = vsel %vm333_vm0, %v341_v20, %v343_v24  ;;  %3905 = vmatprep.subr.mxu1 %v3337_v4 }
  0x23   : > { %3877 = vmatprep.subr.mxu0 %v423_v8  ;;  %378 = vrot.lane.b32.xlu1 %v319_v6, %s4674_s13  ;;  %v346_v32 = vsel %vm333_vm0, %v343_v24, %v345_v29  ;;  %v348_v34 = vsel %vm333_vm0, %v345_v29, %v347_v33  ;;  %v3335_v6 = vld [vmem:[%s6225_s1 + $0xa8] sm:$0xff] }
  0x24   : > { %349 = vrot.lane.b32.xlu0 %v334_v7, %s4675_s19  ;;  %3878 = vmatpush3.msra.mxu0 %v423_v8  ;;  %v3334_v7 = vld [vmem:[%s6225_s1 + $0xa0] sm:$0xff] }
  0x25   : > { %3879 = vmatprep.subr.mxu0 %v422_v12  ;;  %3906 = vmatpush3.msra.mxu1 %v3337_v4  ;;  %v3309_v8 = vld [vmem:[%s6211_s2] ss:$0 sm:$0xff] }
  0x26   : > { %3880 = vmatpush3.msra.mxu0 %v422_v12  ;;  %3907 = vmatprep.subr.mxu1 %v3336_v5 }
  0x27   : > { %351 = vrot.lane.b32.xlu1 %v336_v14, %s4675_s19  ;;  %3881 = vmatprep.subr.mxu0 %v421_v17 }
  0x28   : > { %353 = vrot.lane.b32.xlu0 %v338_v13, %s4675_s19  ;;  %3882 = vmatpush3.msra.mxu0 %v421_v17 }
  0x29   : > { %3883 = vmatprep.subr.mxu0 %v420_v18  ;;  %3908 = vmatpush3.msra.mxu1 %v3336_v5 }
  0x2a   : > { %3884 = vmatpush3.msra.mxu0 %v420_v18  ;;  %3909 = vmatprep.subr.mxu1 %v3335_v6 }
  0x2b   : > { %380 = vrot.lane.b32.xlu1 %v320_v11, %s4674_s13  ;;  %3885 = vmatprep.subr.mxu0 %v419_v22 }
  0x2c   : > { %355 = vrot.lane.b32.xlu0 %v340_v19, %s4675_s19  ;;  %3886 = vmatpush3.msra.mxu0 %v419_v22 }
  0x2d   : > { %3887 = vmatprep.subr.mxu0 %v418_v26  ;;  %3910 = vmatpush3.msra.mxu1 %v3335_v6 }
  0x2e   : > { %3888 = vmatpush3.msra.mxu0 %v418_v26  ;;  %3911 = vmatprep.subr.mxu1 %v3334_v7 }
  0x2f   : > { %382 = vrot.lane.b32.xlu1 %v321_v16, %s4674_s13  ;;  %3889 = vmatprep.subr.mxu0 %v417_v27 }
  0x30   : > { %357 = vrot.lane.b32.xlu0 %v342_v23, %s4675_s19  ;;  %3890 = vmatpush3.msra.mxu0 %v417_v27 }
  0x31   : > { %3891 = vmatprep.subr.mxu0 %v416_v31  ;;  %3912 = vmatpush3.msra.mxu1 %v3334_v7 }
  0x32   : > { %3892 = vmatpush3.msra.mxu0 %v416_v31 }
  0x33   : > { %384 = vrot.lane.b32.xlu1 %v322_v21, %s4674_s13 }
  0x34   : > { %359 = vrot.lane.b32.xlu0 %v344_v28, %s4675_s19 }
  0x37   : > { %386 = vrot.lane.b32.xlu1 %v323_v25, %s4674_s13 }
  0x38   : > { %361 = vrot.lane.b32.xlu0 %v346_v32, %s4675_s19 }
  0x3b   : > { %388 = vrot.lane.b32.xlu1 %v324_v30, %s4674_s13 }
  0x3c   : > { %363 = vrot.lane.b32.xlu0 %v348_v34, %s4675_s19  ;;  %s4679_s19 = smov [#allocation7]  }
  0x91   : > { %v377_v35 = vpop.permute.xlu1 %376 }
  0x92   : > { %v375_v36 = vpop.permute.xlu0 %374 }
  0x95   : > { %v379_v37 = vpop.permute.xlu1 %378 }
  0x96   : > { %v350_v38 = vpop.permute.xlu0 %349 }
  0x97   : > { %v373_v39 = vsel %vm333_vm0, 0.0, %v350_v38 }
  0x98   : > { %v399_v40 = vsel %vm398_vm1, %v373_v39, %v375_v36  ;;  %v3333_v39 = vld [vmem:[%s6225_s1 + $0x98] sm:$0xff] }
  0x99   : > { %v408_v41 = vsel %vm407_vm2, %v399_v40, %v375_v36  ;;  %v352_v43 = vpop.permute.xlu1 %351  ;;  %3913 = vmatprep.subr.mxu1 %v3333_v39 }
  0x9a   : > { %3893 = vmatprep.mubr.msk.f32.mxu0 %vm435_vm3, %v408_v41  ;;  %v354_v42 = vpop.permute.xlu0 %353  ;;  %v400_v45 = vsel %vm398_vm1, %v352_v43, %v377_v35  ;;  %3914 = vmatpush3.msra.mxu1 %v3333_v39  ;;  %v3331_v43 = vld [vmem:[%s6225_s1 + $0x88] sm:$0xff] }
  0x9b   : > { %v401_v44 = vsel %vm398_vm1, %v354_v42, %v379_v37  ;;  %v409_v46 = vsel %vm407_vm2, %v400_v45, %v377_v35  ;;  %v3332_v42 = vld [vmem:[%s6225_s1 + $0x90] sm:$0xff] }
  0x9c   : > { %v410_v47 = vsel %vm407_vm2, %v401_v44, %v379_v37  ;;  %3894 = vmatmul.mubr.msk.f32.vlgmr.msra.gmra.mxu0 %vm435_vm3, %v409_v46  ;;  %3915 = vmatprep.subr.mxu1 %v3332_v42  ;;  %v3330_v44 = vld [vmem:[%s6225_s1 + $0x80] sm:$0xff] }
  0x9d   : > { %3896 = vmatprep.mubr.msk.f32.mxu0 %vm435_vm3, %v410_v47  ;;  %v381_v49 = vpop.permute.xlu1 %380  ;;  %3916 = vmatpush3.msra.mxu1 %v3332_v42  ;;  %v3329_v47 = vld [vmem:[%s6225_s1 + $0x78] sm:$0xff] }
  0x9e   : > { %v356_v48 = vpop.permute.xlu0 %355  ;;  %3917 = vmatprep.subr.mxu1 %v3331_v43 }
  0x9f   : > { %v402_v50 = vsel %vm398_vm1, %v356_v48, %v381_v49  ;;  %3918 = vmatpush3.msra.mxu1 %v3331_v43 }
  0xa0   : > { %v411_v51 = vsel %vm407_vm2, %v402_v50, %v381_v49  ;;  %3919 = vmatprep.subr.mxu1 %v3330_v44 }
  0xa1   : > { %3897 = vmatmul.mubr.msk.f32.gmra.mxu0 %vm435_vm3, %v411_v51  ;;  %v383_v53 = vpop.permute.xlu1 %382  ;;  %3920 = vmatpush3.msra.mxu1 %v3330_v44  ;;  %v3328_v51 = vld [vmem:[%s6225_s1 + $0x70] sm:$0xff] }
  0xa2   : > { %v358_v52 = vpop.permute.xlu0 %357  ;;  %3921 = vmatprep.subr.mxu1 %v3329_v47 }
  0xa3   : > { %v403_v54 = vsel %vm398_vm1, %v358_v52, %v383_v53  ;;  %3922 = vmatpush3.msra.mxu1 %v3329_v47 }
  0xa4   : > { %v412_v55 = vsel %vm407_vm2, %v403_v54, %v383_v53  ;;  %3923 = vmatprep.subr.mxu1 %v3328_v51  ;;  %v3327_v54 = vld [vmem:[%s6225_s1 + $0x68] sm:$0xff] }
  0xa5   : > { %3899 = vmatprep.mubr.msk.f32.mxu0 %vm435_vm3, %v412_v55  ;;  %v385_v57 = vpop.permute.xlu1 %384  ;;  %3924 = vmatpush3.msra.mxu1 %v3328_v51 }
  0xa6   : > { %v360_v56 = vpop.permute.xlu0 %359  ;;  %3925 = vmatprep.subr.mxu1 %v3327_v54 }
  0xa7   : > { %v404_v58 = vsel %vm398_vm1, %v360_v56, %v385_v57  ;;  %3926 = vmatpush3.msra.mxu1 %v3327_v54 }
  0xa8   : > { %v413_v59 = vsel %vm407_vm2, %v404_v58, %v385_v57  ;;  %v3326_v57 = vld [vmem:[%s6225_s1 + $0x60] sm:$0xff] }
  0xa9   : > { %3900 = vmatmul.mubr.msk.f32.gmra.mxu0 %vm435_vm3, %v413_v59  ;;  %v387_v61 = vpop.permute.xlu1 %386  ;;  %3927 = vmatprep.subr.mxu1 %v3326_v57 }
  0xaa   : > { %v362_v60 = vpop.permute.xlu0 %361  ;;  %3928 = vmatpush3.msra.mxu1 %v3326_v57 }
  0xab   : > { %v405_v62 = vsel %vm398_vm1, %v362_v60, %v387_v61 }
  0xac   : > { %v414_v63 = vsel %vm407_vm2, %v405_v62, %v387_v61 }
  0xad   : > { %3902 = vmatprep.mubr.msk.f32.mxu0 %vm435_vm3, %v414_v63  ;;  %v389_v1 = vpop.permute.xlu1 %388 }
  0xae   : > { %v364_v0 = vpop.permute.xlu0 %363 }
  0xaf   : > { %v406_v2 = vsel %vm398_vm1, %v364_v0, %v389_v1 }
  0xb0   : > { %v415_v3 = vsel %vm407_vm2, %v406_v2, %v389_v1 }
  0xb1   : > { %3903 = vmatmul.mubr.msk.f32.gmra.mxu0 %vm435_vm3, %v415_v3 }
 0x15c   : > { %v3895_v9 = vpop.f32.mrf.mxu0 }
 0x15d   : > { %v4894_v10 = vadd.f32 %v3895_v9, %v3309_v8 }
 0x15e   : > { %v526_v11 = vpop.f32.mrf.mxu0 }
 0x15f   : > { %v3319_v12 = vmul.f32 -1.442695, %v4894_v10  ;;  %v4897_v13 = vadd.f32 %v3309_v8, %v526_v11 }
 0x161   : > { %v3898_v14 = vpop.f32.mrf.mxu0  ;;  %4398 = vpow2.f32 %v3319_v12  ;;  %v3318_v15 = vmul.f32 -1.442695, %v4897_v13 }
 0x162   : > { %v4900_v16 = vadd.f32 %v3898_v14, %v3309_v8 }
 0x163   : > { %v536_v17 = vpop.f32.mrf.mxu0  ;;  %4400 = vpow2.f32 %v3318_v15 }
 0x164   : > { %v3321_v18 = vmul.f32 -1.442695, %v4900_v16  ;;  %v4903_v19 = vadd.f32 %v3309_v8, %v536_v17 }
 0x166   : > { %4402 = vpow2.f32 %v3321_v18  ;;  %v3320_v20 = vmul.f32 -1.442695, %v4903_v19 }
 0x168   : > { %4404 = vpow2.f32 %v3320_v20 }
 0x169   : > { %v3901_v21 = vpop.f32.mrf.mxu0 }
 0x16a   : > { %v4906_v22 = vadd.f32 %v3901_v21, %v3309_v8 }
 0x16b   : > { %v546_v23 = vpop.f32.mrf.mxu0 }
 0x16c   : > { %v3323_v24 = vmul.f32 -1.442695, %v4906_v22  ;;  %v4909_v25 = vadd.f32 %v3309_v8, %v546_v23 }
 0x16e   : > { %4406 = vpow2.f32 %v3323_v24  ;;  %v3322_v26 = vmul.f32 -1.442695, %v4909_v25  ;;  %v4399_v27 = vpop.eup %4398 }
 0x16f   : > { %v590_v28 = vadd.f32 1.0, %v4399_v27 }
 0x170   : > { %4408 = vpow2.f32 %v3322_v26  ;;  %v4401_v29 = vpop.eup %4400 }
 0x171   : > { %v3904_v30 = vpop.f32.mrf.mxu0  ;;  %4410 = vrcp.f32 %v590_v28  ;;  %v589_v31 = vadd.f32 1.0, %v4401_v29 }
 0x172   : > { %v4912_v32 = vadd.f32 %v3904_v30, %v3309_v8 }
 0x173   : > { %v4403_v33 = vpop.eup %4402  ;;  %v556_v34 = vpop.f32.mrf.mxu0  ;;  %4412 = vrcp.f32 %v589_v31 }
 0x174   : > { %v592_v35 = vadd.f32 1.0, %v4403_v33  ;;  %v3325_v36 = vmul.f32 -1.442695, %v4912_v32  ;;  %v4915_v37 = vadd.f32 %v3309_v8, %v556_v34 }
 0x175   : > { %v4405_v38 = vpop.eup %4404 }
 0x176   : > { %4414 = vrcp.f32 %v592_v35  ;;  %v591_v40 = vadd.f32 1.0, %v4405_v38  ;;  %v3324_v41 = vmul.f32 -1.442695, %v4915_v37 }
 0x177   : > { %4416 = vpow2.f32 %v3325_v36 }
 0x178   : > { %4418 = vrcp.f32 %v591_v40 }
 0x179   : > { %4420 = vpow2.f32 %v3324_v41 }
 0x17b   : > { %v4407_v45 = vpop.eup %4406 }
 0x17c   : > { %v594_v46 = vadd.f32 1.0, %v4407_v45 }
 0x17d   : > { %v4409_v48 = vpop.eup %4408 }
 0x17e   : > { %4422 = vrcp.f32 %v594_v46  ;;  %v593_v49 = vadd.f32 1.0, %v4409_v48  ;;  %v4411_v50 = vpop.eup %4410 }
 0x17f   : > { %v4937_v52 = vmul.f32 %v4411_v50, %v4894_v10 }
 0x180   : > { %4424 = vrcp.f32 %v593_v49  ;;  %v4413_v53 = vpop.eup %4412 }
 0x181   : > { %v4943_v55 = vmul.f32 %v4413_v53, %v4897_v13  ;;  %673 = vrot.lane.b32.xlu1 %v4937_v52, %s4674_s13  ;;  %v655_v61 = vrot.slane %v4937_v52, 1  ;;  %v630_v36 = vrot.slane %v4937_v52, 7 }
 0x183   : > { %v4415_v56 = vpop.eup %4414  ;;  %671 = vrot.lane.b32.xlu0 %v4943_v55, %s4674_s13  ;;  %v654_v60 = vrot.slane %v4943_v55, 1 }
 0x184   : > { %v4417_v58 = vpop.eup %4416  ;;  %v4951_v59 = vmul.f32 %v4415_v56, %v4900_v16 }
 0x185   : > { %v4419_v62 = vpop.eup %4418  ;;  %v596_v63 = vadd.f32 1.0, %v4417_v58  ;;  %v656_v1 = vsel %vm653_vm4, %v654_v60, %v655_v61 }
 0x186   : > { %v4421_v0 = vpop.eup %4420  ;;  %677 = vrot.lane.b32.xlu1 %v4951_v59, %s4674_s13  ;;  %v4961_v2 = vmul.f32 %v4419_v62, %v4903_v19  ;;  %v659_v8 = vrot.slane %v4951_v59, 1  ;;  %v634_v48 = vrot.slane %v4951_v59, 7 }
 0x187   : > { %4426 = vrcp.f32 %v596_v63  ;;  %v595_v3 = vadd.f32 1.0, %v4421_v0  ;;  %696 = vrot.lane.b32.xlu0 %v656_v1, %s4676_s21 }
 0x188   : > { %v657_v5 = vrot.slane %v4961_v2, 1  ;;  %v632_v34 = vrot.slane %v4961_v2, 7 }
 0x189   : > { %4428 = vrcp.f32 %v595_v3 }
 0x18a   : > { %v660_v10 = vsel %vm653_vm4, %v657_v5, %v659_v8  ;;  %v658_v11 = vsel %vm653_vm4, %v655_v61, %v657_v5  ;;  %v633_v40 = vsel %vm333_vm0, %v630_v36, %v632_v34  ;;  %v635_v50 = vsel %vm333_vm0, %v632_v34, %v634_v48 }
 0x18b   : > { %v4423_v4 = vpop.eup %4422  ;;  %675 = vrot.lane.b32.xlu0 %v4961_v2, %s4674_s13 }
 0x18c   : > { %v4966_v6 = vmul.f32 %v4423_v4, %v4906_v22 }
 0x18d   : > { %v4425_v7 = vpop.eup %4424 }
 0x18e   : > { %681 = vrot.lane.b32.xlu1 %v4966_v6, %s4674_s13  ;;  %v4974_v9 = vmul.f32 %v4425_v7, %v4909_v25  ;;  %v663_v15 = vrot.slane %v4966_v6, 1  ;;  %v629_v25 = vrot.slane %v4943_v55, 7  ;;  %v638_v57 = vrot.slane %v4966_v6, 7 }
 0x18f   : > { %700 = vrot.lane.b32.xlu0 %v660_v10, %s4676_s21 }
 0x190   : > { %v661_v12 = vrot.slane %v4974_v9, 1  ;;  %v652_v28 = vsel %vm333_vm0, 0.0, %v629_v25  ;;  %v631_v38 = vsel %vm333_vm0, %v629_v25, %v630_v36  ;;  %v636_v46 = vrot.slane %v4974_v9, 7 }
 0x192   : > { %698 = vrot.lane.b32.xlu1 %v658_v11, %s4676_s21  ;;  %v664_v18 = vsel %vm653_vm4, %v661_v12, %v663_v15  ;;  %v662_v19 = vsel %vm653_vm4, %v659_v8, %v661_v12  ;;  %v637_v53 = vsel %vm333_vm0, %v634_v48, %v636_v46  ;;  %v639_v63 = vsel %vm333_vm0, %v636_v46, %v638_v57 }
 0x193   : > { %679 = vrot.lane.b32.xlu0 %v4974_v9, %s4674_s13 }
 0x194   : > { %v4427_v13 = vpop.eup %4426 }
 0x195   : > { %v4984_v14 = vmul.f32 %v4427_v13, %v4912_v32 }
 0x196   : > { %v4429_v16 = vpop.eup %4428 }
 0x197   : > { %v4988_v17 = vmul.f32 %v4429_v16, %v4915_v37  ;;  %685 = vrot.lane.b32.xlu1 %v4984_v14, %s4674_s13  ;;  %704 = vrot.lane.b32.xlu0 %v664_v18, %s4676_s21  ;;  %v667_v21 = vrot.slane %v4984_v14, 1  ;;  %v642_v4 = vrot.slane %v4984_v14, 7  ;;  %v3367_v16 = vld [vmem:[%s6225_s1 + $0x118] sm:$0xff]  ;;  %v3366_v18 = vld [vmem:[%s6225_s1 + $0x110] sm:$0xff] }
 0x198   : > { %3941 = vmatprep.subr.mxu0 %v3367_v16 }
 0x199   : > { %v665_v20 = vrot.slane %v4988_v17, 1  ;;  %v670_v24 = vsel %vm653_vm4, %v667_v21, 0.0  ;;  %v640_v54 = vrot.slane %v4988_v17, 7  ;;  %3942 = vmatpush3.msra.mxu0 %v3367_v16 }
 0x19a   : > { %3943 = vmatprep.subr.mxu0 %v3366_v18 }
 0x19b   : > { %702 = vrot.lane.b32.xlu1 %v662_v19, %s4676_s21  ;;  %683 = vrot.lane.b32.xlu0 %v4988_v17, %s4674_s13  ;;  %v666_v22 = vsel %vm653_vm4, %v663_v15, %v665_v20  ;;  %v668_v23 = vsel %vm653_vm4, %v665_v20, %v667_v21  ;;  %v641_v1 = vsel %vm333_vm0, %v638_v57, %v640_v54  ;;  %v3365_v19 = vld [vmem:[%s6225_s1 + $0x108] sm:$0xff]  ;;  %v3364_v20 = vld [vmem:[%s6225_s1 + $0x100] sm:$0xff] }
 0x19c   : > { %v643_v11 = vsel %vm333_vm0, %v640_v54, %v642_v4  ;;  %3944 = vmatpush3.msra.mxu0 %v3366_v18  ;;  %v3339_v21 = vld [vmem:[%s6211_s2 + $0x1] ss:$0 sm:$0xff] }
 0x19d   : > { %3945 = vmatprep.subr.mxu0 %v3365_v19 }
 0x19e   : > { %3946 = vmatpush3.msra.mxu0 %v3365_v19 }
 0x19f   : > { %706 = vrot.lane.b32.xlu1 %v666_v22, %s4676_s21  ;;  %708 = vrot.lane.b32.xlu0 %v668_v23, %s4676_s21 }
 0x1a0   : > { %3947 = vmatprep.subr.mxu0 %v3364_v20 }
 0x1a1   : > { %3948 = vmatpush3.msra.mxu0 %v3364_v20 }
 0x1a3   : > { %710 = vrot.lane.b32.xlu1 %v670_v24, %s4676_s21 }
 0x1f3   : > { %v674_v26 = vpop.permute.xlu1 %673 }
 0x1f4   : > { %v721_v39 = vsel %vm398_vm1, %v631_v38, %v674_v26 }
 0x1f5   : > { %v672_v27 = vpop.permute.xlu0 %671 }
 0x1f6   : > { %v720_v29 = vsel %vm398_vm1, %v652_v28, %v672_v27 }
 0x1f8   : > { %v678_v32 = vpop.permute.xlu1 %677 }
 0x1f9   : > { %v697_v30 = vpop.permute.xlu0 %696  ;;  %v723_v51 = vsel %vm398_vm1, %v635_v50, %v678_v32  ;;  %v3363_v50 = vld [vmem:[%s6225_s1 + $0xf8] sm:$0xff] }
 0x1fa   : > { %v728_v31 = vsel %vm407_vm2, %v720_v29, %v697_v30  ;;  %3949 = vmatprep.subr.mxu0 %v3363_v50 }
 0x1fb   : > { %3929 = vmatprep.mubr.msk.f32.mxu1 %vm435_vm3, %v728_v31  ;;  %3950 = vmatpush3.msra.mxu0 %v3363_v50 }
 0x1fd   : > { %v676_v33 = vpop.permute.xlu0 %675 }
 0x1fe   : > { %v722_v42 = vsel %vm398_vm1, %v633_v40, %v676_v33 }
 0x200   : > { %v682_v35 = vpop.permute.xlu1 %681 }
 0x201   : > { %v701_v37 = vpop.permute.xlu0 %700  ;;  %v725_v0 = vsel %vm398_vm1, %v639_v63, %v682_v35 }
 0x202   : > { %v730_v44 = vsel %vm407_vm2, %v722_v42, %v701_v37 }
 0x204   : > { %v699_v41 = vpop.permute.xlu1 %698 }
 0x205   : > { %v729_v43 = vsel %vm407_vm2, %v721_v39, %v699_v41  ;;  %v680_v45 = vpop.permute.xlu0 %679 }
 0x206   : > { %3930 = vmatmul.mubr.msk.f32.vlgmr.msra.gmra.mxu1 %vm435_vm3, %v729_v43  ;;  %v724_v58 = vsel %vm398_vm1, %v637_v53, %v680_v45  ;;  %v3361_v53 = vld [vmem:[%s6225_s1 + $0xe8] sm:$0xff] }
 0x207   : > { %3932 = vmatprep.mubr.msk.f32.mxu1 %vm435_vm3, %v730_v44 }
 0x209   : > { %v686_v47 = vpop.permute.xlu1 %685  ;;  %v705_v49 = vpop.permute.xlu0 %704 }
 0x20a   : > { %v732_v62 = vsel %vm407_vm2, %v724_v58, %v705_v49  ;;  %v727_v12 = vsel %vm398_vm1, %v643_v11, %v686_v47 }
 0x20d   : > { %v703_v56 = vpop.permute.xlu1 %702  ;;  %v684_v61 = vpop.permute.xlu0 %683 }
 0x20e   : > { %v731_v60 = vsel %vm407_vm2, %v723_v51, %v703_v56  ;;  %v726_v5 = vsel %vm398_vm1, %v641_v1, %v684_v61  ;;  %v3362_v51 = vld [vmem:[%s6225_s1 + $0xf0] sm:$0xff] }
 0x20f   : > { %3933 = vmatmul.mubr.msk.f32.gmra.mxu1 %vm435_vm3, %v731_v60  ;;  %3951 = vmatprep.subr.mxu0 %v3362_v51  ;;  %v3360_v60 = vld [vmem:[%s6225_s1 + $0xe0] sm:$0xff] }
 0x210   : > { %3935 = vmatprep.mubr.msk.f32.mxu1 %vm435_vm3, %v732_v62  ;;  %3952 = vmatpush3.msra.mxu0 %v3362_v51 }
 0x211   : > { %v707_v3 = vpop.permute.xlu1 %706  ;;  %v709_v8 = vpop.permute.xlu0 %708  ;;  %3953 = vmatprep.subr.mxu0 %v3361_v53 }
 0x212   : > { %v733_v7 = vsel %vm407_vm2, %v725_v0, %v707_v3  ;;  %v734_v10 = vsel %vm407_vm2, %v726_v5, %v709_v8  ;;  %3954 = vmatpush3.msra.mxu0 %v3361_v53  ;;  %v3359_v0 = vld [vmem:[%s6225_s1 + $0xd8] sm:$0xff] }
 0x213   : > { %3936 = vmatmul.mubr.msk.f32.gmra.mxu1 %vm435_vm3, %v733_v7  ;;  %3955 = vmatprep.subr.mxu0 %v3360_v60  ;;  %v3358_v7 = vld [vmem:[%s6225_s1 + $0xd0] sm:$0xff] }
 0x214   : > { %3938 = vmatprep.mubr.msk.f32.mxu1 %vm435_vm3, %v734_v10  ;;  %3956 = vmatpush3.msra.mxu0 %v3360_v60 }
 0x215   : > { %v711_v13 = vpop.permute.xlu1 %710  ;;  %3957 = vmatprep.subr.mxu0 %v3359_v0 }
 0x216   : > { %v735_v15 = vsel %vm407_vm2, %v727_v12, %v711_v13  ;;  %3958 = vmatpush3.msra.mxu0 %v3359_v0  ;;  %v3357_v13 = vld [vmem:[%s6225_s1 + $0xc8] sm:$0xff] }
 0x217   : > { %3939 = vmatmul.mubr.msk.f32.gmra.mxu1 %vm435_vm3, %v735_v15  ;;  %3959 = vmatprep.subr.mxu0 %v3358_v7 }
 0x218   : > { %3960 = vmatpush3.msra.mxu0 %v3358_v7 }
 0x219   : > { %3961 = vmatprep.subr.mxu0 %v3357_v13 }
 0x21a   : > { %3962 = vmatpush3.msra.mxu0 %v3357_v13 }
 0x2c6   : > { %v3931_v22 = vpop.f32.mrf.mxu1 }
 0x2c7   : > { %v5061_v23 = vadd.f32 %v3931_v22, %v3339_v21 }
 0x2c8   : > { %v847_v24 = vpop.f32.mrf.mxu1 }
 0x2c9   : > { %v3349_v25 = vmul.f32 -1.442695, %v5061_v23  ;;  %v5064_v26 = vadd.f32 %v3339_v21, %v847_v24 }
 0x2cb   : > { %4430 = vpow2.f32 %v3349_v25  ;;  %v3348_v27 = vmul.f32 -1.442695, %v5064_v26 }
 0x2cd   : > { %4432 = vpow2.f32 %v3348_v27 }
 0x2cf   : > { %v3934_v28 = vpop.f32.mrf.mxu1 }
 0x2d0   : > { %v5067_v29 = vadd.f32 %v3934_v28, %v3339_v21 }
 0x2d1   : > { %v857_v30 = vpop.f32.mrf.mxu1 }
 0x2d2   : > { %v3351_v31 = vmul.f32 -1.442695, %v5067_v29  ;;  %v5070_v32 = vadd.f32 %v3339_v21, %v857_v30 }
 0x2d3   : > { %v3937_v33 = vpop.f32.mrf.mxu1 }
 0x2d4   : > { %4434 = vpow2.f32 %v3351_v31  ;;  %v3350_v34 = vmul.f32 -1.442695, %v5070_v32  ;;  %v5073_v35 = vadd.f32 %v3937_v33, %v3339_v21 }
 0x2d5   : > { %v867_v36 = vpop.f32.mrf.mxu1 }
 0x2d6   : > { %4436 = vpow2.f32 %v3350_v34  ;;  %v3353_v37 = vmul.f32 -1.442695, %v5073_v35  ;;  %v5076_v38 = vadd.f32 %v3339_v21, %v867_v36 }
 0x2d7   : > { %v3940_v39 = vpop.f32.mrf.mxu1 }
 0x2d8   : > { %v4431_v40 = vpop.eup %4430  ;;  %4438 = vpow2.f32 %v3353_v37  ;;  %v3352_v41 = vmul.f32 -1.442695, %v5076_v38  ;;  %v5079_v42 = vadd.f32 %v3940_v39, %v3339_v21 }
 0x2d9   : > { %v911_v43 = vadd.f32 1.0, %v4431_v40  ;;  %v877_v44 = vpop.f32.mrf.mxu1 }
 0x2da   : > { %v4433_v45 = vpop.eup %4432  ;;  %4440 = vpow2.f32 %v3352_v41  ;;  %v3355_v46 = vmul.f32 -1.442695, %v5079_v42  ;;  %v5082_v47 = vadd.f32 %v3339_v21, %v877_v44  ;;  %v3356_v21 = vld [vmem:[%s6225_s1 + $0xc0] sm:$0xff] }
 0x2db   : > { %4442 = vrcp.f32 %v911_v43  ;;  %v910_v48 = vadd.f32 1.0, %v4433_v45  ;;  %3963 = vmatprep.subr.mxu0 %v3356_v21 }
 0x2dc   : > { %4444 = vpow2.f32 %v3355_v46  ;;  %v3354_v49 = vmul.f32 -1.442695, %v5082_v47  ;;  %3964 = vmatpush3.msra.mxu0 %v3356_v21 }
 0x2dd   : > { %4446 = vrcp.f32 %v910_v48 }
 0x2de   : > { %4448 = vpow2.f32 %v3354_v49 }
 0x2e1   : > { %v4435_v54 = vpop.eup %4434 }
 0x2e2   : > { %v913_v56 = vadd.f32 1.0, %v4435_v54 }
 0x2e3   : > { %v4437_v57 = vpop.eup %4436 }
 0x2e4   : > { %4450 = vrcp.f32 %v913_v56  ;;  %v912_v58 = vadd.f32 1.0, %v4437_v57 }
 0x2e5   : > { %v4439_v61 = vpop.eup %4438 }
 0x2e6   : > { %4452 = vrcp.f32 %v912_v58  ;;  %v915_v62 = vadd.f32 1.0, %v4439_v61 }
 0x2e7   : > { %v4441_v63 = vpop.eup %4440 }
 0x2e8   : > { %v4443_v1 = vpop.eup %4442  ;;  %4454 = vrcp.f32 %v915_v62  ;;  %v914_v3 = vadd.f32 1.0, %v4441_v63 }
 0x2e9   : > { %v4445_v4 = vpop.eup %4444  ;;  %v935_v5 = vmul.f32 %v4443_v1, %v5061_v23 }
 0x2ea   : > { %v4447_v8 = vpop.eup %4446  ;;  %4456 = vrcp.f32 %v914_v3  ;;  %v917_v10 = vadd.f32 1.0, %v4445_v4 }
 0x2eb   : > { %v4449_v11 = vpop.eup %4448  ;;  %v5105_v12 = vmul.f32 %v4447_v8, %v5064_v26  ;;  %993 = vrot.lane.b32.xlu1 %v935_v5, %s4674_s13  ;;  %v951_v16 = vrot.slane %v935_v5, 7  ;;  %v975_v20 = vrot.slane %v935_v5, 1 }
 0x2ec   : > { %4458 = vrcp.f32 %v917_v10  ;;  %v916_v15 = vadd.f32 1.0, %v4449_v11 }
 0x2ed   : > { %v950_v18 = vrot.slane %v5105_v12, 7  ;;  %991 = vrot.lane.b32.xlu0 %v5105_v12, %s4674_s13  ;;  %v974_v19 = vrot.slane %v5105_v12, 1 }
 0x2ee   : > { %4460 = vrcp.f32 %v916_v15 }
 0x2ef   : > { %v976_v22 = vsel %vm653_vm4, %v974_v19, %v975_v20  ;;  %v5122_v23 = vsel %vm333_vm0, %v950_v18, %v951_v16  ;;  %v973_v3 = vsel %vm333_vm0, 0.0, %v950_v18 }
 0x2f1   : > { %v4451_v24 = vpop.eup %4450  ;;  %1016 = vrot.lane.b32.xlu0 %v976_v22, %s4676_s21 }
 0x2f2   : > { %v937_v25 = vmul.f32 %v4451_v24, %v5067_v29 }
 0x2f3   : > { %v4453_v26 = vpop.eup %4452 }
 0x2f4   : > { %v936_v27 = vmul.f32 %v4453_v26, %v5070_v32  ;;  %997 = vrot.lane.b32.xlu1 %v937_v25, %s4674_s13  ;;  %v979_v34 = vrot.slane %v937_v25, 1  ;;  %v955_v37 = vrot.slane %v937_v25, 7 }
 0x2f5   : > { %v4455_v28 = vpop.eup %4454 }
 0x2f6   : > { %v953_v30 = vrot.slane %v936_v27, 7  ;;  %v939_v31 = vmul.f32 %v4455_v28, %v5073_v35  ;;  %995 = vrot.lane.b32.xlu0 %v936_v27, %s4674_s13  ;;  %v977_v33 = vrot.slane %v936_v27, 1 }
 0x2f7   : > { %v4457_v36 = vpop.eup %4456 }
 0x2f8   : > { %v938_v39 = vmul.f32 %v4457_v36, %v5076_v38  ;;  %1001 = vrot.lane.b32.xlu1 %v939_v31, %s4674_s13  ;;  %v980_v29 = vsel %vm653_vm4, %v977_v33, %v979_v34  ;;  %v956_v32 = vsel %vm333_vm0, %v953_v30, %v955_v37  ;;  %v954_v41 = vsel %vm333_vm0, %v951_v16, %v953_v30 }
 0x2f9   : > { %v4459_v40 = vpop.eup %4458  ;;  %v959_v45 = vrot.slane %v939_v31, 7  ;;  %v978_v46 = vsel %vm653_vm4, %v975_v20, %v977_v33 }
 0x2fa   : > { %v957_v43 = vrot.slane %v938_v39, 7  ;;  %v941_v35 = vmul.f32 %v4459_v40, %v5079_v42  ;;  %1020 = vrot.lane.b32.xlu0 %v980_v29, %s4676_s21  ;;  %v981_v48 = vrot.slane %v938_v39, 1  ;;  %v983_v42 = vrot.slane %v939_v31, 1 }
 0x2fb   : > { %v4461_v44 = vpop.eup %4460 }
 0x2fc   : > { %v940_v38 = vmul.f32 %v4461_v44, %v5082_v47  ;;  %1018 = vrot.lane.b32.xlu1 %v978_v46, %s4676_s21  ;;  %v960_v49 = vsel %vm333_vm0, %v957_v43, %v959_v45  ;;  %v958_v50 = vsel %vm333_vm0, %v955_v37, %v957_v43  ;;  %v963_v51 = vrot.slane %v941_v35, 7  ;;  %v3394_v43 = vld [vmem:[%s6225_s1 + $0x168] sm:$0xff]  ;;  %v3392_v44 = vld [vmem:[%s6225_s1 + $0x158] sm:$0xff]  ;;  %v3369_v46 = vld [vmem:[%s6211_s2 + $0x2] ss:$0 sm:$0xff] }
 0x2fd   : > { %v984_v47 = vsel %vm653_vm4, %v981_v48, %v983_v42  ;;  %v982_v57 = vsel %vm653_vm4, %v979_v34, %v981_v48  ;;  %v987_v61 = vrot.slane %v941_v35, 1 }
 0x2fe   : > { %v961_v53 = vrot.slane %v940_v38, 7  ;;  %999 = vrot.lane.b32.xlu0 %v938_v39, %s4674_s13  ;;  %v985_v58 = vrot.slane %v940_v38, 1 }
 0x2ff   : > { %v990_v63 = vsel %vm653_vm4, %v987_v61, 0.0 }
 0x300   : > { %1005 = vrot.lane.b32.xlu1 %v941_v35, %s4674_s13  ;;  %v964_v54 = vsel %vm333_vm0, %v961_v53, %v963_v51  ;;  %v962_v56 = vsel %vm333_vm0, %v959_v45, %v961_v53  ;;  %v986_v60 = vsel %vm653_vm4, %v983_v42, %v985_v58  ;;  %v988_v62 = vsel %vm653_vm4, %v985_v58, %v987_v61  ;;  %v3393_v35 = vld [vmem:[%s6225_s1 + $0x160] sm:$0xff]  ;;  %v3391_v45 = vld [vmem:[%s6225_s1 + $0x150] sm:$0xff]  ;;  %v3386_v58 = vld [vmem:[%s6225_s1 + $0x128] sm:$0xff] }
 0x301   : > { %v3389_v51 = vld [vmem:[%s6225_s1 + $0x140] sm:$0xff] }
 0x302   : > { %1024 = vrot.lane.b32.xlu0 %v984_v47, %s4676_s21 }
 0x304   : > { %1022 = vrot.lane.b32.xlu1 %v982_v57, %s4676_s21 }
 0x306   : > { %1003 = vrot.lane.b32.xlu0 %v940_v38, %s4674_s13 }
 0x308   : > { %1026 = vrot.lane.b32.xlu1 %v986_v60, %s4676_s21  ;;  %v3385_v60 = vld [vmem:[%s6225_s1 + $0x120] sm:$0xff] }
 0x30a   : > { %1028 = vrot.lane.b32.xlu0 %v988_v62, %s4676_s21 }
 0x30c   : > { %1030 = vrot.lane.b32.xlu1 %v990_v63, %s4676_s21 }
 0x35d   : > { %v994_v1 = vpop.permute.xlu1 %993 }
 0x35e   : > { %v1041_v15 = vsel %vm398_vm1, %v5122_v23, %v994_v1 }
 0x35f   : > { %v992_v0 = vpop.permute.xlu0 %991 }
 0x360   : > { %v1040_v4 = vsel %vm398_vm1, %v973_v3, %v992_v0 }
 0x363   : > { %v1017_v5 = vpop.permute.xlu0 %1016 }
 0x364   : > { %v1048_v7 = vsel %vm407_vm2, %v1040_v4, %v1017_v5 }
 0x365   : > { %3965 = vmatprep.mubr.msk.f32.mxu0 %vm435_vm3, %v1048_v7 }
 0x366   : > { %v998_v8 = vpop.permute.xlu1 %997 }
 0x367   : > { %v1043_v24 = vsel %vm398_vm1, %v956_v32, %v998_v8  ;;  %v3396_v32 = vld [vmem:[%s6225_s1 + $0x178] sm:$0xff] }
 0x368   : > { %v996_v10 = vpop.permute.xlu0 %995  ;;  %3977 = vmatprep.subr.mxu1 %v3396_v32 }
 0x369   : > { %v1042_v19 = vsel %vm398_vm1, %v954_v41, %v996_v10  ;;  %v3395_v41 = vld [vmem:[%s6225_s1 + $0x170] sm:$0xff]  ;;  %3978 = vmatpush3.msra.mxu1 %v3396_v32 }
 0x36a   : > { %v1002_v11 = vpop.permute.xlu1 %1001  ;;  %3979 = vmatprep.subr.mxu1 %v3395_v41 }
 0x36b   : > { %v1045_v30 = vsel %vm398_vm1, %v960_v49, %v1002_v11  ;;  %3980 = vmatpush3.msra.mxu1 %v3395_v41 }
 0x36c   : > { %v1021_v13 = vpop.permute.xlu0 %1020  ;;  %3981 = vmatprep.subr.mxu1 %v3394_v43 }
 0x36d   : > { %v1050_v18 = vsel %vm407_vm2, %v1042_v19, %v1021_v13  ;;  %3982 = vmatpush3.msra.mxu1 %v3394_v43 }
 0x36e   : > { %v1019_v16 = vpop.permute.xlu1 %1018  ;;  %3983 = vmatprep.subr.mxu1 %v3393_v35 }
 0x36f   : > { %v1049_v12 = vsel %vm407_vm2, %v1041_v15, %v1019_v16  ;;  %3984 = vmatpush3.msra.mxu1 %v3393_v35 }
 0x370   : > { %v1000_v20 = vpop.permute.xlu0 %999  ;;  %3966 = vmatmul.mubr.msk.f32.vlgmr.msra.gmra.mxu0 %vm435_vm3, %v1049_v12  ;;  %3985 = vmatprep.subr.mxu1 %v3392_v44 }
 0x371   : > { %3968 = vmatprep.mubr.msk.f32.mxu0 %vm435_vm3, %v1050_v18  ;;  %v1044_v26 = vsel %vm398_vm1, %v958_v50, %v1000_v20  ;;  %3986 = vmatpush3.msra.mxu1 %v3392_v44  ;;  %v3390_v50 = vld [vmem:[%s6225_s1 + $0x148] sm:$0xff] }
 0x372   : > { %v1006_v21 = vpop.permute.xlu1 %1005  ;;  %3987 = vmatprep.subr.mxu1 %v3391_v45 }
 0x373   : > { %v1047_v39 = vsel %vm398_vm1, %v964_v54, %v1006_v21  ;;  %3988 = vmatpush3.msra.mxu1 %v3391_v45  ;;  %v3418_v45 = vld [vmem:[%s6225_s1 + $0x1d8] sm:$0xff] }
 0x374   : > { %v1025_v22 = vpop.permute.xlu0 %1024  ;;  %3989 = vmatprep.subr.mxu1 %v3390_v50  ;;  %4007 = vmatprep.subr.mxu0 %v3418_v45 }
 0x375   : > { %v1052_v27 = vsel %vm407_vm2, %v1044_v26, %v1025_v22  ;;  %3990 = vmatpush3.msra.mxu1 %v3390_v50  ;;  %4008 = vmatpush3.msra.mxu0 %v3418_v45  ;;  %v3398_v50 = vld [vmem:[%s6211_s2 + $0x3] ss:$0 sm:$0xff] }
 0x376   : > { %v1023_v25 = vpop.permute.xlu1 %1022  ;;  %3991 = vmatprep.subr.mxu1 %v3389_v51 }
 0x377   : > { %v1051_v23 = vsel %vm407_vm2, %v1043_v24, %v1023_v25  ;;  %3992 = vmatpush3.msra.mxu1 %v3389_v51 }
 0x378   : > { %v1004_v28 = vpop.permute.xlu0 %1003  ;;  %3969 = vmatmul.mubr.msk.f32.gmra.mxu0 %vm435_vm3, %v1051_v23 }
 0x379   : > { %3971 = vmatprep.mubr.msk.f32.mxu0 %vm435_vm3, %v1052_v27  ;;  %v1046_v34 = vsel %vm398_vm1, %v962_v56, %v1004_v28  ;;  %v3388_v56 = vld [vmem:[%s6225_s1 + $0x138] sm:$0xff] }
 0x37a   : > { %v1027_v31 = vpop.permute.xlu1 %1026  ;;  %3993 = vmatprep.subr.mxu1 %v3388_v56 }
 0x37b   : > { %v1053_v33 = vsel %vm407_vm2, %v1045_v30, %v1027_v31  ;;  %3994 = vmatpush3.msra.mxu1 %v3388_v56 }
 0x37c   : > { %v1029_v36 = vpop.permute.xlu0 %1028  ;;  %3972 = vmatmul.mubr.msk.f32.gmra.mxu0 %vm435_vm3, %v1053_v33 }
 0x37d   : > { %v1054_v37 = vsel %vm407_vm2, %v1046_v34, %v1029_v36 }
 0x37e   : > { %3974 = vmatprep.mubr.msk.f32.mxu0 %vm435_vm3, %v1054_v37  ;;  %v1031_v29 = vpop.permute.xlu1 %1030 }
 0x37f   : > { %v1055_v40 = vsel %vm407_vm2, %v1047_v39, %v1031_v29 }
 0x380   : > { %3975 = vmatmul.mubr.msk.f32.gmra.mxu0 %vm435_vm3, %v1055_v40 }
 0x430   : > { %v3967_v38 = vpop.f32.mrf.mxu0 }
 0x431   : > { %v1173_v48 = vadd.f32 %v3967_v38, %v3369_v46  ;;  %v3416_v38 = vld [vmem:[%s6225_s1 + $0x1c8] sm:$0xff] }
 0x432   : > { %v1167_v49 = vpop.f32.mrf.mxu0 }
 0x433   : > { %v1207_v53 = vadd.f32 %v1173_v48, %v4937_v52  ;;  %v1168_v42 = vadd.f32 %v3369_v46, %v1167_v49  ;;  %v3387_v52 = vld [vmem:[%s6225_s1 + $0x130] sm:$0xff]  ;;  %v3415_v48 = vld [vmem:[%s6225_s1 + $0x1c0] sm:$0xff]  ;;  %v3414_v49 = vld [vmem:[%s6225_s1 + $0x1b8] sm:$0xff] }
 0x434   : > { %3995 = vmatprep.subr.mxu1 %v3387_v52 }
 0x435   : > { %1215 = vst.msk [vmem:[%s5211_s15 + $0x8] sm:$0xff] %vm398_vm1, %v1207_v53  ;;  %v1206_v54 = vadd.f32 %v1168_v42, %v4943_v55  ;;  %3996 = vmatpush3.msra.mxu1 %v3387_v52 }
 0x436   : > { %3997 = vmatprep.subr.mxu1 %v3386_v58 }
 0x437   : > { %1214 = vst.msk [vmem:[%s5211_s15] sm:$0xff] %vm398_vm1, %v1206_v54  ;;  %3998 = vmatpush3.msra.mxu1 %v3386_v58 }
 0x438   : > { %v3970_v47 = vpop.f32.mrf.mxu0  ;;  %3999 = vmatprep.subr.mxu1 %v3385_v60 }
 0x439   : > { %v1183_v57 = vadd.f32 %v3970_v47, %v3369_v46  ;;  %4000 = vmatpush3.msra.mxu1 %v3385_v60 }
 0x43a   : > { %v1177_v55 = vpop.f32.mrf.mxu0 }
 0x43b   : > { %v1209_v61 = vadd.f32 %v1183_v57, %v4951_v59  ;;  %v1178_v62 = vadd.f32 %v3369_v46, %v1177_v55 }
 0x43c   : > { %v3973_v63 = vpop.f32.mrf.mxu0 }
 0x43d   : > { %1217 = vst.msk [vmem:[%s5211_s15 + $0x18] sm:$0xff] %vm398_vm1, %v1209_v61  ;;  %v1208_v0 = vadd.f32 %v1178_v62, %v4961_v2  ;;  %v1193_v1 = vadd.f32 %v3973_v63, %v3369_v46 }
 0x43e   : > { %v1187_v3 = vpop.f32.mrf.mxu0  ;;  %v1222_v4 = vld [vmem:[%s5211_s15] ss:$2 sm:$0xff]  ;;  %v3381_v11 = vld [vmem:[%s5211_s15 + $0x1] ss:$2 sm:$0xff] }
 0x43f   : > { %1216 = vst.msk [vmem:[%s5211_s15 + $0x10] sm:$0xff] %vm398_vm1, %v1208_v0  ;;  %v1211_v59 = vadd.f32 %v1193_v1, %v4966_v6  ;;  %v1188_v5 = vadd.f32 %v3369_v46, %v1187_v3  ;;  %1257 = vrot.lane.b32.xlu0 %v1222_v4, %s4674_s13  ;;  %v1241_v19 = vrot.slane %v3381_v11, 7  ;;  %v3413_v3 = vld [vmem:[%s6225_s1 + $0x1b0] sm:$0xff] }
 0x440   : > { %v3976_v7 = vpop.f32.mrf.mxu0 }
 0x441   : > { %1219 = vst.msk [vmem:[%s5211_s15 + $0x28] sm:$0xff] %vm398_vm1, %v1211_v59  ;;  %v1210_v2 = vadd.f32 %v1188_v5, %v4974_v9  ;;  %v1203_v8 = vadd.f32 %v3976_v7, %v3369_v46  ;;  %v1252_v27 = vsel %vm333_vm0, 0.0, %v1241_v19  ;;  %v3412_v59 = vld [vmem:[%s6225_s1 + $0x1a8] sm:$0xff]  ;;  %v3411_v5 = vld [vmem:[%s6225_s1 + $0x1a0] sm:$0xff] }
 0x442   : > { %v1197_v10 = vpop.f32.mrf.mxu0 }
 0x443   : > { %1218 = vst.msk [vmem:[%s5211_s15 + $0x20] sm:$0xff] %vm398_vm1, %v1210_v2  ;;  %v1213_v13 = vadd.f32 %v1203_v8, %v4984_v14  ;;  %v1198_v6 = vadd.f32 %v3369_v46, %v1197_v10  ;;  %1269 = vrot.lane.b32.xlu0 %v3381_v11, %s4676_s21  ;;  %v3417_v46 = vld [vmem:[%s6225_s1 + $0x1d0] sm:$0xff]  ;;  %v3410_v10 = vld [vmem:[%s6225_s1 + $0x198] sm:$0xff] }
 0x444   : > { %4009 = vmatprep.subr.mxu0 %v3417_v46  ;;  %v3409_v11 = vld [vmem:[%s6225_s1 + $0x190] sm:$0xff] }
 0x445   : > { %1221 = vst.msk [vmem:[%s5211_s15 + $0x38] sm:$0xff] %vm398_vm1, %v1213_v13  ;;  %v1212_v15 = vadd.f32 %v1198_v6, %v4988_v17  ;;  %4010 = vmatpush3.msra.mxu0 %v3417_v46  ;;  %v3408_v6 = vld [vmem:[%s6225_s1 + $0x188] sm:$0xff] }
 0x446   : > { %v3378_v16 = vld [vmem:[%s5211_s15 + $0x10] ss:$2 sm:$0xff]  ;;  %v3382_v9 = vld [vmem:[%s5211_s15 + $0x11] ss:$2 sm:$0xff]  ;;  %4011 = vmatprep.subr.mxu0 %v3416_v38 }
 0x447   : > { %1220 = vst.msk [vmem:[%s5211_s15 + $0x30] sm:$0xff] %vm398_vm1, %v1212_v15  ;;  %1259 = vrot.lane.b32.xlu1 %v3378_v16, %s4674_s13  ;;  %v1242_v12 = vrot.slane %v3382_v9, 7  ;;  %4012 = vmatpush3.msra.mxu0 %v3416_v38  ;;  %v3407_v15 = vld [vmem:[%s6225_s1 + $0x180] sm:$0xff] }
 0x448   : > { %4013 = vmatprep.subr.mxu0 %v3415_v48 }
 0x449   : > { %v1243_v18 = vsel %vm333_vm0, %v1241_v19, %v1242_v12  ;;  %4014 = vmatpush3.msra.mxu0 %v3415_v48 }
 0x44a   : > { %v3379_v14 = vld [vmem:[%s5211_s15 + $0x20] ss:$2 sm:$0xff]  ;;  %v3383_v20 = vld [vmem:[%s5211_s15 + $0x21] ss:$2 sm:$0xff]  ;;  %4015 = vmatprep.subr.mxu0 %v3414_v49 }
 0x44b   : > { %1271 = vrot.lane.b32.xlu1 %v3382_v9, %s4676_s21  ;;  %1261 = vrot.lane.b32.xlu0 %v3379_v14, %s4674_s13  ;;  %v1244_v21 = vrot.slane %v3383_v20, 7 }
 0x44c   : > { %4016 = vmatpush3.msra.mxu0 %v3414_v49 }
 0x44d   : > { %v1245_v22 = vsel %vm333_vm0, %v1242_v12, %v1244_v21  ;;  %4017 = vmatprep.subr.mxu0 %v3413_v3 }
 0x44e   : > { %v3380_v17 = vld [vmem:[%s5211_s15 + $0x30] ss:$2 sm:$0xff]  ;;  %v3384_v24 = vld [vmem:[%s5211_s15 + $0x31] ss:$2 sm:$0xff]  ;;  %4018 = vmatpush3.msra.mxu0 %v3413_v3  ;;  %s5463_s15 = sand.u32 1, %s4664_s25  }
 0x44f   : > { %1273 = vrot.lane.b32.xlu0 %v3383_v20, %s4676_s21  ;;  %1263 = vrot.lane.b32.xlu1 %v3380_v17, %s4674_s13  ;;  %v1246_v25 = vrot.slane %v3384_v24, 7  ;;  %s3303_s17 = sshll.u32 %s5463_s15, 5  ;;  %s3304_s18 = sshll.u32 %s5463_s15, 4 }
 0x450   : > { %4019 = vmatprep.subr.mxu0 %v3412_v59  ;;  %s5476_s14 = scalar_lea.vmem [#allocation6], %s3303_s17  ;;  %s5686_s17 = scalar_lea.vmem [#allocation7], %s3304_s18 }
 0x451   : > { %v1247_v26 = vsel %vm333_vm0, %v1244_v21, %v1246_v25  ;;  %4020 = vmatpush3.msra.mxu0 %v3412_v59  ;;  %s3117_s20 = sshll.u32 %s5686_s17, 4  ;;  %s3059_s9 = scalar_lea.sflag [#allocation8], %s5463_s15  ;;  %s6064_s20 = int_to_ptr.vmem [resolvable:$true] %s3117_s20 }
 0x452   : > { %4021 = vmatprep.subr.mxu0 %v3411_v5  ;;  %s4526_s23 = scalar_lea.vmem %s6064_s20, 256 }
 0x453   : > { %1275 = vrot.lane.b32.xlu1 %v3384_v24, %s4676_s21  ;;  %4022 = vmatpush3.msra.mxu0 %v3411_v5  ;;  %p4527_p11 = scmp.ne.s32.totalorder %s6064_s20, %s4526_s23 }
 0x454   : > { %4023 = vmatprep.subr.mxu0 %v3410_v10 }
 0x455   : > { %4024 = vmatpush3.msra.mxu0 %v3410_v10  ;;  %p4528_p12 = pnand %p4527_p11, %p4765_p5 }
 0x456   : > { %4025 = vmatprep.subr.mxu0 %v3409_v11 }
 0x457   : > { %4026 = vmatpush3.msra.mxu0 %v3409_v11  ;;  %p4529_p13 = pneg %p4528_p12 }
 0x458   : > { %4027 = vmatprep.subr.mxu0 %v3408_v6 }
 0x459   : > { %4028 = vmatpush3.msra.mxu0 %v3408_v6 }
 0x45a   : > { %4029 = vmatprep.subr.mxu0 %v3407_v15 }
 0x45b   : > { %4030 = vmatpush3.msra.mxu0 %v3407_v15 }
 0x4b1   : > { %v1258_v23 = vpop.permute.xlu0 %1257 }
 0x4b2   : > { %v1281_v28 = vsel %vm398_vm1, %v1252_v27, %v1258_v23 }
 0x4b5   : > { %v1270_v30 = vpop.permute.xlu0 %1269 }
 0x4b6   : > { %v1285_v31 = vsel %vm407_vm2, %v1281_v28, %v1270_v30 }
 0x4b7   : > { %4001 = vmatprep.mubr.msk.f32.mxu1 %vm435_vm3, %v1285_v31 }
 0x4b9   : > { %v1260_v33 = vpop.permute.xlu1 %1259 }
 0x4ba   : > { %v1282_v34 = vsel %vm398_vm1, %v1243_v18, %v1260_v33 }
 0x4bd   : > { %v1262_v36 = vpop.permute.xlu0 %1261  ;;  %v1272_v37 = vpop.permute.xlu1 %1271 }
 0x4be   : > { %v1286_v39 = vsel %vm407_vm2, %v1282_v34, %v1272_v37  ;;  %v1283_v29 = vsel %vm398_vm1, %v1245_v22, %v1262_v36 }
 0x4bf   : > { %4002 = vmatmul.mubr.msk.f32.vlgmr.msra.gmra.mxu1 %vm435_vm3, %v1286_v39 }
 0x4c1   : > { %v1274_v40 = vpop.permute.xlu0 %1273  ;;  %v1264_v32 = vpop.permute.xlu1 %1263 }
 0x4c2   : > { %v1287_v41 = vsel %vm407_vm2, %v1283_v29, %v1274_v40  ;;  %v1284_v43 = vsel %vm398_vm1, %v1247_v26, %v1264_v32 }
 0x4c3   : > { %4004 = vmatprep.mubr.msk.f32.mxu1 %vm435_vm3, %v1287_v41 }
 0x4c5   : > { %v1276_v35 = vpop.permute.xlu1 %1275 }
 0x4c6   : > { %v1288_v44 = vsel %vm407_vm2, %v1284_v43, %v1276_v35 }
 0x4c7   : > { %4005 = vmatmul.mubr.msk.f32.gmra.mxu1 %vm435_vm3, %v1288_v44 }
 0x57f   : > { %v4003_v51 = vpop.f32.mrf.mxu1 }
 0x580   : > { %v1394_v53 = vadd.f32 %v4003_v51, %v3398_v50 }
 0x581   : > { %v1388_v42 = vpop.f32.mrf.mxu1 }
 0x582   : > { %v3404_v54 = vmul.f32 -1.442695, %v1394_v53  ;;  %v1389_v56 = vadd.f32 %v3398_v50, %v1388_v42 }
 0x584   : > { %4462 = vpow2.f32 %v3404_v54  ;;  %v3403_v52 = vmul.f32 -1.442695, %v1389_v56  ;;  %v3440_v54 = vld [vmem:[%s6225_s1 + $0x238] sm:$0xff] }
 0x585   : > { %4037 = vmatprep.subr.mxu1 %v3440_v54 }
 0x586   : > { %4464 = vpow2.f32 %v3403_v52  ;;  %4038 = vmatpush3.msra.mxu1 %v3440_v54  ;;  %v3438_v52 = vld [vmem:[%s6225_s1 + $0x228] sm:$0xff] }
 0x587   : > { %v4006_v47 = vpop.f32.mrf.mxu1 }
 0x588   : > { %v1404_v57 = vadd.f32 %v4006_v47, %v3398_v50  ;;  %v3437_v47 = vld [vmem:[%s6225_s1 + $0x220] sm:$0xff] }
 0x589   : > { %v1398_v55 = vpop.f32.mrf.mxu1 }
 0x58a   : > { %v3406_v58 = vmul.f32 -1.442695, %v1404_v57  ;;  %v1399_v60 = vadd.f32 %v3398_v50, %v1398_v55  ;;  %v3435_v55 = vld [vmem:[%s6225_s1 + $0x210] sm:$0xff] }
 0x58c   : > { %4466 = vpow2.f32 %v3406_v58  ;;  %v3405_v61 = vmul.f32 -1.442695, %v1399_v60  ;;  %v3434_v58 = vld [vmem:[%s6225_s1 + $0x208] sm:$0xff] }
 0x58e   : > { %4468 = vpow2.f32 %v3405_v61 }
 0x591   : > { %v4463_v62 = vpop.eup %4462 }
 0x592   : > { %v1420_v63 = vadd.f32 1.0, %v4463_v62 }
 0x593   : > { %v4465_v0 = vpop.eup %4464 }
 0x594   : > { %4470 = vrcp.f32 %v1420_v63  ;;  %v1419_v1 = vadd.f32 1.0, %v4465_v0 }
 0x596   : > { %4472 = vrcp.f32 %v1419_v1 }
 0x599   : > { %v4467_v4 = vpop.eup %4466 }
 0x59a   : > { %v1422_v7 = vadd.f32 1.0, %v4467_v4 }
 0x59b   : > { %v4469_v2 = vpop.eup %4468 }
 0x59c   : > { %4474 = vrcp.f32 %v1422_v7  ;;  %v1421_v8 = vadd.f32 1.0, %v4469_v2 }
 0x59e   : > { %4476 = vrcp.f32 %v1421_v8 }
 0x5a1   : > { %v4471_v13 = vpop.eup %4470 }
 0x5a2   : > { %v5326_v16 = vmul.f32 %v4471_v13, %v1394_v53 }
 0x5a3   : > { %v4473_v9 = vpop.eup %4472 }
 0x5a4   : > { %v5328_v19 = vmul.f32 %v4473_v9, %v1389_v56  ;;  %1462 = vrot.lane.b32.xlu1 %v5326_v16, %s4674_s13  ;;  %v1452_v18 = vrot.slane %v5326_v16, 1  ;;  %v1440_v40 = vrot.slane %v5326_v16, 7  ;;  %v3439_v56 = vld [vmem:[%s6225_s1 + $0x230] sm:$0xff] }
 0x5a5   : > { %4039 = vmatprep.subr.mxu1 %v3439_v56 }
 0x5a6   : > { %1460 = vrot.lane.b32.xlu0 %v5328_v19, %s4674_s13  ;;  %v1451_v12 = vrot.slane %v5328_v19, 1  ;;  %v1439_v28 = vrot.slane %v5328_v19, 7  ;;  %4040 = vmatpush3.msra.mxu1 %v3439_v56 }
 0x5a7   : > { %4041 = vmatprep.subr.mxu1 %v3438_v52 }
 0x5a8   : > { %v1453_v14 = vsel %vm653_vm4, %v1451_v12, %v1452_v18  ;;  %v1450_v33 = vsel %vm333_vm0, 0.0, %v1439_v28  ;;  %v1441_v41 = vsel %vm333_vm0, %v1439_v28, %v1440_v40  ;;  %4042 = vmatpush3.msra.mxu1 %v3438_v52 }
 0x5a9   : > { %v4475_v20 = vpop.eup %4474  ;;  %4043 = vmatprep.subr.mxu1 %v3437_v47 }
 0x5aa   : > { %v5337_v21 = vmul.f32 %v4475_v20, %v1404_v57  ;;  %1473 = vrot.lane.b32.xlu0 %v1453_v14, %s4676_s21  ;;  %v3436_v57 = vld [vmem:[%s6225_s1 + $0x218] sm:$0xff]  ;;  %4044 = vmatpush3.msra.mxu1 %v3437_v47 }
 0x5ab   : > { %v4477_v22 = vpop.eup %4476  ;;  %4045 = vmatprep.subr.mxu1 %v3436_v57  ;;  %v3432_v20 = vld [vmem:[%s6225_s1 + $0x1f8] sm:$0xff] }
 0x5ac   : > { %v5340_v17 = vmul.f32 %v4477_v22, %v1399_v60  ;;  %1466 = vrot.lane.b32.xlu1 %v5337_v21, %s4674_s13  ;;  %v1456_v25 = vrot.slane %v5337_v21, 1  ;;  %v1444_v45 = vrot.slane %v5337_v21, 7  ;;  %4046 = vmatpush3.msra.mxu1 %v3436_v57  ;;  %v3420_v60 = vld [vmem:[%s6211_s2 + $0x4] ss:$0 sm:$0xff]  ;;  %v3431_v22 = vld [vmem:[%s6225_s1 + $0x1f0] sm:$0xff] }
 0x5ad   : > { %4047 = vmatprep.subr.mxu1 %v3435_v55 }
 0x5ae   : > { %1464 = vrot.lane.b32.xlu0 %v5340_v17, %s4674_s13  ;;  %v1454_v24 = vrot.slane %v5340_v17, 1  ;;  %v1459_v27 = vsel %vm653_vm4, %v1456_v25, 0.0  ;;  %v1442_v29 = vrot.slane %v5340_v17, 7  ;;  %4048 = vmatpush3.msra.mxu1 %v3435_v55 }
 0x5af   : > { %4049 = vmatprep.subr.mxu1 %v3434_v58 }
 0x5b0   : > { %v1455_v26 = vsel %vm653_vm4, %v1452_v18, %v1454_v24  ;;  %v1457_v23 = vsel %vm653_vm4, %v1454_v24, %v1456_v25  ;;  %v1443_v35 = vsel %vm333_vm0, %v1440_v40, %v1442_v29  ;;  %v1445_v50 = vsel %vm333_vm0, %v1442_v29, %v1444_v45  ;;  %4050 = vmatpush3.msra.mxu1 %v3434_v58  ;;  %v3433_v18 = vld [vmem:[%s6225_s1 + $0x200] sm:$0xff]  ;;  %v3430_v24 = vld [vmem:[%s6225_s1 + $0x1e8] sm:$0xff] }
 0x5b1   : > { %1475 = vrot.lane.b32.xlu1 %v1455_v26, %s4676_s21  ;;  %4051 = vmatprep.subr.mxu1 %v3433_v18  ;;  %v3429_v25 = vld [vmem:[%s6225_s1 + $0x1e0] sm:$0xff] }
 0x5b2   : > { %1477 = vrot.lane.b32.xlu0 %v1457_v23, %s4676_s21  ;;  %4052 = vmatpush3.msra.mxu1 %v3433_v18 }
 0x5b3   : > { %4053 = vmatprep.subr.mxu1 %v3432_v20 }
 0x5b4   : > { %4054 = vmatpush3.msra.mxu1 %v3432_v20 }
 0x5b5   : > { %1479 = vrot.lane.b32.xlu1 %v1459_v27, %s4676_s21  ;;  %4055 = vmatprep.subr.mxu1 %v3431_v22 }
 0x5b6   : > { %4056 = vmatpush3.msra.mxu1 %v3431_v22  ;;  %v3452_v22 = vld [vmem:[%s6225_s1 + $0x250] sm:$0xff] }
 0x5b7   : > { %4057 = vmatprep.subr.mxu1 %v3430_v24 }
 0x5b8   : > { %4058 = vmatpush3.msra.mxu1 %v3430_v24 }
 0x5b9   : > { %4059 = vmatprep.subr.mxu1 %v3429_v25 }
 0x5ba   : > { %4060 = vmatpush3.msra.mxu1 %v3429_v25  ;;  %v3450_v25 = vld [vmem:[%s6225_s1 + $0x240] sm:$0xff] }
 0x616   : > { %v1463_v31 = vpop.permute.xlu1 %1462 }
 0x617   : > { %v1486_v43 = vsel %vm398_vm1, %v1441_v41, %v1463_v31 }
 0x618   : > { %v1461_v30 = vpop.permute.xlu0 %1460 }
 0x619   : > { %v1485_v34 = vsel %vm398_vm1, %v1450_v33, %v1461_v30 }
 0x61c   : > { %v1474_v36 = vpop.permute.xlu0 %1473 }
 0x61d   : > { %v1489_v37 = vsel %vm407_vm2, %v1485_v34, %v1474_v36 }
 0x61e   : > { %4031 = vmatprep.mubr.msk.f32.mxu0 %vm435_vm3, %v1489_v37  ;;  %v1467_v39 = vpop.permute.xlu1 %1466 }
 0x61f   : > { %v1488_v51 = vsel %vm398_vm1, %v1445_v50, %v1467_v39 }
 0x620   : > { %v1465_v32 = vpop.permute.xlu0 %1464 }
 0x621   : > { %v1487_v46 = vsel %vm398_vm1, %v1443_v35, %v1465_v32 }
 0x623   : > { %v1476_v44 = vpop.permute.xlu1 %1475 }
 0x624   : > { %v1490_v38 = vsel %vm407_vm2, %v1486_v43, %v1476_v44  ;;  %v1478_v48 = vpop.permute.xlu0 %1477 }
 0x625   : > { %v1491_v49 = vsel %vm407_vm2, %v1487_v46, %v1478_v48  ;;  %4032 = vmatmul.mubr.msk.f32.vlgmr.msra.gmra.mxu0 %vm435_vm3, %v1490_v38 }
 0x626   : > { %4034 = vmatprep.mubr.msk.f32.mxu0 %vm435_vm3, %v1491_v49 }
 0x627   : > { %v1480_v53 = vpop.permute.xlu1 %1479 }
 0x628   : > { %v1492_v42 = vsel %vm407_vm2, %v1488_v51, %v1480_v53 }
 0x629   : > { %4035 = vmatmul.mubr.msk.f32.gmra.mxu0 %vm435_vm3, %v1492_v42 }
 0x6e5   : > { %v4033_v61 = vpop.f32.mrf.mxu0 }
 0x6e6   : > { %v1598_v62 = vadd.f32 %v4033_v61, %v3420_v60 }
 0x6e7   : > { %v1592_v63 = vpop.f32.mrf.mxu0 }
 0x6e8   : > { %v3426_v0 = vmul.f32 -1.442695, %v1598_v62  ;;  %v1593_v1 = vadd.f32 %v3420_v60, %v1592_v63 }
 0x6e9   : > { %v4036_v3 = vpop.f32.mrf.mxu0 }
 0x6ea   : > { %4478 = vpow2.f32 %v3426_v0  ;;  %v3425_v4 = vmul.f32 -1.442695, %v1593_v1  ;;  %v1608_v59 = vadd.f32 %v4036_v3, %v3420_v60  ;;  %v3461_v3 = vld [vmem:[%s6225_s1 + $0x298] sm:$0xff] }
 0x6eb   : > { %v1602_v5 = vpop.f32.mrf.mxu0  ;;  %4067 = vmatprep.subr.mxu0 %v3461_v3 }
 0x6ec   : > { %4480 = vpow2.f32 %v3425_v4  ;;  %v3428_v7 = vmul.f32 -1.442695, %v1608_v59  ;;  %v1603_v2 = vadd.f32 %v3420_v60, %v1602_v5  ;;  %v3460_v4 = vld [vmem:[%s6225_s1 + $0x290] sm:$0xff]  ;;  %4068 = vmatpush3.msra.mxu0 %v3461_v3  ;;  %v3458_v5 = vld [vmem:[%s6225_s1 + $0x280] sm:$0xff] }
 0x6ed   : > { %4069 = vmatprep.subr.mxu0 %v3460_v4 }
 0x6ee   : > { %4482 = vpow2.f32 %v3428_v7  ;;  %v3427_v8 = vmul.f32 -1.442695, %v1603_v2  ;;  %4070 = vmatpush3.msra.mxu0 %v3460_v4  ;;  %v3457_v7 = vld [vmem:[%s6225_s1 + $0x278] sm:$0xff] }
 0x6f0   : > { %4484 = vpow2.f32 %v3427_v8  ;;  %v3455_v8 = vld [vmem:[%s6225_s1 + $0x268] sm:$0xff] }
 0x6f7   : > { %v4479_v10 = vpop.eup %4478 }
 0x6f8   : > { %v1624_v11 = vadd.f32 1.0, %v4479_v10  ;;  %v3442_v10 = vld [vmem:[%s6211_s2 + $0x5] ss:$0 sm:$0xff] }
 0x6f9   : > { %v4481_v13 = vpop.eup %4480 }
 0x6fa   : > { %4486 = vrcp.f32 %v1624_v11  ;;  %v1623_v6 = vadd.f32 1.0, %v4481_v13 }
 0x6fb   : > { %v4483_v15 = vpop.eup %4482 }
 0x6fc   : > { %4488 = vrcp.f32 %v1623_v6  ;;  %v1626_v9 = vadd.f32 1.0, %v4483_v15  ;;  %v3454_v15 = vld [vmem:[%s6225_s1 + $0x260] sm:$0xff] }
 0x6fd   : > { %v4485_v12 = vpop.eup %4484 }
 0x6fe   : > { %4490 = vrcp.f32 %v1626_v9  ;;  %v1625_v14 = vadd.f32 1.0, %v4485_v12  ;;  %v3453_v9 = vld [vmem:[%s6225_s1 + $0x258] sm:$0xff] }
 0x700   : > { %4492 = vrcp.f32 %v1625_v14 }
 0x707   : > { %v4487_v26 = vpop.eup %4486 }
 0x708   : > { %v1636_v23 = vmul.f32 %v4487_v26, %v1598_v62 }
 0x709   : > { %v4489_v27 = vpop.eup %4488 }
 0x70a   : > { %v1635_v28 = vmul.f32 %v4489_v27, %v1593_v1  ;;  %1666 = vrot.lane.b32.xlu1 %v1636_v23, %s4674_s13  ;;  %v1656_v36 = vrot.slane %v1636_v23, 1  ;;  %v1644_v39 = vrot.slane %v1636_v23, 7 }
 0x70b   : > { %v4491_v30 = vpop.eup %4490 }
 0x70c   : > { %v1643_v31 = vrot.slane %v1635_v28, 7  ;;  %v1638_v33 = vmul.f32 %v4491_v30, %v1608_v59  ;;  %1664 = vrot.lane.b32.xlu0 %v1635_v28, %s4674_s13  ;;  %v1655_v34 = vrot.slane %v1635_v28, 1  ;;  %v3459_v59 = vld [vmem:[%s6225_s1 + $0x288] sm:$0xff] }
 0x70d   : > { %v4493_v37 = vpop.eup %4492  ;;  %4071 = vmatprep.subr.mxu0 %v3459_v59 }
 0x70e   : > { %v1637_v29 = vmul.f32 %v4493_v37, %v1603_v2  ;;  %1670 = vrot.lane.b32.xlu1 %v1638_v33, %s4674_s13  ;;  %v1657_v40 = vsel %vm653_vm4, %v1655_v34, %v1656_v36  ;;  %v1645_v32 = vsel %vm333_vm0, %v1643_v31, %v1644_v39  ;;  %v1648_v41 = vrot.slane %v1638_v33, 7  ;;  %4072 = vmatpush3.msra.mxu0 %v3459_v59  ;;  %v3456_v2 = vld [vmem:[%s6225_s1 + $0x270] sm:$0xff] }
 0x70f   : > { %v1660_v45 = vrot.slane %v1638_v33, 1  ;;  %v1654_v42 = vsel %vm333_vm0, 0.0, %v1643_v31  ;;  %4073 = vmatprep.subr.mxu0 %v3458_v5 }
 0x710   : > { %v1646_v43 = vrot.slane %v1637_v29, 7  ;;  %1677 = vrot.lane.b32.xlu0 %v1657_v40, %s4676_s21  ;;  %v1658_v35 = vrot.slane %v1637_v29, 1  ;;  %4074 = vmatpush3.msra.mxu0 %v3458_v5 }
 0x711   : > { %v1663_v48 = vsel %vm653_vm4, %v1660_v45, 0.0  ;;  %4075 = vmatprep.subr.mxu0 %v3457_v7 }
 0x712   : > { %v1659_v44 = vsel %vm653_vm4, %v1656_v36, %v1658_v35  ;;  %v1649_v46 = vsel %vm333_vm0, %v1646_v43, %v1648_v41  ;;  %v1647_v38 = vsel %vm333_vm0, %v1644_v39, %v1646_v43  ;;  %v1661_v49 = vsel %vm653_vm4, %v1658_v35, %v1660_v45  ;;  %4076 = vmatpush3.msra.mxu0 %v3457_v7  ;;  %v3478_v45 = vld [vmem:[%s6225_s1 + $0x2f0] sm:$0xff] }
 0x713   : > { %1679 = vrot.lane.b32.xlu1 %v1659_v44, %s4676_s21  ;;  %4077 = vmatprep.subr.mxu0 %v3456_v2  ;;  %v3479_v44 = vld [vmem:[%s6225_s1 + $0x2f8] sm:$0xff] }
 0x714   : > { %1668 = vrot.lane.b32.xlu0 %v1637_v29, %s4674_s13  ;;  %4078 = vmatpush3.msra.mxu0 %v3456_v2 }
 0x715   : > { %4079 = vmatprep.subr.mxu0 %v3455_v8  ;;  %4094 = vmatprep.subr.mxu1 %v3479_v44 }
 0x716   : > { %4080 = vmatpush3.msra.mxu0 %v3455_v8 }
 0x717   : > { %1683 = vrot.lane.b32.xlu1 %v1663_v48, %s4676_s21  ;;  %4081 = vmatprep.subr.mxu0 %v3454_v15  ;;  %v3475_v48 = vld [vmem:[%s6225_s1 + $0x2d8] sm:$0xff] }
 0x718   : > { %1681 = vrot.lane.b32.xlu0 %v1661_v49, %s4676_s21  ;;  %4082 = vmatpush3.msra.mxu0 %v3454_v15  ;;  %v3474_v49 = vld [vmem:[%s6225_s1 + $0x2d0] sm:$0xff] }
 0x719   : > { %4083 = vmatprep.subr.mxu0 %v3453_v9 }
 0x71a   : > { %4084 = vmatpush3.msra.mxu0 %v3453_v9 }
 0x71b   : > { %4085 = vmatprep.subr.mxu0 %v3452_v22 }
 0x71c   : > { %4086 = vmatpush3.msra.mxu0 %v3452_v22 }
 0x77c   : > { %v1667_v50 = vpop.permute.xlu1 %1666 }
 0x77d   : > { %v1690_v47 = vsel %vm398_vm1, %v1645_v32, %v1667_v50  ;;  %v3473_v50 = vld [vmem:[%s6225_s1 + $0x2c8] sm:$0xff] }
 0x77e   : > { %v1665_v51 = vpop.permute.xlu0 %1664 }
 0x77f   : > { %v1689_v54 = vsel %vm398_vm1, %v1654_v42, %v1665_v51  ;;  %v3472_v51 = vld [vmem:[%s6225_s1 + $0x2c0] sm:$0xff] }
 0x780   : > { %v1671_v53 = vpop.permute.xlu1 %1670 }
 0x781   : > { %v1692_v63 = vsel %vm398_vm1, %v1649_v46, %v1671_v53  ;;  %v3477_v46 = vld [vmem:[%s6225_s1 + $0x2e8] sm:$0xff]  ;;  %v3463_v53 = vld [vmem:[%s6211_s2 + $0x6] ss:$0 sm:$0xff] }
 0x782   : > { %v1678_v56 = vpop.permute.xlu0 %1677 }
 0x783   : > { %v1693_v52 = vsel %vm407_vm2, %v1689_v54, %v1678_v56 }
 0x784   : > { %4061 = vmatprep.mubr.msk.f32.mxu1 %vm435_vm3, %v1693_v52 }
 0x785   : > { %v1680_v57 = vpop.permute.xlu1 %1679 }
 0x786   : > { %v1694_v55 = vsel %vm407_vm2, %v1690_v47, %v1680_v57  ;;  %v1669_v58 = vpop.permute.xlu0 %1668 }
 0x787   : > { %4062 = vmatmul.mubr.msk.f32.vlgmr.msra.gmra.mxu1 %vm435_vm3, %v1694_v55  ;;  %v1691_v61 = vsel %vm398_vm1, %v1647_v38, %v1669_v58  ;;  %v3476_v38 = vld [vmem:[%s6225_s1 + $0x2e0] sm:$0xff] }
 0x788   : > { %4095 = vmatpush3.msra.mxu1 %v3479_v44  ;;  %v3487_v44 = vld [vmem:[%s6225_s1 + $0x308] sm:$0xff] }
 0x789   : > { %v1684_v60 = vpop.permute.xlu1 %1683  ;;  %4096 = vmatprep.subr.mxu1 %v3478_v45 }
 0x78a   : > { %v1682_v62 = vpop.permute.xlu0 %1681  ;;  %v1696_v1 = vsel %vm407_vm2, %v1692_v63, %v1684_v60  ;;  %4097 = vmatpush3.msra.mxu1 %v3478_v45  ;;  %v3470_v63 = vld [vmem:[%s6225_s1 + $0x2b0] sm:$0xff]  ;;  %v3486_v45 = vld [vmem:[%s6225_s1 + $0x300] sm:$0xff] }
 0x78b   : > { %v1695_v0 = vsel %vm407_vm2, %v1691_v61, %v1682_v62  ;;  %4098 = vmatprep.subr.mxu1 %v3477_v46  ;;  %v3471_v62 = vld [vmem:[%s6225_s1 + $0x2b8] sm:$0xff] }
 0x78c   : > { %4064 = vmatprep.mubr.msk.f32.mxu1 %vm435_vm3, %v1695_v0  ;;  %4099 = vmatpush3.msra.mxu1 %v3477_v46  ;;  %v3469_v0 = vld [vmem:[%s6225_s1 + $0x2a8] sm:$0xff] }
 0x78d   : > { %4065 = vmatmul.mubr.msk.f32.gmra.mxu1 %vm435_vm3, %v1696_v1  ;;  %4100 = vmatprep.subr.mxu1 %v3476_v38  ;;  %v3468_v1 = vld [vmem:[%s6225_s1 + $0x2a0] sm:$0xff] }
 0x78e   : > { %4101 = vmatpush3.msra.mxu1 %v3476_v38 }
 0x78f   : > { %4102 = vmatprep.subr.mxu1 %v3475_v48 }
 0x790   : > { %4103 = vmatpush3.msra.mxu1 %v3475_v48 }
 0x791   : > { %4104 = vmatprep.subr.mxu1 %v3474_v49 }
 0x792   : > { %4105 = vmatpush3.msra.mxu1 %v3474_v49 }
 0x793   : > { %4106 = vmatprep.subr.mxu1 %v3473_v50 }
 0x794   : > { %4107 = vmatpush3.msra.mxu1 %v3473_v50 }
 0x795   : > { %4108 = vmatprep.subr.mxu1 %v3472_v51 }
 0x796   : > { %4109 = vmatpush3.msra.mxu1 %v3472_v51 }
 0x797   : > { %4110 = vmatprep.subr.mxu1 %v3471_v62 }
 0x798   : > { %4111 = vmatpush3.msra.mxu1 %v3471_v62 }
 0x799   : > { %4112 = vmatprep.subr.mxu1 %v3470_v63 }
 0x79a   : > { %4113 = vmatpush3.msra.mxu1 %v3470_v63 }
 0x79b   : > { %4114 = vmatprep.subr.mxu1 %v3469_v0 }
 0x79c   : > { %4115 = vmatpush3.msra.mxu1 %v3469_v0 }
 0x79d   : > { %4116 = vmatprep.subr.mxu1 %v3468_v1 }
 0x79e   : > { %4117 = vmatpush3.msra.mxu1 %v3468_v1  ;;  %v3514_v1 = vld [vmem:[%s6225_s1 + $0x3b8] sm:$0xff] }
 0x847   : > { %v4063_v11 = vpop.f32.mrf.mxu1 }
 0x848   : > { %v1802_v13 = vadd.f32 %v4063_v11, %v3442_v10 }
 0x849   : > { %v1796_v6 = vpop.f32.mrf.mxu1 }
 0x84a   : > { %v1816_v12 = vadd.f32 %v1802_v13, %v5326_v16  ;;  %v1797_v18 = vadd.f32 %v3442_v10, %v1796_v6 }
 0x84c   : > { %1820 = vst.msk [vmem:[%s5476_s14 + $0x8] sm:$0xff] %vm398_vm1, %v1816_v12  ;;  %v1815_v14 = vadd.f32 %v1797_v18, %v5328_v19  ;;  %v3451_v19 = vld [vmem:[%s6225_s1 + $0x248] sm:$0xff] }
 0x84d   : > { %v4066_v20 = vpop.f32.mrf.mxu1  ;;  %4087 = vmatprep.subr.mxu0 %v3451_v19 }
 0x84e   : > { %1819 = vst.msk [vmem:[%s5476_s14] sm:$0xff] %vm398_vm1, %v1815_v14  ;;  %v1812_v16 = vadd.f32 %v4066_v20, %v3442_v10  ;;  %4088 = vmatpush3.msra.mxu0 %v3451_v19  ;;  %v3497_v19 = vld [vmem:[%s6225_s1 + $0x358] sm:$0xff] }
 0x84f   : > { %v1806_v24 = vpop.f32.mrf.mxu1  ;;  %4089 = vmatprep.subr.mxu0 %v3450_v25 }
 0x850   : > { %v1818_v26 = vadd.f32 %v1812_v16, %v5337_v21  ;;  %v1807_v23 = vadd.f32 %v3442_v10, %v1806_v24  ;;  %4090 = vmatpush3.msra.mxu0 %v3450_v25  ;;  %v3496_v25 = vld [vmem:[%s6225_s1 + $0x350] sm:$0xff] }
 0x851   : > { %4121 = vmatprep.subr.mxu0 %v3497_v19 }
 0x852   : > { %1822 = vst.msk [vmem:[%s5476_s14 + $0x18] sm:$0xff] %vm398_vm1, %v1818_v26  ;;  %v1817_v27 = vadd.f32 %v1807_v23, %v5340_v17  ;;  %v3495_v26 = vld [vmem:[%s6225_s1 + $0x348] sm:$0xff]  ;;  %v3494_v23 = vld [vmem:[%s6225_s1 + $0x340] sm:$0xff] }
 0x854   : > { %1821 = vst.msk [vmem:[%s5476_s14 + $0x10] sm:$0xff] %vm398_vm1, %v1817_v27  ;;  %v3493_v27 = vld [vmem:[%s6225_s1 + $0x338] sm:$0xff] }
 0x855   : > { %v1823_v28 = vld [vmem:[%s5476_s14] ss:$2 sm:$0xff]  ;;  %v3448_v30 = vld [vmem:[%s5476_s14 + $0x1] ss:$2 sm:$0xff] }
 0x856   : > { %1840 = vrot.lane.b32.xlu0 %v1823_v28, %s4674_s13  ;;  %v1832_v21 = vrot.slane %v3448_v30, 7  ;;  %v3492_v28 = vld [vmem:[%s6225_s1 + $0x330] sm:$0xff] }
 0x858   : > { %v1837_v37 = vsel %vm333_vm0, 0.0, %v1832_v21 }
 0x85a   : > { %1846 = vrot.lane.b32.xlu0 %v3448_v30, %s4676_s21  ;;  %v3491_v30 = vld [vmem:[%s6225_s1 + $0x328] sm:$0xff] }
 0x85b   : > { %v3447_v31 = vld [vmem:[%s5476_s14 + $0x10] ss:$2 sm:$0xff]  ;;  %v3449_v33 = vld [vmem:[%s5476_s14 + $0x11] ss:$2 sm:$0xff] }
 0x85c   : > { %1842 = vrot.lane.b32.xlu1 %v3447_v31, %s4674_s13  ;;  %v1833_v34 = vrot.slane %v3449_v33, 7  ;;  %v3490_v31 = vld [vmem:[%s6225_s1 + $0x320] sm:$0xff] }
 0x85e   : > { %v1834_v36 = vsel %vm333_vm0, %v1832_v21, %v1833_v34 }
 0x860   : > { %1848 = vrot.lane.b32.xlu1 %v3449_v33, %s4676_s21  ;;  %v3481_v33 = vld [vmem:[%s6211_s2 + $0x7] ss:$0 sm:$0xff] }
 0x8c8   : > { %v1841_v17 = vpop.permute.xlu0 %1840 }
 0x8c9   : > { %v1852_v39 = vsel %vm398_vm1, %v1837_v37, %v1841_v17 }
 0x8cc   : > { %v1847_v29 = vpop.permute.xlu0 %1846 }
 0x8cd   : > { %v1854_v40 = vsel %vm407_vm2, %v1852_v39, %v1847_v29 }
 0x8ce   : > { %v1843_v32 = vpop.permute.xlu1 %1842  ;;  %4091 = vmatprep.mubr.msk.f32.mxu0 %vm435_vm3, %v1854_v40 }
 0x8cf   : > { %v1853_v41 = vsel %vm398_vm1, %v1834_v36, %v1843_v32 }
 0x8d2   : > { %v1849_v43 = vpop.permute.xlu1 %1848 }
 0x8d3   : > { %v1855_v35 = vsel %vm407_vm2, %v1853_v41, %v1849_v43  ;;  %v3489_v43 = vld [vmem:[%s6225_s1 + $0x318] sm:$0xff] }
 0x8d4   : > { %4092 = vmatmul.mubr.msk.f32.vlgmr.msra.gmra.mxu0 %vm435_vm3, %v1855_v35  ;;  %v3488_v35 = vld [vmem:[%s6225_s1 + $0x310] sm:$0xff] }
 0x8d5   : > { %4122 = vmatpush3.msra.mxu0 %v3497_v19 }
 0x8d6   : > { %4123 = vmatprep.subr.mxu0 %v3496_v25 }
 0x8d7   : > { %4124 = vmatpush3.msra.mxu0 %v3496_v25 }
 0x8d8   : > { %4125 = vmatprep.subr.mxu0 %v3495_v26 }
 0x8d9   : > { %4126 = vmatpush3.msra.mxu0 %v3495_v26 }
 0x8da   : > { %4127 = vmatprep.subr.mxu0 %v3494_v23 }
 0x8db   : > { %4128 = vmatpush3.msra.mxu0 %v3494_v23 }
 0x8dc   : > { %4129 = vmatprep.subr.mxu0 %v3493_v27 }
 0x8dd   : > { %4130 = vmatpush3.msra.mxu0 %v3493_v27 }
 0x8de   : > { %4131 = vmatprep.subr.mxu0 %v3492_v28 }
 0x8df   : > { %4132 = vmatpush3.msra.mxu0 %v3492_v28 }
 0x8e0   : > { %4133 = vmatprep.subr.mxu0 %v3491_v30 }
 0x8e1   : > { %4134 = vmatpush3.msra.mxu0 %v3491_v30 }
 0x8e2   : > { %4135 = vmatprep.subr.mxu0 %v3490_v31 }
 0x8e3   : > { %4136 = vmatpush3.msra.mxu0 %v3490_v31  ;;  %v3530_v31 = vld [vmem:[%s6225_s1 + $0x418] sm:$0xff] }
 0x8e4   : > { %4137 = vmatprep.subr.mxu0 %v3489_v43 }
 0x8e5   : > { %4138 = vmatpush3.msra.mxu0 %v3489_v43 }
 0x8e6   : > { %4139 = vmatprep.subr.mxu0 %v3488_v35 }
 0x8e7   : > { %4140 = vmatpush3.msra.mxu0 %v3488_v35 }
 0x8e8   : > { %4141 = vmatprep.subr.mxu0 %v3487_v44 }
 0x8e9   : > { %4142 = vmatpush3.msra.mxu0 %v3487_v44 }
 0x8ea   : > { %4143 = vmatprep.subr.mxu0 %v3486_v45 }
 0x8eb   : > { %4144 = vmatpush3.msra.mxu0 %v3486_v45 }
 0x994   : > { %v4093_v42 = vpop.f32.mrf.mxu0 }
 0x995   : > { %v1955_v54 = vadd.f32 %v4093_v42, %v3463_v53 }
 0x996   : > { %v1949_v56 = vpop.f32.mrf.mxu0 }
 0x997   : > { %v3467_v52 = vmul.f32 -1.442695, %v1955_v54  ;;  %v1950_v47 = vadd.f32 %v3463_v53, %v1949_v56 }
 0x999   : > { %4494 = vpow2.f32 %v3467_v52  ;;  %v3466_v57 = vmul.f32 -1.442695, %v1950_v47 }
 0x99b   : > { %4496 = vpow2.f32 %v3466_v57 }
 0x9a6   : > { %v4495_v55 = vpop.eup %4494 }
 0x9a7   : > { %v1965_v58 = vadd.f32 1.0, %v4495_v55 }
 0x9a8   : > { %v4497_v60 = vpop.eup %4496 }
 0x9a9   : > { %4498 = vrcp.f32 %v1965_v58  ;;  %v1964_v61 = vadd.f32 1.0, %v4497_v60 }
 0x9ab   : > { %4500 = vrcp.f32 %v1964_v61 }
 0x9b6   : > { %v4499_v3 = vpop.eup %4498 }
 0x9b7   : > { %v5553_v4 = vmul.f32 %v4499_v3, %v1955_v54  ;;  %v4677_v3 = vmov 0.0  }
 0x9b8   : > { %v4501_v59 = vpop.eup %4500  ;;  %4148 = vmatprep.subr.mxu1 %v4677_v3  ;;  %4175 = vmatprep.subr.mxu0 %v4677_v3 }
 0x9b9   : > { %v5555_v5 = vmul.f32 %v4501_v59, %v1950_v47  ;;  %1987 = vrot.lane.b32.xlu1 %v5553_v4, %s4674_s13  ;;  %v1981_v7 = vrot.slane %v5553_v4, 1  ;;  %v1975_v15 = vrot.slane %v5553_v4, 7  ;;  %v3513_v59 = vld [vmem:[%s6225_s1 + $0x3b0] sm:$0xff] }
 0x9bb   : > { %1985 = vrot.lane.b32.xlu0 %v5555_v5, %s4674_s13  ;;  %v1984_v2 = vsel %vm653_vm4, %v1981_v7, 0.0  ;;  %v1980_v8 = vrot.slane %v5555_v5, 1  ;;  %v1974_v13 = vrot.slane %v5555_v5, 7 }
 0x9bd   : > { %1994 = vrot.lane.b32.xlu1 %v1984_v2, %s4676_s21  ;;  %v1982_v10 = vsel %vm653_vm4, %v1980_v8, %v1981_v7  ;;  %v1979_v9 = vsel %vm333_vm0, 0.0, %v1974_v13  ;;  %v1976_v18 = vsel %vm333_vm0, %v1974_v13, %v1975_v15  ;;  %v3512_v7 = vld [vmem:[%s6225_s1 + $0x3a8] sm:$0xff]  ;;  %v3511_v2 = vld [vmem:[%s6225_s1 + $0x3a0] sm:$0xff]  ;;  %v3510_v8 = vld [vmem:[%s6225_s1 + $0x398] sm:$0xff] }
 0x9be   : > { %v3507_v13 = vld [vmem:[%s6225_s1 + $0x380] sm:$0xff]  ;;  %v3505_v15 = vld [vmem:[%s6225_s1 + $0x370] sm:$0xff] }
 0x9bf   : > { %1992 = vrot.lane.b32.xlu0 %v1982_v10, %s4676_s21  ;;  %v3509_v10 = vld [vmem:[%s6225_s1 + $0x390] sm:$0xff] }
 0xa2b   : > { %v1988_v11 = vpop.permute.xlu1 %1987 }
 0xa2c   : > { %v1999_v22 = vsel %vm398_vm1, %v1976_v18, %v1988_v11  ;;  %v3508_v11 = vld [vmem:[%s6225_s1 + $0x388] sm:$0xff] }
 0xa2d   : > { %v1986_v6 = vpop.permute.xlu0 %1985 }
 0xa2e   : > { %v1998_v14 = vsel %vm398_vm1, %v1979_v9, %v1986_v6  ;;  %v3506_v6 = vld [vmem:[%s6225_s1 + $0x378] sm:$0xff]  ;;  %v3504_v9 = vld [vmem:[%s6225_s1 + $0x368] sm:$0xff] }
 0xa2f   : > { %v1995_v12 = vpop.permute.xlu1 %1994 }
 0xa30   : > { %v2001_v24 = vsel %vm407_vm2, %v1999_v22, %v1995_v12  ;;  %v3499_v12 = vld [vmem:[%s6211_s2 + $0x8] ss:$0 sm:$0xff] }
 0xa31   : > { %v1993_v20 = vpop.permute.xlu0 %1992 }
 0xa32   : > { %v2000_v16 = vsel %vm407_vm2, %v1998_v14, %v1993_v20 }
 0xa33   : > { %4118 = vmatprep.mubr.msk.f32.mxu1 %vm435_vm3, %v2000_v16 }
 0xa34   : > { %4119 = vmatmul.mubr.msk.f32.vlgmr.msra.gmra.mxu1 %vm435_vm3, %v2001_v24  ;;  %v3503_v24 = vld [vmem:[%s6225_s1 + $0x360] sm:$0xff] }
 0xa35   : > { %4149 = vmatpush3.msra.mxu1 %v3514_v1  ;;  %4172 = vmatprep.mubr.msk.f32.mxu1 %vm4678_vm5, %v4677_v3  ;;  %v3539_v1 = vld [vmem:[%s6225_s1 + $0x440] sm:$0xff] }
 0xa36   : > { %4150 = vmatprep.subr.mxu1 %v4677_v3 }
 0xa37   : > { %4151 = vmatpush3.msra.mxu1 %v3513_v59  ;;  %v3538_v59 = vld [vmem:[%s6225_s1 + $0x438] sm:$0xff] }
 0xa38   : > { %4152 = vmatprep.subr.mxu1 %v4677_v3 }
 0xa39   : > { %4153 = vmatpush3.msra.mxu1 %v3512_v7  ;;  %v3537_v7 = vld [vmem:[%s6225_s1 + $0x430] sm:$0xff] }
 0xa3a   : > { %4154 = vmatprep.subr.mxu1 %v4677_v3 }
 0xa3b   : > { %4155 = vmatpush3.msra.mxu1 %v3511_v2  ;;  %v3532_v2 = vld [vmem:[%s6211_s2 + $0xa] ss:$0 sm:$0xff] }
 0xa3c   : > { %4156 = vmatprep.subr.mxu1 %v4677_v3 }
 0xa3d   : > { %4157 = vmatpush3.msra.mxu1 %v3510_v8 }
 0xa3e   : > { %4158 = vmatprep.subr.mxu1 %v4677_v3 }
 0xa3f   : > { %4159 = vmatpush3.msra.mxu1 %v3509_v10 }
 0xa40   : > { %4160 = vmatprep.subr.mxu1 %v4677_v3 }
 0xa41   : > { %4161 = vmatpush3.msra.mxu1 %v3508_v11 }
 0xa42   : > { %4162 = vmatprep.subr.mxu1 %v4677_v3 }
 0xa43   : > { %4163 = vmatpush3.msra.mxu1 %v3507_v13 }
 0xa44   : > { %4164 = vmatprep.subr.mxu1 %v4677_v3 }
 0xa45   : > { %4165 = vmatpush3.msra.mxu1 %v3506_v6 }
 0xa46   : > { %4166 = vmatprep.subr.mxu1 %v4677_v3 }
 0xa47   : > { %4167 = vmatpush3.msra.mxu1 %v3505_v15 }
 0xa48   : > { %4168 = vmatprep.subr.mxu1 %v4677_v3 }
 0xa49   : > { %4169 = vmatpush3.msra.mxu1 %v3504_v9  ;;  %v3536_v9 = vld [vmem:[%s6225_s1 + $0x428] sm:$0xff] }
 0xa4a   : > { %4170 = vmatprep.subr.mxu1 %v4677_v3 }
 0xa4b   : > { %4171 = vmatpush3.msra.mxu1 %v3503_v24 }
 0xa4c   : > { %4202 = vmatprep.subr.mxu1 %v4677_v3 }
 0xaf4   : > { %v4120_v21 = vpop.f32.mrf.mxu1 }
 0xaf5   : > { %v2101_v34 = vadd.f32 %v4120_v21, %v3481_v33  ;;  %v3528_v21 = vld [vmem:[%s6225_s1 + $0x408] sm:$0xff] }
 0xaf6   : > { %v2095_v36 = vpop.f32.mrf.mxu1 }
 0xaf7   : > { %v3485_v17 = vmul.f32 -1.442695, %v2101_v34  ;;  %v2096_v37 = vadd.f32 %v3481_v33, %v2095_v36  ;;  %v3529_v33 = vld [vmem:[%s6225_s1 + $0x410] sm:$0xff]  ;;  %v3526_v36 = vld [vmem:[%s6225_s1 + $0x3f8] sm:$0xff] }
 0xaf9   : > { %4502 = vpow2.f32 %v3485_v17  ;;  %v3484_v39 = vmul.f32 -1.442695, %v2096_v37  ;;  %v3525_v17 = vld [vmem:[%s6225_s1 + $0x3f0] sm:$0xff] }
 0xafb   : > { %4504 = vpow2.f32 %v3484_v39  ;;  %v3523_v39 = vld [vmem:[%s6225_s1 + $0x3e0] sm:$0xff] }
 0xb06   : > { %v4503_v29 = vpop.eup %4502 }
 0xb07   : > { %v2111_v40 = vadd.f32 1.0, %v4503_v29  ;;  %v3522_v29 = vld [vmem:[%s6225_s1 + $0x3d8] sm:$0xff] }
 0xb08   : > { %v4505_v32 = vpop.eup %4504 }
 0xb09   : > { %4506 = vrcp.f32 %v2111_v40  ;;  %v2110_v41 = vadd.f32 1.0, %v4505_v32  ;;  %v3521_v40 = vld [vmem:[%s6225_s1 + $0x3d0] sm:$0xff]  ;;  %v3516_v32 = vld [vmem:[%s6211_s2 + $0x9] ss:$0 sm:$0xff] }
 0xb0b   : > { %4508 = vrcp.f32 %v2110_v41 }
 0xb16   : > { %v4507_v46 = vpop.eup %4506 }
 0xb17   : > { %v2117_v38 = vmul.f32 %v4507_v46, %v2101_v34  ;;  %v3527_v34 = vld [vmem:[%s6225_s1 + $0x400] sm:$0xff] }
 0xb18   : > { %v4509_v48 = vpop.eup %4508 }
 0xb19   : > { %v2116_v49 = vmul.f32 %v4509_v48, %v2096_v37  ;;  %2133 = vrot.lane.b32.xlu1 %v2117_v38, %s4674_s13  ;;  %v2127_v50 = vrot.slane %v2117_v38, 1  ;;  %v2121_v51 = vrot.slane %v2117_v38, 7  ;;  %v3524_v37 = vld [vmem:[%s6225_s1 + $0x3e8] sm:$0xff]  ;;  %v3519_v48 = vld [vmem:[%s6225_s1 + $0x3c0] sm:$0xff] }
 0xb1a   : > { %v3520_v38 = vld [vmem:[%s6225_s1 + $0x3c8] sm:$0xff] }
 0xb1b   : > { %v2120_v53 = vrot.slane %v2116_v49, 7  ;;  %2131 = vrot.lane.b32.xlu0 %v2116_v49, %s4674_s13  ;;  %v2130_v42 = vsel %vm653_vm4, %v2127_v50, 0.0  ;;  %v2126_v54 = vrot.slane %v2116_v49, 1 }
 0xb1d   : > { %2140 = vrot.lane.b32.xlu1 %v2130_v42, %s4676_s21  ;;  %v2128_v56 = vsel %vm653_vm4, %v2126_v54, %v2127_v50  ;;  %v2122_v52 = vsel %vm333_vm0, %v2120_v53, %v2121_v51  ;;  %v2125_v55 = vsel %vm333_vm0, 0.0, %v2120_v53 }
 0xb1f   : > { %2138 = vrot.lane.b32.xlu0 %v2128_v56, %s4676_s21 }
 0xb8b   : > { %v2134_v47 = vpop.permute.xlu1 %2133 }
 0xb8c   : > { %v2145_v62 = vsel %vm398_vm1, %v2122_v52, %v2134_v47 }
 0xb8d   : > { %v2132_v57 = vpop.permute.xlu0 %2131 }
 0xb8e   : > { %v2144_v60 = vsel %vm398_vm1, %v2125_v55, %v2132_v57  ;;  %v3546_v55 = vld [vmem:[%s6225_s1 + $0x478] sm:$0xff] }
 0xb8f   : > { %v2141_v58 = vpop.permute.xlu1 %2140 }
 0xb90   : > { %v2147_v0 = vsel %vm407_vm2, %v2145_v62, %v2141_v58  ;;  %v3545_v58 = vld [vmem:[%s6225_s1 + $0x470] sm:$0xff]  ;;  %v3542_v62 = vld [vmem:[%s6225_s1 + $0x458] sm:$0xff] }
 0xb91   : > { %v2139_v61 = vpop.permute.xlu0 %2138 }
 0xb92   : > { %v2146_v63 = vsel %vm407_vm2, %v2144_v60, %v2139_v61  ;;  %v3544_v60 = vld [vmem:[%s6225_s1 + $0x468] sm:$0xff]  ;;  %v3543_v61 = vld [vmem:[%s6225_s1 + $0x460] sm:$0xff] }
 0xb93   : > { %4145 = vmatprep.mubr.msk.f32.mxu0 %vm435_vm3, %v2146_v63  ;;  %v3541_v63 = vld [vmem:[%s6225_s1 + $0x450] sm:$0xff] }
 0xb94   : > { %4146 = vmatmul.mubr.msk.f32.vlgmr.msra.gmra.mxu0 %vm435_vm3, %v2147_v0  ;;  %v3540_v0 = vld [vmem:[%s6225_s1 + $0x448] sm:$0xff] }
 0xb95   : > { %4199 = vmatprep.mubr.msk.f32.mxu0 %vm4678_vm5, %v4677_v3  ;;  %4176 = vmatpush3.msra.mxu0 %v3530_v31  ;;  %v3556_v31 = vld [vmem:[%s6225_s1 + $0x4b0] sm:$0xff] }
 0xb96   : > { %4177 = vmatprep.subr.mxu0 %v4677_v3 }
 0xb97   : > { %4178 = vmatpush3.msra.mxu0 %v3529_v33  ;;  %v3555_v33 = vld [vmem:[%s6225_s1 + $0x4a8] sm:$0xff] }
 0xb98   : > { %4179 = vmatprep.subr.mxu0 %v4677_v3 }
 0xb99   : > { %4180 = vmatpush3.msra.mxu0 %v3528_v21  ;;  %v3554_v21 = vld [vmem:[%s6225_s1 + $0x4a0] sm:$0xff] }
 0xb9a   : > { %4181 = vmatprep.subr.mxu0 %v4677_v3 }
 0xb9b   : > { %4182 = vmatpush3.msra.mxu0 %v3527_v34  ;;  %v3553_v34 = vld [vmem:[%s6225_s1 + $0x498] sm:$0xff] }
 0xb9c   : > { %4183 = vmatprep.subr.mxu0 %v4677_v3 }
 0xb9d   : > { %4184 = vmatpush3.msra.mxu0 %v3526_v36  ;;  %v3552_v36 = vld [vmem:[%s6225_s1 + $0x490] sm:$0xff] }
 0xb9e   : > { %4185 = vmatprep.subr.mxu0 %v4677_v3 }
 0xb9f   : > { %4186 = vmatpush3.msra.mxu0 %v3525_v17  ;;  %v3551_v17 = vld [vmem:[%s6225_s1 + $0x488] sm:$0xff] }
 0xba0   : > { %4187 = vmatprep.subr.mxu0 %v4677_v3 }
 0xba1   : > { %4188 = vmatpush3.msra.mxu0 %v3524_v37  ;;  %v3550_v37 = vld [vmem:[%s6225_s1 + $0x480] sm:$0xff] }
 0xba2   : > { %4189 = vmatprep.subr.mxu0 %v4677_v3 }
 0xba3   : > { %4190 = vmatpush3.msra.mxu0 %v3523_v39  ;;  %v3548_v39 = vld [vmem:[%s6211_s2 + $0xb] ss:$0 sm:$0xff] }
 0xba4   : > { %4191 = vmatprep.subr.mxu0 %v4677_v3 }
 0xba5   : > { %4192 = vmatpush3.msra.mxu0 %v3522_v29 }
 0xba6   : > { %4193 = vmatprep.subr.mxu0 %v4677_v3 }
 0xba7   : > { %4194 = vmatpush3.msra.mxu0 %v3521_v40 }
 0xba8   : > { %4195 = vmatprep.subr.mxu0 %v4677_v3 }
 0xba9   : > { %4196 = vmatpush3.msra.mxu0 %v3520_v38 }
 0xbaa   : > { %4197 = vmatprep.subr.mxu0 %v4677_v3 }
 0xbab   : > { %4198 = vmatpush3.msra.mxu0 %v3519_v48 }
 0xbac   : > { %4229 = vmatprep.subr.mxu0 %v4677_v3 }
 0xc54   : > { %v4147_v18 = vpop.f32.mrf.mxu0 }
 0xc55   : > { %v2247_v14 = vadd.f32 %v4147_v18, %v3499_v12 }
 0xc56   : > { %v2241_v20 = vpop.f32.mrf.mxu0 }
 0xc57   : > { %v2251_v22 = vadd.f32 %v2247_v14, %v5553_v4  ;;  %v2242_v16 = vadd.f32 %v3499_v12, %v2241_v20  ;;  %v3535_v12 = vld [vmem:[%s6225_s1 + $0x420] sm:$0xff] }
 0xc59   : > { %2253 = vst.msk [vmem:[%s5686_s17 + $0x8] sm:$0xff] %vm398_vm1, %v2251_v22  ;;  %v2250_v4 = vadd.f32 %v2242_v16, %v5555_v5 }
 0xc5b   : > { %2252 = vst.msk [vmem:[%s5686_s17] sm:$0xff] %vm398_vm1, %v2250_v4 }
 0xc62   : > { %v3502_v19 = vld [vmem:[%s5686_s17 + $0x1] ss:$2 sm:$0xff]  ;;  %v2254_v25 = vld [vmem:[%s5686_s17] ss:$2 sm:$0xff] }
 0xc63   : > { %2265 = vrot.lane.b32.xlu1 %v3502_v19, %s4676_s21  ;;  %2262 = vrot.lane.b32.xlu0 %v2254_v25, %s4674_s13  ;;  %v2258_v26 = vrot.slane %v3502_v19, 7 }
 0xc65   : > { %v2260_v27 = vsel %vm333_vm0, 0.0, %v2258_v26 }
 0xcd5   : > { %v2266_v23 = vpop.permute.xlu1 %2265  ;;  %v2263_v28 = vpop.permute.xlu0 %2262 }
 0xcd6   : > { %v2268_v5 = vsel %vm398_vm1, %v2260_v27, %v2263_v28  ;;  %v3560_v27 = vld [vmem:[%s6225_s1 + $0x4d0] sm:$0xff]  ;;  %v3559_v28 = vld [vmem:[%s6225_s1 + $0x4c8] sm:$0xff] }
 0xcd7   : > { %v2269_v30 = vsel %vm407_vm2, %v2268_v5, %v2266_v23  ;;  %v3561_v23 = vld [vmem:[%s6225_s1 + $0x4d8] sm:$0xff]  ;;  %v3558_v5 = vld [vmem:[%s6225_s1 + $0x4c0] sm:$0xff] }
 0xcd8   : > { %4173 = vmatmul.mubr.msk.f32.vlgmr.msra.gmra.mxu1 %vm435_vm3, %v2269_v30  ;;  %v3557_v30 = vld [vmem:[%s6225_s1 + $0x4b8] sm:$0xff] }
 0xcd9   : > { %4226 = vmatprep.mubr.msk.f32.mxu1 %vm4678_vm5, %v4677_v3  ;;  %4203 = vmatpush3.msra.mxu1 %v3546_v55  ;;  %v3583_v55 = vld [vmem:[%s6225_s1 + $0x550] sm:$0xff] }
 0xcda   : > { %4204 = vmatprep.subr.mxu1 %v4677_v3 }
 0xcdb   : > { %4205 = vmatpush3.msra.mxu1 %v3545_v58  ;;  %v3582_v58 = vld [vmem:[%s6225_s1 + $0x548] sm:$0xff] }
 0xcdc   : > { %4206 = vmatprep.subr.mxu1 %v4677_v3 }
 0xcdd   : > { %4207 = vmatpush3.msra.mxu1 %v3544_v60  ;;  %v3581_v60 = vld [vmem:[%s6225_s1 + $0x540] sm:$0xff] }
 0xcde   : > { %4208 = vmatprep.subr.mxu1 %v4677_v3 }
 0xcdf   : > { %4209 = vmatpush3.msra.mxu1 %v3543_v61  ;;  %v3577_v61 = vld [vmem:[%s6225_s1 + $0x538] sm:$0xff] }
 0xce0   : > { %4210 = vmatprep.subr.mxu1 %v4677_v3 }
 0xce1   : > { %4211 = vmatpush3.msra.mxu1 %v3542_v62  ;;  %v3576_v62 = vld [vmem:[%s6225_s1 + $0x530] sm:$0xff] }
 0xce2   : > { %4212 = vmatprep.subr.mxu1 %v4677_v3 }
 0xce3   : > { %4213 = vmatpush3.msra.mxu1 %v3541_v63  ;;  %v3575_v63 = vld [vmem:[%s6225_s1 + $0x528] sm:$0xff] }
 0xce4   : > { %4214 = vmatprep.subr.mxu1 %v4677_v3 }
 0xce5   : > { %4215 = vmatpush3.msra.mxu1 %v3540_v0  ;;  %v3574_v0 = vld [vmem:[%s6225_s1 + $0x520] sm:$0xff] }
 0xce6   : > { %4216 = vmatprep.subr.mxu1 %v4677_v3 }
 0xce7   : > { %4217 = vmatpush3.msra.mxu1 %v3539_v1  ;;  %v3573_v1 = vld [vmem:[%s6225_s1 + $0x518] sm:$0xff] }
 0xce8   : > { %4218 = vmatprep.subr.mxu1 %v4677_v3 }
 0xce9   : > { %4219 = vmatpush3.msra.mxu1 %v3538_v59  ;;  %v3572_v59 = vld [vmem:[%s6225_s1 + $0x510] sm:$0xff] }
 0xcea   : > { %4220 = vmatprep.subr.mxu1 %v4677_v3 }
 0xceb   : > { %4221 = vmatpush3.msra.mxu1 %v3537_v7  ;;  %v3571_v7 = vld [vmem:[%s6225_s1 + $0x508] sm:$0xff] }
 0xcec   : > { %4222 = vmatprep.subr.mxu1 %v4677_v3 }
 0xced   : > { %4223 = vmatpush3.msra.mxu1 %v3536_v9 }
 0xcee   : > { %4224 = vmatprep.subr.mxu1 %v4677_v3 }
 0xcef   : > { %4225 = vmatpush3.msra.mxu1 %v3535_v12 }
 0xcf0   : > { %4256 = vmatprep.subr.mxu1 %v4677_v3 }
 0xd98   : > { %v2360_v41 = vpop.f32.mrf.mxu1 }
 0xd99   : > { %v2361_v43 = vadd.f32 %v3516_v32, %v2360_v41 }
 0xd9a   : > { %v4174_v35 = vpop.f32.mrf.mxu1 }
 0xd9b   : > { %v3518_v44 = vmul.f32 -1.442695, %v2361_v43 }
 0xd9d   : > { %4510 = vpow2.f32 %v3518_v44 }
 0xdaa   : > { %v4511_v45 = vpop.eup %4510 }
 0xdab   : > { %v2367_v46 = vadd.f32 1.0, %v4511_v45 }
 0xdad   : > { %4512 = vrcp.f32 %v2367_v46 }
 0xdba   : > { %v4513_v49 = vpop.eup %4512 }
 0xdbb   : > { %v5757_v50 = vmul.f32 %v4513_v49, %v2361_v43  ;;  %v3592_v49 = vld [vmem:[%s6225_s1 + $0x598] sm:$0xff] }
 0xdbd   : > { %2378 = vrot.lane.b32.xlu0 %v5757_v50, %s4674_s13  ;;  %v2375_v51 = vrot.slane %v5757_v50, 1  ;;  %v2372_v42 = vrot.slane %v5757_v50, 7 }
 0xdbf   : > { %v2377_v53 = vsel %vm653_vm4, %v2375_v51, 0.0  ;;  %v2374_v56 = vsel %vm333_vm0, 0.0, %v2372_v42  ;;  %v3591_v51 = vld [vmem:[%s6225_s1 + $0x590] sm:$0xff]  ;;  %v3589_v42 = vld [vmem:[%s6225_s1 + $0x580] sm:$0xff] }
 0xdc0   : > { %2382 = vrot.lane.b32.xlu1 %v2377_v53, %s4676_s21  ;;  %v3590_v53 = vld [vmem:[%s6225_s1 + $0x588] sm:$0xff] }
 0xe2f   : > { %v2379_v54 = vpop.permute.xlu0 %2378 }
 0xe30   : > { %v2385_v52 = vsel %vm398_vm1, %v2374_v56, %v2379_v54  ;;  %v3588_v54 = vld [vmem:[%s6225_s1 + $0x578] sm:$0xff]  ;;  %v3587_v56 = vld [vmem:[%s6225_s1 + $0x570] sm:$0xff] }
 0xe32   : > { %v2383_v47 = vpop.permute.xlu1 %2382 }
 0xe33   : > { %v2386_v57 = vsel %vm407_vm2, %v2385_v52, %v2383_v47  ;;  %v3586_v52 = vld [vmem:[%s6225_s1 + $0x568] sm:$0xff]  ;;  %v3585_v47 = vld [vmem:[%s6225_s1 + $0x560] sm:$0xff] }
 0xe34   : > { %4200 = vmatmul.mubr.msk.f32.vlgmr.msra.gmra.mxu0 %vm435_vm3, %v2386_v57  ;;  %v3584_v57 = vld [vmem:[%s6225_s1 + $0x558] sm:$0xff] }
 0xe35   : > { %4253 = vmatprep.mubr.msk.f32.mxu0 %vm4678_vm5, %v4677_v3  ;;  %4230 = vmatpush3.msra.mxu0 %v3561_v23 }
 0xe36   : > { %4231 = vmatprep.subr.mxu0 %v4677_v3 }
 0xe37   : > { %4232 = vmatpush3.msra.mxu0 %v3560_v27 }
 0xe38   : > { %4233 = vmatprep.subr.mxu0 %v4677_v3 }
 0xe39   : > { %4234 = vmatpush3.msra.mxu0 %v3559_v28 }
 0xe3a   : > { %4235 = vmatprep.subr.mxu0 %v4677_v3 }
 0xe3b   : > { %4236 = vmatpush3.msra.mxu0 %v3558_v5 }
 0xe3c   : > { %4237 = vmatprep.subr.mxu0 %v4677_v3 }
 0xe3d   : > { %4238 = vmatpush3.msra.mxu0 %v3557_v30 }
 0xe3e   : > { %4239 = vmatprep.subr.mxu0 %v4677_v3 }
 0xe3f   : > { %4240 = vmatpush3.msra.mxu0 %v3556_v31 }
 0xe40   : > { %4241 = vmatprep.subr.mxu0 %v4677_v3 }
 0xe41   : > { %4242 = vmatpush3.msra.mxu0 %v3555_v33 }
 0xe42   : > { %4243 = vmatprep.subr.mxu0 %v4677_v3 }
 0xe43   : > { %4244 = vmatpush3.msra.mxu0 %v3554_v21 }
 0xe44   : > { %4245 = vmatprep.subr.mxu0 %v4677_v3 }
 0xe45   : > { %4246 = vmatpush3.msra.mxu0 %v3553_v34 }
 0xe46   : > { %4247 = vmatprep.subr.mxu0 %v4677_v3 }
 0xe47   : > { %4248 = vmatpush3.msra.mxu0 %v3552_v36 }
 0xe48   : > { %4249 = vmatprep.subr.mxu0 %v4677_v3 }
 0xe49   : > { %4250 = vmatpush3.msra.mxu0 %v3551_v17 }
 0xe4a   : > { %4251 = vmatprep.subr.mxu0 %v4677_v3 }
 0xe4b   : > { %4252 = vmatpush3.msra.mxu0 %v3550_v37 }
 0xe4c   : > { %4283 = vmatprep.subr.mxu0 %v4677_v3 }
 0xef4   : > { %v2477_v8 = vpop.f32.mrf.mxu0 }
 0xef5   : > { %v2478_v10 = vadd.f32 %v3532_v2, %v2477_v8  ;;  %v3570_v2 = vld [vmem:[%s6225_s1 + $0x500] sm:$0xff]  ;;  %v3569_v8 = vld [vmem:[%s6225_s1 + $0x4f8] sm:$0xff] }
 0xef6   : > { %v4201_v11 = vpop.f32.mrf.mxu0 }
 0xef7   : > { %v3534_v13 = vmul.f32 -1.442695, %v2478_v10  ;;  %v3563_v11 = vld [vmem:[%s6211_s2 + $0xc] ss:$0 sm:$0xff] }
 0xef9   : > { %4514 = vpow2.f32 %v3534_v13 }
 0xf06   : > { %v4515_v6 = vpop.eup %4514 }
 0xf07   : > { %v2484_v15 = vadd.f32 1.0, %v4515_v6 }
 0xf09   : > { %4516 = vrcp.f32 %v2484_v15 }
 0xf16   : > { %v4517_v18 = vpop.eup %4516 }
 0xf17   : > { %v2487_v14 = vmul.f32 %v4517_v18, %v2478_v10  ;;  %v3568_v10 = vld [vmem:[%s6225_s1 + $0x4f0] sm:$0xff] }
 0xf19   : > { %2495 = vrot.lane.b32.xlu0 %v2487_v14, %s4674_s13  ;;  %v2492_v20 = vrot.slane %v2487_v14, 1  ;;  %v2489_v16 = vrot.slane %v2487_v14, 7  ;;  %v3594_v14 = vld [vmem:[%s6211_s2 + $0xe] ss:$0 sm:$0xff] }
 0xf1b   : > { %v2494_v22 = vsel %vm653_vm4, %v2492_v20, 0.0  ;;  %v2491_v4 = vsel %vm333_vm0, 0.0, %v2489_v16  ;;  %v3566_v16 = vld [vmem:[%s6225_s1 + $0x4e0] sm:$0xff] }
 0xf1c   : > { %2499 = vrot.lane.b32.xlu1 %v2494_v22, %s4676_s21  ;;  %v3567_v22 = vld [vmem:[%s6225_s1 + $0x4e8] sm:$0xff] }
 0xf8b   : > { %v2496_v24 = vpop.permute.xlu0 %2495 }
 0xf8c   : > { %v2502_v19 = vsel %vm398_vm1, %v2491_v4, %v2496_v24 }
 0xf8e   : > { %v2500_v25 = vpop.permute.xlu1 %2499 }
 0xf8f   : > { %v2503_v26 = vsel %vm407_vm2, %v2502_v19, %v2500_v25 }
 0xf90   : > { %4227 = vmatmul.mubr.msk.f32.vlgmr.msra.gmra.mxu1 %vm435_vm3, %v2503_v26 }
 0xf91   : > { %4280 = vmatprep.mubr.msk.f32.mxu1 %vm4678_vm5, %v4677_v3  ;;  %4257 = vmatpush3.msra.mxu1 %v3577_v61 }
 0xf92   : > { %4258 = vmatprep.subr.mxu1 %v4677_v3 }
 0xf93   : > { %4259 = vmatpush3.msra.mxu1 %v3576_v62 }
 0xf94   : > { %4260 = vmatprep.subr.mxu1 %v4677_v3 }
 0xf95   : > { %4261 = vmatpush3.msra.mxu1 %v3575_v63 }
 0xf96   : > { %4262 = vmatprep.subr.mxu1 %v4677_v3 }
 0xf97   : > { %4263 = vmatpush3.msra.mxu1 %v3574_v0 }
 0xf98   : > { %4264 = vmatprep.subr.mxu1 %v4677_v3 }
 0xf99   : > { %4265 = vmatpush3.msra.mxu1 %v3573_v1 }
 0xf9a   : > { %4266 = vmatprep.subr.mxu1 %v4677_v3 }
 0xf9b   : > { %4267 = vmatpush3.msra.mxu1 %v3572_v59 }
 0xf9c   : > { %4268 = vmatprep.subr.mxu1 %v4677_v3 }
 0xf9d   : > { %4269 = vmatpush3.msra.mxu1 %v3571_v7 }
 0xf9e   : > { %4270 = vmatprep.subr.mxu1 %v4677_v3 }
 0xf9f   : > { %4271 = vmatpush3.msra.mxu1 %v3570_v2 }
 0xfa0   : > { %4272 = vmatprep.subr.mxu1 %v4677_v3 }
 0xfa1   : > { %4273 = vmatpush3.msra.mxu1 %v3569_v8 }
 0xfa2   : > { %4274 = vmatprep.subr.mxu1 %v4677_v3 }
 0xfa3   : > { %4275 = vmatpush3.msra.mxu1 %v3568_v10 }
 0xfa4   : > { %4276 = vmatprep.subr.mxu1 %v4677_v3 }
 0xfa5   : > { %4277 = vmatpush3.msra.mxu1 %v3567_v22 }
 0xfa6   : > { %4278 = vmatprep.subr.mxu1 %v4677_v3 }
 0xfa7   : > { %4279 = vmatpush3.msra.mxu1 %v3566_v16 }
 0xfa8   : > { %4310 = vmatprep.subr.mxu1 %v4677_v3 }
0x1050   : > { %v2594_v29 = vpop.f32.mrf.mxu1 }
0x1051   : > { %v2595_v40 = vadd.f32 %v3548_v39, %v2594_v29  ;;  %v3608_v29 = vld [vmem:[%s6225_s1 + $0x5f8] sm:$0xff] }
0x1052   : > { %v4228_v32 = vpop.f32.mrf.mxu1 }
0x1053   : > { %v2598_v41 = vadd.f32 %v2595_v40, %v5757_v50  ;;  %v3607_v32 = vld [vmem:[%s6225_s1 + $0x5f0] sm:$0xff] }
0x1055   : > { %2606 = vrot.lane.b32.xlu0 %v2598_v41, %s4674_s13  ;;  %v2603_v43 = vrot.slane %v2598_v41, 1  ;;  %v2600_v44 = vrot.slane %v2598_v41, 7  ;;  %v3606_v41 = vld [vmem:[%s6225_s1 + $0x5e8] sm:$0xff] }
0x1057   : > { %v2605_v35 = vsel %vm653_vm4, %v2603_v43, 0.0  ;;  %v2602_v46 = vsel %vm333_vm0, 0.0, %v2600_v44  ;;  %v3605_v43 = vld [vmem:[%s6225_s1 + $0x5e0] sm:$0xff]  ;;  %v3603_v44 = vld [vmem:[%s6225_s1 + $0x5d0] sm:$0xff] }
0x1058   : > { %2610 = vrot.lane.b32.xlu1 %v2605_v35, %s4676_s21  ;;  %v3604_v35 = vld [vmem:[%s6225_s1 + $0x5d8] sm:$0xff] }
0x10c7   : > { %v2607_v45 = vpop.permute.xlu0 %2606 }
0x10c8   : > { %v2613_v38 = vsel %vm398_vm1, %v2602_v46, %v2607_v45  ;;  %v3602_v45 = vld [vmem:[%s6225_s1 + $0x5c8] sm:$0xff]  ;;  %v3601_v46 = vld [vmem:[%s6225_s1 + $0x5c0] sm:$0xff] }
0x10ca   : > { %v2611_v48 = vpop.permute.xlu1 %2610 }
0x10cb   : > { %v2614_v50 = vsel %vm407_vm2, %v2613_v38, %v2611_v48  ;;  %v3600_v38 = vld [vmem:[%s6225_s1 + $0x5b8] sm:$0xff]  ;;  %v3599_v48 = vld [vmem:[%s6225_s1 + $0x5b0] sm:$0xff] }
0x10cc   : > { %4254 = vmatmul.mubr.msk.f32.vlgmr.msra.gmra.mxu0 %vm435_vm3, %v2614_v50 }
0x10cd   : > { %4284 = vmatpush3.msra.mxu0 %v3592_v49  ;;  %4307 = vmatprep.mubr.msk.f32.mxu0 %vm4678_vm5, %v4677_v3 }
0x10ce   : > { %4285 = vmatprep.subr.mxu0 %v4677_v3 }
0x10cf   : > { %4286 = vmatpush3.msra.mxu0 %v3591_v51 }
0x10d0   : > { %4287 = vmatprep.subr.mxu0 %v4677_v3 }
0x10d1   : > { %4288 = vmatpush3.msra.mxu0 %v3590_v53  ;;  %v3597_v53 = vld [vmem:[%s6225_s1 + $0x5a0] sm:$0xff] }
0x10d2   : > { %4289 = vmatprep.subr.mxu0 %v4677_v3 }
0x10d3   : > { %4290 = vmatpush3.msra.mxu0 %v3589_v42 }
0x10d4   : > { %4291 = vmatprep.subr.mxu0 %v4677_v3 }
0x10d5   : > { %4292 = vmatpush3.msra.mxu0 %v3588_v54 }
0x10d6   : > { %4293 = vmatprep.subr.mxu0 %v4677_v3 }
0x10d7   : > { %4294 = vmatpush3.msra.mxu0 %v3587_v56 }
0x10d8   : > { %4295 = vmatprep.subr.mxu0 %v4677_v3 }
0x10d9   : > { %4296 = vmatpush3.msra.mxu0 %v3586_v52 }
0x10da   : > { %4297 = vmatprep.subr.mxu0 %v4677_v3 }
0x10db   : > { %4298 = vmatpush3.msra.mxu0 %v3585_v47 }
0x10dc   : > { %4299 = vmatprep.subr.mxu0 %v4677_v3 }
0x10dd   : > { %4300 = vmatpush3.msra.mxu0 %v3584_v57 }
0x10de   : > { %4301 = vmatprep.subr.mxu0 %v4677_v3 }
0x10df   : > { %4302 = vmatpush3.msra.mxu0 %v3583_v55 }
0x10e0   : > { %4303 = vmatprep.subr.mxu0 %v4677_v3 }
0x10e1   : > { %4304 = vmatpush3.msra.mxu0 %v3582_v58 }
0x10e2   : > { %4305 = vmatprep.subr.mxu0 %v4677_v3 }
0x10e3   : > { %4306 = vmatpush3.msra.mxu0 %v3581_v60 }
0x10e4   : > { %4308 = vmatmul.mubr.msk.f32.vlgmr.msra.gmra.mxu0 %vm435_vm3, %v2614_v50  ;;  %v3598_v50 = vld [vmem:[%s6225_s1 + $0x5a8] sm:$0xff] }
0x118c   : > { %v2705_v13 = vpop.f32.mrf.mxu0 }
0x118d   : > { %v2706_v6 = vadd.f32 %v3563_v11, %v2705_v13 }
0x118e   : > { %v4255_v15 = vpop.f32.mrf.mxu0 }
0x118f   : > { %v3565_v9 = vmul.f32 -1.442695, %v2706_v6 }
0x1191   : > { %4518 = vpow2.f32 %v3565_v9 }
0x119e   : > { %v4519_v12 = vpop.eup %4518 }
0x119f   : > { %v2712_v18 = vadd.f32 1.0, %v4519_v12 }
0x11a1   : > { %4520 = vrcp.f32 %v2712_v18 }
0x11a4   : > { %v2915_v20 = vpop.f32.mrf.mxu0 }
0x11a5   : > { %v2916_v24 = vadd.f32 %v3594_v14, %v2915_v20 }
0x11a6   : > { %v4309_v4 = vpop.f32.mrf.mxu0 }
0x11a7   : > { %v3596_v19 = vmul.f32 -1.442695, %v2916_v24 }
0x11a9   : > { %4522 = vpow2.f32 %v3596_v19 }
0x11ae   : > { %v4521_v25 = vpop.eup %4520 }
0x11af   : > { %v2715_v26 = vmul.f32 %v4521_v25, %v2706_v6 }
0x11b1   : > { %2723 = vrot.lane.b32.xlu0 %v2715_v26, %s4674_s13  ;;  %v2720_v23 = vrot.slane %v2715_v26, 1  ;;  %v2717_v34 = vrot.slane %v2715_v26, 7 }
0x11b3   : > { %v2722_v27 = vsel %vm653_vm4, %v2720_v23, 0.0  ;;  %v2719_v17 = vsel %vm333_vm0, 0.0, %v2717_v34 }
0x11b4   : > { %2727 = vrot.lane.b32.xlu1 %v2722_v27, %s4676_s21 }
0x11b6   : > { %v4523_v28 = vpop.eup %4522 }
0x11b7   : > { %v2922_v5 = vadd.f32 1.0, %v4523_v28 }
0x11b9   : > { %4524 = vrcp.f32 %v2922_v5 }
0x11c6   : > { %v4525_v30 = vpop.eup %4524 }
0x11c7   : > { %v2925_v31 = vmul.f32 %v4525_v30, %v2916_v24 }
0x11c9   : > { %2933 = vrot.lane.b32.xlu0 %v2925_v31, %s4674_s13  ;;  %v2930_v33 = vrot.slane %v2925_v31, 1  ;;  %v2927_v49 = vrot.slane %v2925_v31, 7  ;;  %s4530_s13 = sshll.u32 %s4679_s19, 4  ;;  %s4531_s13 = int_to_ptr.vmem [resolvable:$false] %s4530_s13 }
0x11ca   : > { %s4532_s16 = scalar_lea.vmem %s4531_s13, 512  ;;  %p4533_p0 = scmp.lt.s32.totalorder %s6064_s20, %s4531_s13 }
0x11cb   : > { %v2932_v21 = vsel %vm653_vm4, %v2930_v33, 0.0  ;;  %v2929_v42 = vsel %vm333_vm0, 0.0, %v2927_v49  ;;  %p4534_p1 = scmp.lt.s32.totalorder %s4532_s16, %s4526_s23 }
0x11cc   : > { %2937 = vrot.lane.b32.xlu1 %v2932_v21, %s4676_s21  ;;  %s3627_s21 = sshll.u32 %s4746_s28, 8 }
0x11cd   : > { %s6061_s8 = scalar_lea.hbm %s6216_s7, %s3627_s21  ;;  %p4535_p2 = por %p4534_p1, %p4533_p0 }
0x11cf   : > { %p4536_p3 = pnand %p4535_p2, %p4529_p13 }
0x1223   : > { %v2724_v36 = vpop.permute.xlu0 %2723 }
0x1224   : > { %v2730_v37 = vsel %vm398_vm1, %v2719_v17, %v2724_v36 }
0x1226   : > { %v2728_v39 = vpop.permute.xlu1 %2727 }
0x1227   : > { %v2731_v40 = vsel %vm407_vm2, %v2730_v37, %v2728_v39 }
0x1228   : > { %4281 = vmatmul.mubr.msk.f32.vlgmr.msra.gmra.mxu1 %vm435_vm3, %v2731_v40 }
0x1229   : > { %4311 = vmatpush3.msra.mxu1 %v3608_v29  ;;  %4334 = vmatprep.mubr.msk.f32.mxu1 %vm4678_vm5, %v4677_v3 }
0x122a   : > { %4312 = vmatprep.subr.mxu1 %v4677_v3 }
0x122b   : > { %4313 = vmatpush3.msra.mxu1 %v3607_v32 }
0x122c   : > { %4314 = vmatprep.subr.mxu1 %v4677_v3 }
0x122d   : > { %4315 = vmatpush3.msra.mxu1 %v3606_v41 }
0x122e   : > { %4316 = vmatprep.subr.mxu1 %v4677_v3 }
0x122f   : > { %4317 = vmatpush3.msra.mxu1 %v3605_v43 }
0x1230   : > { %4318 = vmatprep.subr.mxu1 %v4677_v3 }
0x1231   : > { %4319 = vmatpush3.msra.mxu1 %v3604_v35 }
0x1232   : > { %4320 = vmatprep.subr.mxu1 %v4677_v3 }
0x1233   : > { %4321 = vmatpush3.msra.mxu1 %v3603_v44 }
0x1234   : > { %4322 = vmatprep.subr.mxu1 %v4677_v3 }
0x1235   : > { %4323 = vmatpush3.msra.mxu1 %v3602_v45 }
0x1236   : > { %4324 = vmatprep.subr.mxu1 %v4677_v3 }
0x1237   : > { %4325 = vmatpush3.msra.mxu1 %v3601_v46 }
0x1238   : > { %4326 = vmatprep.subr.mxu1 %v4677_v3 }
0x1239   : > { %4327 = vmatpush3.msra.mxu1 %v3600_v38 }
0x123a   : > { %4328 = vmatprep.subr.mxu1 %v4677_v3 }
0x123b   : > { %4329 = vmatpush3.msra.mxu1 %v3599_v48  ;;  %v2934_v51 = vpop.permute.xlu0 %2933 }
0x123c   : > { %4330 = vmatprep.subr.mxu1 %v4677_v3  ;;  %v2940_v54 = vsel %vm398_vm1, %v2929_v42, %v2934_v51 }
0x123d   : > { %4331 = vmatpush3.msra.mxu1 %v3598_v50 }
0x123e   : > { %4332 = vmatprep.subr.mxu1 %v4677_v3  ;;  %v2938_v56 = vpop.permute.xlu1 %2937 }
0x123f   : > { %v2941_v52 = vsel %vm407_vm2, %v2940_v54, %v2938_v56  ;;  %4333 = vmatpush3.msra.mxu1 %v3597_v53 }
0x1240   : > { %4335 = vmatmul.mubr.msk.f32.vlgmr.msra.gmra.mxu1 %vm435_vm3, %v2941_v52 }
0x1241   : > { %4539 = shalt.err (!%p4536_p3)
}
0x1242   : > { %s4540_s17 = scalar_lea.hbm %s6061_s8, 256  ;;  %s4544_s22 = scalar_lea.hbm %s6216_s7, 512 }
0x1243   : > { %p4541_p4 = scmp.ne.s32.totalorder %s6061_s8, %s4540_s17  ;;  %p4545_p9 = scmp.lt.s32.totalorder %s6061_s8, %s6216_s7 }
0x1244   : > { %p4546_p10 = scmp.lt.s32.totalorder %s4544_s22, %s4540_s17 }
0x1245   : > { %p4542_p7 = pnand %p4541_p4, %p4765_p5 }
0x1246   : > { %p4547_p11 = por %p4546_p10, %p4545_p9 }
0x1247   : > { %p4543_p8 = pneg %p4542_p7 }
0x1249   : > { %p4548_p12 = pnand %p4547_p11, %p4543_p8 }
0x124b   : > { %4551 = shalt.err (!%p4548_p12)
}
0x124c   : > { %s6218_s23 = smov 128   ;;  %s6219_s13 = smov 8   ;;  %v3579_v3 = vld [vmem:[%s6211_s2 + $0xd] ss:$0 sm:$0xff] }
0x124d   : > { %4340 = dma.vmem_to_hbm [thread:$0]  (%p4765_p5), %s6064_s20, 256, %s6061_s8, %s3059_s9, %s6218_s23, %s6218_s23, %s6219_s13  }
0x124e   : > { %s3301_s29 = sshll.u32 %s5463_s15, 3  ;;  %s6220_s21 = sshll.u32 %s4746_s28, 7 }
0x124f   : > { %s278_s18 = scalar_lea.vmem [#allocation2], %s3301_s29  ;;  %s3070_s1 = scalar_lea.hbm %s6212_s3, %s6220_s21 }
0x1250   : > { %s3072_s22 = sshll.u32 %s278_s18, 4  ;;  %s3039_s8 = scalar_lea.sflag [#allocation3], %s5463_s15  ;;  %s3073_s22 = int_to_ptr.vmem [resolvable:$true] %s3072_s22 }
0x1251   : > { %s4552_s20 = scalar_lea.vmem %s3073_s22, 128  ;;  %s4682_s9 = smov [#allocation2]  }
0x1252   : > { %p4553_p13 = scmp.ne.s32.totalorder %s3073_s22, %s4552_s20  ;;  %s4556_s16 = sshll.u32 %s4682_s9, 4  ;;  %s4557_s16 = int_to_ptr.vmem [resolvable:$false] %s4556_s16 }
0x1253   : > { %s4558_s17 = scalar_lea.vmem %s4557_s16, 256  ;;  %p4559_p2 = scmp.lt.s32.totalorder %s3073_s22, %s4557_s16 }
0x1254   : > { %p4554_p0 = pnand %p4553_p13, %p4765_p5  ;;  %p4560_p3 = scmp.lt.s32.totalorder %s4558_s17, %s4552_s20 }
0x1256   : > { %p4555_p1 = pneg %p4554_p0  ;;  %p4561_p4 = por %p4560_p3, %p4559_p2 }
0x1258   : > { %p4562_p7 = pnand %p4561_p4, %p4555_p1 }
0x12e8   : > { %v2822_v47 = vpop.f32.mrf.mxu1 }
0x12e9   : > { %v2823_v57 = vadd.f32 %v3579_v3, %v2822_v47 }
0x12ea   : > { %v4282_v55 = vpop.f32.mrf.mxu1 }
0x12eb   : > { %v2826_v58 = vmax.f32 %v2823_v57, 0.0 }
0x12ed   : > { %2827 = vst.msk [vmem:[%s278_s18] sm:$0xff] %vm398_vm1, %v2826_v58 }
0x12ee   : > { %4565 = shalt.err (!%p4562_p7)
}
0x12ef   : > { %s4566_s0 = scalar_lea.hbm %s3070_s1, 128  ;;  %s4570_s23 = scalar_lea.hbm %s6212_s3, 256 }
0x12f0   : > { %p4567_p8 = scmp.ne.s32.totalorder %s3070_s1, %s4566_s0  ;;  %p4571_p11 = scmp.lt.s32.totalorder %s3070_s1, %s6212_s3 }
0x12f1   : > { %p4572_p12 = scmp.lt.s32.totalorder %s4570_s23, %s4566_s0 }
0x12f2   : > { %p4568_p9 = pnand %p4567_p8, %p4765_p5 }
0x12f3   : > { %p4573_p13 = por %p4572_p12, %p4571_p11 }
0x12f4   : > { %p4569_p10 = pneg %p4568_p9 }
0x12f6   : > { %p4574_p0 = pnand %p4573_p13, %p4569_p10 }
0x12f8   : > { %4577 = shalt.err (!%p4574_p0)
}
0x12f9   : > { %4337 = dma.vmem_to_hbm [thread:$0]  (%p4765_p5), %s3073_s22, 128, %s3070_s1, %s3039_s8   ;;  %v3610_v60 = vld [vmem:[%s6211_s2 + $0xf] ss:$0 sm:$0xff] }
0x12fa   : > { %s3043_s16 = sand.u32 1, %s4746_s28   ;;  %s285_s23 = scalar_lea.vmem [#allocation4], %s3301_s29 }
0x12fb   : > { %s3085_s13 = sshll.u32 %s285_s23, 4  ;;  %s3626_s21 = sshll.u32 %s4746_s28, 9  ;;  %s6133_s13 = int_to_ptr.vmem [resolvable:$true] %s3085_s13 }
0x12fc   : > { %s3101_s17 = sshll.u32 %s5476_s14, 4  ;;  %s6227_s0 = sshll.u32 %s4746_s28, 7  ;;  %s6140_s17 = int_to_ptr.vmem [resolvable:$true] %s3101_s17 }
0x12fd   : > { %s6131_s1 = scalar_lea.hbm %s6213_s4, %s6227_s0  ;;  %s6138_s15 = scalar_lea.hbm %s6215_s6, %s3626_s21 }
0x12fe   : > { %s6143_s28 = scalar_lea.sflag [#allocation5], %s3043_s16  ;;  %s4578_s14 = scalar_lea.vmem %s6133_s13, 128 }
0x12ff   : > { %p4579_p1 = scmp.ne.s32.totalorder %s6133_s13, %s4578_s14  ;;  %s4683_s29 = smov [#allocation4]  }
0x1300   : > { %v3032_v61 = vpop.f32.mrf.mxu1  ;;  %s4582_s20 = sshll.u32 %s4683_s29, 4  ;;  %s4583_s20 = int_to_ptr.vmem [resolvable:$false] %s4582_s20 }
0x1301   : > { %v3033_v62 = vadd.f32 %v3610_v60, %v3032_v61  ;;  %p4580_p2 = pnand %p4579_p1, %p4765_p5  ;;  %s4584_s9 = scalar_lea.vmem %s4583_s20, 256 }
0x1302   : > { %v4336_v63 = vpop.f32.mrf.mxu1  ;;  %p4585_p4 = scmp.lt.s32.totalorder %s6133_s13, %s4583_s20  ;;  %p4586_p7 = scmp.lt.s32.totalorder %s4584_s9, %s4578_s14 }
0x1303   : > { %v3036_v0 = vmax.f32 %v3033_v62, 0.0  ;;  %p4581_p3 = pneg %p4580_p2 }
0x1304   : > { %p4587_p8 = por %p4586_p7, %p4585_p4 }
0x1305   : > { %3037 = vst.msk [vmem:[%s285_s23] sm:$0xff] %vm398_vm1, %v3036_v0 }
0x1306   : > { %p4588_p9 = pnand %p4587_p8, %p4581_p3 }
0x1308   : > { %4591 = shalt.err (!%p4588_p9)
}
0x1309   : > { %s4592_s16 = scalar_lea.hbm %s6131_s1, 128  ;;  %s4596_s0 = scalar_lea.hbm %s6213_s4, 256 }
0x130a   : > { %p4593_p10 = scmp.ne.s32.totalorder %s6131_s1, %s4592_s16  ;;  %p4597_p13 = scmp.lt.s32.totalorder %s6131_s1, %s6213_s4 }
0x130b   : > { %p4598_p0 = scmp.lt.s32.totalorder %s4596_s0, %s4592_s16 }
0x130c   : > { %p4594_p11 = pnand %p4593_p10, %p4765_p5 }
0x130d   : > { %p4599_p1 = por %p4598_p0, %p4597_p13 }
0x130e   : > { %p4595_p12 = pneg %p4594_p11 }
0x1310   : > { %p4600_p2 = pnand %p4599_p1, %p4595_p12 }
0x1312   : > { %4603 = shalt.err (!%p4600_p2)
}
0x1313   : > { %4338 = dma.vmem_to_hbm [thread:$0]  (%p4765_p5), %s6133_s13, 128, %s6131_s1, %s6143_s28  }
0x1314   : > { %s4604_s22 = scalar_lea.vmem %s6140_s17, 512  ;;  %s4684_s8 = smov [#allocation6]  }
0x1315   : > { %p4605_p3 = scmp.ne.s32.totalorder %s6140_s17, %s4604_s22  ;;  %s4608_s14 = sshll.u32 %s4684_s8, 4  ;;  %s4609_s14 = int_to_ptr.vmem [resolvable:$false] %s4608_s14 }
0x1316   : > { %s4610_s29 = scalar_lea.vmem %s4609_s14, 1024  ;;  %p4611_p8 = scmp.lt.s32.totalorder %s6140_s17, %s4609_s14 }
0x1317   : > { %p4606_p4 = pnand %p4605_p3, %p4765_p5  ;;  %p4612_p9 = scmp.lt.s32.totalorder %s4610_s29, %s4604_s22 }
0x1319   : > { %p4607_p7 = pneg %p4606_p4  ;;  %p4613_p10 = por %p4612_p9, %p4611_p8 }
0x131b   : > { %p4614_p11 = pnand %p4613_p10, %p4607_p7 }
0x131d   : > { %4617 = shalt.err (!%p4614_p11)
}
0x131e   : > { %s4618_s20 = scalar_lea.hbm %s6138_s15, 512  ;;  %s4622_s9 = scalar_lea.hbm %s6215_s6, 1024 }
0x131f   : > { %p4619_p12 = scmp.ne.s32.totalorder %s6138_s15, %s4618_s20  ;;  %p4623_p1 = scmp.lt.s32.totalorder %s6138_s15, %s6215_s6 }
0x1320   : > { %p4624_p2 = scmp.lt.s32.totalorder %s4622_s9, %s4618_s20 }
0x1321   : > { %p4620_p13 = pnand %p4619_p12, %p4765_p5 }
0x1322   : > { %p4625_p3 = por %p4624_p2, %p4623_p1 }
0x1323   : > { %p4621_p0 = pneg %p4620_p13 }
0x1325   : > { %p4626_p4 = pnand %p4625_p3, %p4621_p0 }
0x1327   : > { %4629 = shalt.err (!%p4626_p4)
}
0x1328   : > { %s6228_s21 = smov 8   ;;  %s6229_s0 = smov 128  }
0x1329   : > { %4339 = dma.vmem_to_hbm [thread:$0]  (%p4765_p5), %s6140_s17, 512, %s6138_s15, %s6143_s28, %s6229_s0, %s6229_s0, %s6228_s21  }
0x132a PF: > { %p4358_p7 = scmp.ge.s32.totalorder %s4672_s27, 2  ;;  %s3132_s18 = sand.u32 1, %s4660_s24  }
0x132b   : > { %s3133_s19 = scalar_lea.sflag [#allocation3], %s3132_s18 }
0x132c   : > { %p4346_p8 = pnand %p4358_p7, %p4769_p6 }
0x132e   : > { %p4347_p9 = pneg %p4346_p8 }
0x1330   : > { %4647 = dma.done.wait (%p4347_p9), %s3133_s19, 128  }
0x1331   : > { %4649 = vsyncadd (%p4347_p9), %s3133_s19, 4294967168  ;;  %s6230_s11 = sadd.s32 4294967294, %s4672_s27  }
0x1332   : > { %s3141_s22 = sand.u32 1, %s6230_s11  }
0x1333   : > { %s3142_s8 = scalar_lea.sflag [#allocation5], %s3141_s22 }
0x1334   : > { %4651 = dma.done.wait (%p4347_p9), %s3142_s8, 640  }
0x1335   : > { %4653 = vsyncadd (%p4347_p9), %s3142_s8, 4294966656  ;;  %s3168_s14 = scalar_lea.sflag [#allocation8], %s3132_s18 }
0x1336   : > { %4655 = dma.done.wait (%p4347_p9), %s3168_s14, 256  }
0x1337   : > { %4657 = vsyncadd (%p4347_p9), %s3168_s14, 4294967040  ;;  %p24_p5 = scmp.ge.s32.totalorder %s4750_s30, 4   ;;  %s6231_s24 = smov %s4664_s25 }
0x1338   : > { %s6232_s25 = smov %s4668_s26  ;;  %s6233_s26 = smov %s4763_s10 }
0x1339   : > { %s6234_s27 = smov %s4750_s30  ;;  %26 = sbr.rel (!%p24_p5) target bundleno = 10 (0xa), region = 169 }
0x133e   :  { %3173 = vsyncpa [#allocation3], 1 }
0x133f   :  { %3175 = vsyncpa [#allocation3 + $0x1], 1 }
0x1340   :  { %3176 = vsyncpa [#allocation5], 1 }
0x1341   :  { %3178 = vsyncpa [#allocation5 + $0x1], 1 }
0x1342   :  { %3179 = vsyncpa [#allocation8], 1 }
0x1343   :  { %3181 = vsyncpa [#allocation8 + $0x1], 1 }

</bundles_post_ra>
